<compile_context>
chip_gen: v5e
topology: v5e:2x2
jax: 0.10.0
libtpu: 0.0.40
codegen_flags: <defaults>
</compile_context>

<pallas_src>
import functools

import jax
import jax.numpy as jnp
from jax.experimental import pallas as pl
from jax.experimental.pallas import tpu as pltpu


def _round_up(x, m):
    return (x + m - 1) // m * m


# ------------------------- Pallas kernel (hot path) -------------------------
def convblock_kernel(x_ref, w_ref, shift_ref, o_ref, *, h_out, w_out, kh, kw):
    # x_ref:     (1, Hp, Wp, CI_pad)         zero-padded NHWC input (bf16)
    # w_ref:     (KH*KW, CI_pad, TCO)        BN-scale-folded conv weights (bf16)
    # shift_ref: (1, TCO)                    folded BN shift (f32)
    # o_ref:     (1, H_out, W_out, TCO)      output tile (f32)
    ci = x_ref.shape[-1]
    co = o_ref.shape[-1]
    m = h_out * w_out

    acc = jnp.zeros((m, co), jnp.float32)
    for dh in range(kh):
        for dw in range(kw):
            # Statically-shifted window of the padded input: rows h+dh, cols w+dw.
            xs = x_ref[0, pl.ds(dh, h_out), pl.ds(dw, w_out), :]   # (H_out, W_out, CI)
            xs2 = xs.reshape(m, ci)                                # (M, CI) bf16
            wk = w_ref[dh * kw + dw]                               # (CI, TCO) bf16
            acc = acc + jnp.dot(xs2, wk, preferred_element_type=jnp.float32)

    y = acc + shift_ref[...]      # BN shift (scale already folded into weights)
    y = jnp.maximum(y, 0.0)       # ReLU
    o_ref[0] = y.reshape(h_out, w_out, co).astype(o_ref.dtype)


# ------------------------------- JAX wrapper --------------------------------
def conv_block_forward(x_nchw, params, *, stride=1, padding=1, bn_eps=1e-5):
    """ConvBlock forward: Conv2d (3x3, no bias) + BatchNorm2d (eval) + ReLU."""
    # TODO(synk): only stride=1, dilation=1, groups=1, ReLU activation are
    # implemented in the Pallas path (the conv3x3_block configuration).
    assert stride == 1, "Pallas path implemented for stride=1"

    w = params["conv_weight"]            # (CO, CI, KH, KW) - PyTorch layout
    gamma = params["bn_weight"]          # (CO,)
    beta = params["bn_bias"]             # (CO,)
    mean = params["bn_running_mean"]     # (CO,)
    var = params["bn_running_var"]       # (CO,)

    N, CI, H, W = x_nchw.shape
    CO, _, KH, KW = w.shape
    Hp, Wp = H + 2 * padding, W + 2 * padding
    H_out = Hp - KH + 1
    W_out = Wp - KW + 1

    CI_pad = _round_up(CI, 8)       # keep the contraction dim sublane-friendly
    TCO = 128                       # lane-dense output-channel tile
    CO_pad = _round_up(CO, TCO)
    n_co = CO_pad // TCO

    # --- glue: NCHW -> padded NHWC bf16 ------------------------------------
    # TODO(synk): keeping activations NHWC end-to-end would remove these two
    # HBM transposes; NCHW in/out is kept only to match the PyTorch module.
    x = jnp.transpose(x_nchw, (0, 2, 3, 1))
    x = jnp.pad(x, ((0, 0), (padding, padding), (padding, padding),
                    (0, CI_pad - CI)))
    x = x.astype(jnp.bfloat16)

    # --- fold BN (eval mode) into weight scale + shift ----------------------
    scale = (gamma / jnp.sqrt(var + bn_eps)).astype(jnp.float32)    # (CO,)
    shift = (beta - mean * scale).astype(jnp.float32)               # (CO,)

    w_f = jnp.transpose(w, (2, 3, 1, 0)).astype(jnp.float32)        # (KH,KW,CI,CO)
    w_f = w_f * scale[None, None, None, :]                          # fold BN scale
    w_f = jnp.pad(w_f, ((0, 0), (0, 0), (0, CI_pad - CI), (0, CO_pad - CO)))
    w_f = w_f.reshape(KH * KW, CI_pad, CO_pad).astype(jnp.bfloat16)

    shift_p = jnp.pad(shift, (0, CO_pad - CO)).reshape(1, CO_pad)

    # --- VMEM budget: double-buffered in/out/weights per grid step ----------
    in_bytes = Hp * Wp * CI_pad * 2
    out_bytes = H_out * W_out * TCO * 4
    w_bytes = KH * KW * CI_pad * TCO * 2
    shift_bytes = TCO * 4
    needed = 2 * (in_bytes + out_bytes + w_bytes + shift_bytes)
    vmem_limit = int(min(max(2 * needed, 32 * 1024 * 1024), 64 * 1024 * 1024))

    kernel = functools.partial(convblock_kernel, h_out=H_out, w_out=W_out,
                               kh=KH, kw=KW)

    # TODO(synk): for very large H*W, add an output-row grid axis with a halo
    # (manual DMA of the (TH+2)-row slab) instead of one whole image per step.
    out = pl.pallas_call(
        kernel,
        out_shape=jax.ShapeDtypeStruct((N, H_out, W_out, CO_pad), jnp.float32),
        grid_spec=pltpu.PrefetchScalarGridSpec(
            num_scalar_prefetch=0,
            grid=(N, n_co),
            in_specs=[
                # Same block index across the CO axis -> input stays resident.
                pl.BlockSpec((1, Hp, Wp, CI_pad), lambda n, c: (n, 0, 0, 0)),
                pl.BlockSpec((KH * KW, CI_pad, TCO), lambda n, c: (0, 0, c)),
                pl.BlockSpec((1, TCO), lambda n, c: (0, c)),
            ],
            out_specs=pl.BlockSpec((1, H_out, W_out, TCO),
                                   lambda n, c: (n, 0, 0, c)),
        ),
        compiler_params=pltpu.CompilerParams(
            dimension_semantics=("parallel", "parallel"),
            vmem_limit_bytes=vmem_limit,
        ),
    )(x, w_f, shift_p)

    out = out[:, :, :, :CO]                          # drop CO padding
    return jnp.transpose(out, (0, 3, 1, 2))          # NHWC -> NCHW


# ------------------------------ reference (JAX) ------------------------------
def conv_block_reference(x_nchw, params, *, stride=1, padding=1, bn_eps=1e-5):
    w = params["conv_weight"]
    y = jax.lax.conv_general_dilated(
        x_nchw.astype(jnp.float32), w.astype(jnp.float32),
        window_strides=(stride, stride),
        padding=[(padding, padding), (padding, padding)],
        dimension_numbers=("NCHW", "OIHW", "NCHW"),
    )
    scale = params["bn_weight"] / jnp.sqrt(params["bn_running_var"] + bn_eps)
    shift = params["bn_bias"] - params["bn_running_mean"] * scale
    y = y * scale[None, :, None, None] + shift[None, :, None, None]
    return jnp.maximum(y, 0.0)


if __name__ == "__main__":
    key = jax.random.PRNGKey(0)
    k_x, k_w, k_g, k_b, k_m, k_v = jax.random.split(key, 6)

    N, CI, H, W = 2, 4, 16, 16
    CO, KH, KW = 8, 3, 3

    x = jax.random.normal(k_x, (N, CI, H, W), dtype=jnp.float32)
    params = {
        "conv_weight": 0.1 * jax.random.normal(k_w, (CO, CI, KH, KW), jnp.float32),
        "bn_weight": 1.0 + 0.1 * jax.random.normal(k_g, (CO,), jnp.float32),
        "bn_bias": 0.1 * jax.random.normal(k_b, (CO,), jnp.float32),
        "bn_running_mean": 0.05 * jax.random.normal(k_m, (CO,), jnp.float32),
        "bn_running_var": jnp.abs(1.0 + 0.1 * jax.random.normal(k_v, (CO,), jnp.float32)),
    }

    out = conv_block_forward(x, params, stride=1, padding=1)
    out = jax.block_until_ready(out)

    ref = jax.block_until_ready(conv_block_reference(x, params, stride=1, padding=1))
    assert out.shape == (N, CO, H, W), out.shape
    # bf16 operands with f32 accumulation vs f32 reference -> bf16-level tolerance.
    max_err = float(jnp.max(jnp.abs(out - ref)))
    assert jnp.allclose(out, ref, atol=3e-2, rtol=3e-2), f"mismatch, max_err={max_err}"

    print("KERNEL_OK")
</pallas_src>

<mosaic_0001>
module attributes {stable_mosaic.version = 11 : i64} {
  func.func @convblock_kernel(%arg0: i32, %arg1: i32, %arg2: memref<1x18x18x8xbf16, #tpu.memory_space<vmem>>, %arg3: memref<9x8x128xbf16, #tpu.memory_space<vmem>>, %arg4: memref<1x128xf32, #tpu.memory_space<vmem>>, %arg5: memref<1x16x16x128xf32, #tpu.memory_space<vmem>>) attributes {dimension_semantics = [#tpu.dimension_semantics<parallel>, #tpu.dimension_semantics<parallel>], iteration_bounds = array<i64: 2, 1>, scalar_prefetch = 0 : i64, scratch_operands = 0 : i64, tpu.core_type = #tpu.core_type<tc>, window_params = [{transform_indices = @transform_0, window_bounds = array<i64: 1, 18, 18, 8>}, {transform_indices = @transform_1, window_bounds = array<i64: 9, 8, 128>}, {transform_indices = @transform_2, window_bounds = array<i64: 1, 128>}, {transform_indices = @transform_3, window_bounds = array<i64: 1, 16, 16, 128>}]} {
    %cst = arith.constant 0.000000e+00 : f32
    %0 = vector.broadcast %cst : f32 to vector<256x128xf32>
    %c0 = arith.constant 0 : index
    %c0_0 = arith.constant 0 : index
    %c0_1 = arith.constant 0 : index
    %c0_2 = arith.constant 0 : index
    %1 = vector.load %arg2[%c0, %c0_0, %c0_1, %c0_2] : memref<1x18x18x8xbf16, #tpu.memory_space<vmem>>, vector<1x16x16x8xbf16>
    %2 = vector.shape_cast %1 : vector<1x16x16x8xbf16> to vector<16x16x8xbf16>
    %3 = vector.shape_cast %2 : vector<16x16x8xbf16> to vector<256x8xbf16>
    %c0_3 = arith.constant 0 : index
    %c0_4 = arith.constant 0 : index
    %c0_5 = arith.constant 0 : index
    %4 = vector.load %arg3[%c0_3, %c0_4, %c0_5] : memref<9x8x128xbf16, #tpu.memory_space<vmem>>, vector<1x8x128xbf16>
    %5 = vector.shape_cast %4 : vector<1x8x128xbf16> to vector<8x128xbf16>
    %cst_6 = arith.constant dense<0.000000e+00> : vector<256x128xf32>
    %6 = tpu.matmul %3, %5, %cst_6 {dimension_numbers = #tpu.dot_dimension_numbers<[1], [0], [0], [1], [0, 0, 1, 1], [], []>} : vector<256x8xbf16>, vector<8x128xbf16>, vector<256x128xf32> -> vector<256x128xf32>
    %7 = arith.addf %0, %6 : vector<256x128xf32>
    %c0_7 = arith.constant 0 : index
    %c0_8 = arith.constant 0 : index
    %c1 = arith.constant 1 : index
    %c0_9 = arith.constant 0 : index
    %8 = vector.load %arg2[%c0_7, %c0_8, %c1, %c0_9] : memref<1x18x18x8xbf16, #tpu.memory_space<vmem>>, vector<1x16x16x8xbf16>
    %9 = vector.shape_cast %8 : vector<1x16x16x8xbf16> to vector<16x16x8xbf16>
    %10 = vector.shape_cast %9 : vector<16x16x8xbf16> to vector<256x8xbf16>
    %c1_10 = arith.constant 1 : index
    %c0_11 = arith.constant 0 : index
    %c0_12 = arith.constant 0 : index
    %11 = vector.load %arg3[%c1_10, %c0_11, %c0_12] : memref<9x8x128xbf16, #tpu.memory_space<vmem>>, vector<1x8x128xbf16>
    %12 = vector.shape_cast %11 : vector<1x8x128xbf16> to vector<8x128xbf16>
    %cst_13 = arith.constant dense<0.000000e+00> : vector<256x128xf32>
    %13 = tpu.matmul %10, %12, %cst_13 {dimension_numbers = #tpu.dot_dimension_numbers<[1], [0], [0], [1], [0, 0, 1, 1], [], []>} : vector<256x8xbf16>, vector<8x128xbf16>, vector<256x128xf32> -> vector<256x128xf32>
    %14 = arith.addf %7, %13 : vector<256x128xf32>
    %c0_14 = arith.constant 0 : index
    %c0_15 = arith.constant 0 : index
    %c2 = arith.constant 2 : index
    %c0_16 = arith.constant 0 : index
    %15 = vector.load %arg2[%c0_14, %c0_15, %c2, %c0_16] : memref<1x18x18x8xbf16, #tpu.memory_space<vmem>>, vector<1x16x16x8xbf16>
    %16 = vector.shape_cast %15 : vector<1x16x16x8xbf16> to vector<16x16x8xbf16>
    %17 = vector.shape_cast %16 : vector<16x16x8xbf16> to vector<256x8xbf16>
    %c2_17 = arith.constant 2 : index
    %c0_18 = arith.constant 0 : index
    %c0_19 = arith.constant 0 : index
    %18 = vector.load %arg3[%c2_17, %c0_18, %c0_19] : memref<9x8x128xbf16, #tpu.memory_space<vmem>>, vector<1x8x128xbf16>
    %19 = vector.shape_cast %18 : vector<1x8x128xbf16> to vector<8x128xbf16>
    %cst_20 = arith.constant dense<0.000000e+00> : vector<256x128xf32>
    %20 = tpu.matmul %17, %19, %cst_20 {dimension_numbers = #tpu.dot_dimension_numbers<[1], [0], [0], [1], [0, 0, 1, 1], [], []>} : vector<256x8xbf16>, vector<8x128xbf16>, vector<256x128xf32> -> vector<256x128xf32>
    %21 = arith.addf %14, %20 : vector<256x128xf32>
    %c0_21 = arith.constant 0 : index
    %c1_22 = arith.constant 1 : index
    %c0_23 = arith.constant 0 : index
    %c0_24 = arith.constant 0 : index
    %22 = vector.load %arg2[%c0_21, %c1_22, %c0_23, %c0_24] : memref<1x18x18x8xbf16, #tpu.memory_space<vmem>>, vector<1x16x16x8xbf16>
    %23 = vector.shape_cast %22 : vector<1x16x16x8xbf16> to vector<16x16x8xbf16>
    %24 = vector.shape_cast %23 : vector<16x16x8xbf16> to vector<256x8xbf16>
    %c3 = arith.constant 3 : index
    %c0_25 = arith.constant 0 : index
    %c0_26 = arith.constant 0 : index
    %25 = vector.load %arg3[%c3, %c0_25, %c0_26] : memref<9x8x128xbf16, #tpu.memory_space<vmem>>, vector<1x8x128xbf16>
    %26 = vector.shape_cast %25 : vector<1x8x128xbf16> to vector<8x128xbf16>
    %cst_27 = arith.constant dense<0.000000e+00> : vector<256x128xf32>
    %27 = tpu.matmul %24, %26, %cst_27 {dimension_numbers = #tpu.dot_dimension_numbers<[1], [0], [0], [1], [0, 0, 1, 1], [], []>} : vector<256x8xbf16>, vector<8x128xbf16>, vector<256x128xf32> -> vector<256x128xf32>
    %28 = arith.addf %21, %27 : vector<256x128xf32>
    %c0_28 = arith.constant 0 : index
    %c1_29 = arith.constant 1 : index
    %c1_30 = arith.constant 1 : index
    %c0_31 = arith.constant 0 : index
    %29 = vector.load %arg2[%c0_28, %c1_29, %c1_30, %c0_31] : memref<1x18x18x8xbf16, #tpu.memory_space<vmem>>, vector<1x16x16x8xbf16>
    %30 = vector.shape_cast %29 : vector<1x16x16x8xbf16> to vector<16x16x8xbf16>
    %31 = vector.shape_cast %30 : vector<16x16x8xbf16> to vector<256x8xbf16>
    %c4 = arith.constant 4 : index
    %c0_32 = arith.constant 0 : index
    %c0_33 = arith.constant 0 : index
    %32 = vector.load %arg3[%c4, %c0_32, %c0_33] : memref<9x8x128xbf16, #tpu.memory_space<vmem>>, vector<1x8x128xbf16>
    %33 = vector.shape_cast %32 : vector<1x8x128xbf16> to vector<8x128xbf16>
    %cst_34 = arith.constant dense<0.000000e+00> : vector<256x128xf32>
    %34 = tpu.matmul %31, %33, %cst_34 {dimension_numbers = #tpu.dot_dimension_numbers<[1], [0], [0], [1], [0, 0, 1, 1], [], []>} : vector<256x8xbf16>, vector<8x128xbf16>, vector<256x128xf32> -> vector<256x128xf32>
    %35 = arith.addf %28, %34 : vector<256x128xf32>
    %c0_35 = arith.constant 0 : index
    %c1_36 = arith.constant 1 : index
    %c2_37 = arith.constant 2 : index
    %c0_38 = arith.constant 0 : index
    %36 = vector.load %arg2[%c0_35, %c1_36, %c2_37, %c0_38] : memref<1x18x18x8xbf16, #tpu.memory_space<vmem>>, vector<1x16x16x8xbf16>
    %37 = vector.shape_cast %36 : vector<1x16x16x8xbf16> to vector<16x16x8xbf16>
    %38 = vector.shape_cast %37 : vector<16x16x8xbf16> to vector<256x8xbf16>
    %c5 = arith.constant 5 : index
    %c0_39 = arith.constant 0 : index
    %c0_40 = arith.constant 0 : index
    %39 = vector.load %arg3[%c5, %c0_39, %c0_40] : memref<9x8x128xbf16, #tpu.memory_space<vmem>>, vector<1x8x128xbf16>
    %40 = vector.shape_cast %39 : vector<1x8x128xbf16> to vector<8x128xbf16>
    %cst_41 = arith.constant dense<0.000000e+00> : vector<256x128xf32>
    %41 = tpu.matmul %38, %40, %cst_41 {dimension_numbers = #tpu.dot_dimension_numbers<[1], [0], [0], [1], [0, 0, 1, 1], [], []>} : vector<256x8xbf16>, vector<8x128xbf16>, vector<256x128xf32> -> vector<256x128xf32>
    %42 = arith.addf %35, %41 : vector<256x128xf32>
    %c0_42 = arith.constant 0 : index
    %c2_43 = arith.constant 2 : index
    %c0_44 = arith.constant 0 : index
    %c0_45 = arith.constant 0 : index
    %43 = vector.load %arg2[%c0_42, %c2_43, %c0_44, %c0_45] : memref<1x18x18x8xbf16, #tpu.memory_space<vmem>>, vector<1x16x16x8xbf16>
    %44 = vector.shape_cast %43 : vector<1x16x16x8xbf16> to vector<16x16x8xbf16>
    %45 = vector.shape_cast %44 : vector<16x16x8xbf16> to vector<256x8xbf16>
    %c6 = arith.constant 6 : index
    %c0_46 = arith.constant 0 : index
    %c0_47 = arith.constant 0 : index
    %46 = vector.load %arg3[%c6, %c0_46, %c0_47] : memref<9x8x128xbf16, #tpu.memory_space<vmem>>, vector<1x8x128xbf16>
    %47 = vector.shape_cast %46 : vector<1x8x128xbf16> to vector<8x128xbf16>
    %cst_48 = arith.constant dense<0.000000e+00> : vector<256x128xf32>
    %48 = tpu.matmul %45, %47, %cst_48 {dimension_numbers = #tpu.dot_dimension_numbers<[1], [0], [0], [1], [0, 0, 1, 1], [], []>} : vector<256x8xbf16>, vector<8x128xbf16>, vector<256x128xf32> -> vector<256x128xf32>
    %49 = arith.addf %42, %48 : vector<256x128xf32>
    %c0_49 = arith.constant 0 : index
    %c2_50 = arith.constant 2 : index
    %c1_51 = arith.constant 1 : index
    %c0_52 = arith.constant 0 : index
    %50 = vector.load %arg2[%c0_49, %c2_50, %c1_51, %c0_52] : memref<1x18x18x8xbf16, #tpu.memory_space<vmem>>, vector<1x16x16x8xbf16>
    %51 = vector.shape_cast %50 : vector<1x16x16x8xbf16> to vector<16x16x8xbf16>
    %52 = vector.shape_cast %51 : vector<16x16x8xbf16> to vector<256x8xbf16>
    %c7 = arith.constant 7 : index
    %c0_53 = arith.constant 0 : index
    %c0_54 = arith.constant 0 : index
    %53 = vector.load %arg3[%c7, %c0_53, %c0_54] : memref<9x8x128xbf16, #tpu.memory_space<vmem>>, vector<1x8x128xbf16>
    %54 = vector.shape_cast %53 : vector<1x8x128xbf16> to vector<8x128xbf16>
    %cst_55 = arith.constant dense<0.000000e+00> : vector<256x128xf32>
    %55 = tpu.matmul %52, %54, %cst_55 {dimension_numbers = #tpu.dot_dimension_numbers<[1], [0], [0], [1], [0, 0, 1, 1], [], []>} : vector<256x8xbf16>, vector<8x128xbf16>, vector<256x128xf32> -> vector<256x128xf32>
    %56 = arith.addf %49, %55 : vector<256x128xf32>
    %c0_56 = arith.constant 0 : index
    %c2_57 = arith.constant 2 : index
    %c2_58 = arith.constant 2 : index
    %c0_59 = arith.constant 0 : index
    %57 = vector.load %arg2[%c0_56, %c2_57, %c2_58, %c0_59] : memref<1x18x18x8xbf16, #tpu.memory_space<vmem>>, vector<1x16x16x8xbf16>
    %58 = vector.shape_cast %57 : vector<1x16x16x8xbf16> to vector<16x16x8xbf16>
    %59 = vector.shape_cast %58 : vector<16x16x8xbf16> to vector<256x8xbf16>
    %c8 = arith.constant 8 : index
    %c0_60 = arith.constant 0 : index
    %c0_61 = arith.constant 0 : index
    %60 = vector.load %arg3[%c8, %c0_60, %c0_61] : memref<9x8x128xbf16, #tpu.memory_space<vmem>>, vector<1x8x128xbf16>
    %61 = vector.shape_cast %60 : vector<1x8x128xbf16> to vector<8x128xbf16>
    %cst_62 = arith.constant dense<0.000000e+00> : vector<256x128xf32>
    %62 = tpu.matmul %59, %61, %cst_62 {dimension_numbers = #tpu.dot_dimension_numbers<[1], [0], [0], [1], [0, 0, 1, 1], [], []>} : vector<256x8xbf16>, vector<8x128xbf16>, vector<256x128xf32> -> vector<256x128xf32>
    %63 = arith.addf %56, %62 : vector<256x128xf32>
    %c0_63 = arith.constant 0 : index
    %c0_64 = arith.constant 0 : index
    %64 = vector.load %arg4[%c0_63, %c0_64] : memref<1x128xf32, #tpu.memory_space<vmem>>, vector<1x128xf32>
    %65 = vector.broadcast %64 : vector<1x128xf32> to vector<256x128xf32>
    %66 = arith.addf %63, %65 : vector<256x128xf32>
    %cst_65 = arith.constant 0.000000e+00 : f32
    %67 = vector.broadcast %cst_65 : f32 to vector<256x128xf32>
    %68 = arith.maximumf %66, %67 : vector<256x128xf32>
    %69 = vector.shape_cast %68 : vector<256x128xf32> to vector<16x16x128xf32>
    %c0_66 = arith.constant 0 : index
    %c0_67 = arith.constant 0 : index
    %c0_68 = arith.constant 0 : index
    %c0_69 = arith.constant 0 : index
    %70 = vector.load %arg5[%c0_66, %c0_67, %c0_68, %c0_69] : memref<1x16x16x128xf32, #tpu.memory_space<vmem>>, vector<1x16x16x128xf32>
    %71 = vector.shape_cast %70 : vector<1x16x16x128xf32> to vector<16x16x128xf32>
    %72 = vector.shape_cast %69 : vector<16x16x128xf32> to vector<1x16x16x128xf32>
    tpu.vector_store %arg5[%c0_66, %c0_67, %c0_68, %c0_69], %72 {strides = array<i32>} : memref<1x16x16x128xf32, #tpu.memory_space<vmem>>, vector<1x16x16x128xf32>,
    return
  }
  func.func @transform_0(%arg0: i32, %arg1: i32) -> (i32, i32, i32, i32) {
    %c0_i32 = arith.constant 0 : i32
    %c0_i32_0 = arith.constant 0 : i32
    %c0_i32_1 = arith.constant 0 : i32
    %c0_i32_2 = arith.constant 0 : i32
    return %arg0, %c0_i32, %c0_i32_0, %c0_i32_1 : i32, i32, i32, i32
  }
  func.func @transform_1(%arg0: i32, %arg1: i32) -> (i32, i32, i32) {
    %c0_i32 = arith.constant 0 : i32
    %c0_i32_0 = arith.constant 0 : i32
    %c0_i32_1 = arith.constant 0 : i32
    return %c0_i32, %c0_i32_0, %arg1 : i32, i32, i32
  }
  func.func @transform_2(%arg0: i32, %arg1: i32) -> (i32, i32) {
    %c0_i32 = arith.constant 0 : i32
    %c0_i32_0 = arith.constant 0 : i32
    return %c0_i32, %arg1 : i32, i32
  }
  func.func @transform_3(%arg0: i32, %arg1: i32) -> (i32, i32, i32, i32) {
    %c0_i32 = arith.constant 0 : i32
    %c0_i32_0 = arith.constant 0 : i32
    %c0_i32_1 = arith.constant 0 : i32
    return %arg0, %c0_i32, %c0_i32_0, %arg1 : i32, i32, i32, i32
  }
}

</mosaic_0001>

<bundles_post_ra>
// kernel: tpu_custom_call.1
= control target key start
LH: loop header
LB: loop body
LE: loop exit
PB: predicated region body
PF: predicated region fallthrough
CT: control target
= control target key end

     0   :  { %8 = vsyncpa [#allocation3], 0  ;;  %s6686_s0 = inlined_call_operand.vmem [shape: bf16[2,18,18,8], index: 0, kind: input, shape index: {}]   ;;  %s6687_s1 = inlined_call_operand.vmem [shape: bf16[9,8,128], index: 1, kind: input, shape index: {}]   ;;  %s6688_s2 = inlined_call_operand.vmem [shape: f32[1,128], index: 2, kind: input, shape index: {}]   ;;  %s6689_s3 = inlined_call_operand.hbm [shape: f32[2,16,16,128], index: 3, kind: output, shape index: {}]  }
   0x1   :  { %10 = vsyncpa [#allocation3 + $0x1], 0  ;;  %s5204_s12 = smov 0   ;;  %s5206_s13 = smov 0  }
   0x2   :  { %s5208_s14 = smov 0   ;;  %s5210_s15 = smov 0  }
   0x3   :  { %s5212_s16 = smov 0   ;;  %s5214_s17 = smov 0  }
   0x4 LB: > { %s4342_s18 = sadd.s32 4294967295, %s5180_s17   ;;  %s4343_s19 = sadd.s32 4294967294, %s5180_s17   ;;  %s5180_s17 = sphi %s5214_s17, %s16_s17   ;;  %s5176_s16 = sphi %s5212_s16, %s6706_s16   ;;  %s5172_s15 = sphi %s5210_s15, %s6705_s15   ;;  %s5168_s14 = sphi %s5208_s14, %s6704_s14   ;;  %s5164_s13 = sphi %s5206_s13, %s6703_s13   ;;  %s5160_s12 = sphi %s5204_s12, %s6702_s12  }
   0x5   : > { %s28_s20 = sadd.s32 1, %s5176_s16  ;;  %s115_s21 = sadd.s32 1, %s5168_s14 }
   0x6   : > { %p30_p0 = scmp.ge.s32.totalorder %s28_s20, 2  ;;  %p125_p1 = scmp.ne.s32.totalorder %s5168_s14, %s5164_s13 }
   0x7   : > { %p126_p2 = scmp.eq.s32.totalorder %s4342_s18, 1  ;;  %p131_p3 = scmp.ne.s32.totalorder %s5164_s13, %s5160_s12 }
   0x8   : > { %s6708_s20 = smov (%p30_p0, %s28_s20), 0  ;;  %p132_p5 = scmp.eq.s32.totalorder %s4343_s19, 1 }
   0x9   : > { %p5244_p4 = por %p126_p2, %p125_p1  ;;  %s110_s23 = ssub.s32 %s5176_s16, %s6708_s20 }
   0xa   : > { %p4348_p6 = scmp.ge.s32.totalorder %s5180_s17, 1  ;;  %p113_p7 = scmp.eq.s32.totalorder %s110_s23, 0 }
   0xb   : > { %p5251_p8 = por %p132_p5, %p131_p3  ;;  %p171_p9 = scmp.lt.s32.totalorder %s5180_s17, 3 }
   0xc   : > { %s5257_s25 = scalar_select %p113_p7, %s5168_s14, %s115_s21  }
   0xd   : > { %p172_p10 = pnand %p4348_p6, %p171_p9 }
   0xf   : > { %175 = sbr.rel (%p172_p10) target bundleno = 771 (0x303), region = 32 }
  0x14   : > { %v4351_v0 = vld [vmem:[%s6687_s1 + $0x4] sm:$0xf]  ;;  %vm750_vm0 = vcmask 1043456   ;;  %p202_p11 = scmp.lt.s32.totalorder %s5172_s15, 1  ;;  %v4464_v2 = vld [vmem:[%s6687_s1 + $0x8] sm:$0xf] }
  0x15   : > { %v752_v1 = vsel %vm750_vm0, %v4351_v0, 0  ;;  %v1325_v3 = vsel %vm750_vm0, %v4464_v2, 0  ;;  %v4513_v4 = vld [vmem:[%s6687_s1 + $0xc] sm:$0xf]  ;;  %v247_v5 = vld [vmem:[%s6687_s1] sm:$0xf] }
  0x16   : > { %4989 = vmatpush.bf16.msra.mxu1 %v752_v1  ;;  %4990 = vmatpush.bf16.msra.mxu2 %v752_v1  ;;  %s203_s30 = scalar_select %p202_p11, %s5172_s15, 1  ;;  %v4642_v6 = vld [vmem:[%s6687_s1 + $0x10] sm:$0xf]  ;;  %v1612_v7 = vsel %vm750_vm0, %v4513_v4, 0  ;;  %v972_v8 = vsel %vm750_vm0, %v247_v5, 0  ;;  %vm701_vm4 = vcmask 64512  }
  0x17   : > { %4991 = vmatpush.bf16.msra.mxu3 %v752_v1  ;;  %761 = vmatpush.bf16.msra.mxu0 %v752_v1  ;;  %v2266_v9 = vsel %vm750_vm0, %v4642_v6, 0  ;;  %vm264_vm1 = vsmask.f32 3328  ;;  %vm265_vm2 = vsmask.f32 7440  ;;  %vm1111_vm5 = vcmask 1042432  }
  0x18   : > { %s4992_s10 = smul.u32 216, %s203_s30  ;;  %vm5296_vm3 = vmor %vm264_vm1, %vm265_vm2  ;;  %vm1112_vm6 = vcmask 1046532   ;;  %s199_s5 = sand.u32 1, %s5164_s13  }
  0x19   : > { %vm5470_vm7 = vmor %vm1111_vm5, %vm1112_vm6  ;;  %s4349_s8 = sshll.u32 %s199_s5, 8  ;;  %s4988_s18 = sshll.u32 %s5172_s15, 8 }
  0x1a   : > { %1334 = vmatpush.bf16.msrb.mxu2 %v1325_v3  ;;  %981 = vmatpush.bf16.msrb.mxu1 %v972_v8  ;;  %s5284_s19 = scalar_lea.vmem %s6686_s0, %s4992_s10  ;;  %s6354_s9 = scalar_lea.vmem [#allocation2], %s4349_s8 }
  0x1b   : > { %1621 = vmatpush.bf16.msrb.mxu3 %v1612_v7  ;;  %2275 = vmatpush.bf16.msrb.mxu0 %v2266_v9  ;;  %v223_v10 = vld [vmem:[%s5284_s19 + $0x30] sm:$0xf]  ;;  %v224_v11 = vld [vmem:[%s5284_s19 + $0x34] sm:$0xf]  ;;  %v252_v12 = vld [vmem:[%s5284_s19 + $0x38] sm:$0x1]  ;;  %s4239_s23 = scalar_lea.hbm %s6689_s3, %s4988_s18 }
  0x1c   : > { %v364_v13 = vshrl.u32 %v223_v10, 16  ;;  %v367_v14 = vshll.u32 %v223_v10, 16  ;;  %v373_v15 = vshll.u32 %v224_v11, 16  ;;  %v377_v16 = vshrl.u32 %v224_v11, 16  ;;  %v231_v17 = vld [vmem:[%s5284_s19 + $0x60] sm:$0xf] }
  0x1d   : > { %v383_v18 = vshll.u32 %v252_v12, 16  ;;  %v232_v19 = vld [vmem:[%s5284_s19 + $0x64] sm:$0xf]  ;;  %v256_v20 = vld [vmem:[%s5284_s19 + $0x68] sm:$0x1]  ;;  %v460_v21 = vshrl.u32 %v231_v17, 16 }
  0x1e   : > { %v366_v22 = vrot.slane %v364_v13, 4  ;;  %v369_v23 = vrot.slane %v367_v14, 5  ;;  %v375_v24 = vrot.slane %v373_v15, 5  ;;  %v379_v25 = vrot.slane %v377_v16, 4  ;;  %v239_v26 = vld [vmem:[%s5284_s19 + $0x90] sm:$0xf] }
  0x1f   : > { %v385_v27 = vrot.slane %v383_v18, 5  ;;  %v462_v28 = vrot.slane %v460_v21, 4  ;;  %v463_v29 = vshll.u32 %v231_v17, 16  ;;  %v469_v30 = vshll.u32 %v232_v19, 16  ;;  %v240_v35 = vld [vmem:[%s5284_s19 + $0x94] sm:$0xf] }
  0x20   : > { %v370_v31 = vor.u32 %v369_v23, %v366_v22  ;;  %v380_v32 = vor.u32 %v379_v25, %v375_v24  ;;  %v473_v33 = vshrl.u32 %v232_v19, 16  ;;  %v479_v34 = vshll.u32 %v256_v20, 16  ;;  %v260_v45 = vld [vmem:[%s5284_s19 + $0x98] sm:$0x1]  ;;  %v215_v61 = vld [vmem:[%s5284_s19] sm:$0xf] }
  0x21   : > { %v465_v37 = vrot.slane %v463_v29, 5  ;;  %v471_v38 = vrot.slane %v469_v30, 5  ;;  %v556_v39 = vshrl.u32 %v239_v26, 16  ;;  %v559_v47 = vshll.u32 %v239_v26, 16  ;;  %v5309_v1 = vld [vmem:[%s5284_s19 + $0x4] sm:$0xf] }
  0x22   : > { %v371_v40 = vrot.slane %v370_v31, 4  ;;  %v381_v41 = vrot.slane %v380_v32, 4  ;;  %v475_v42 = vrot.slane %v473_v33, 4  ;;  %v481_v43 = vrot.slane %v479_v34, 5  ;;  %v5312_v2 = vld [vmem:[%s5284_s19 + $0x8] sm:$0x1] }
  0x23   : > { %v466_v44 = vor.u32 %v465_v37, %v462_v28  ;;  %v558_v46 = vrot.slane %v556_v39, 4  ;;  %v565_v48 = vshll.u32 %v240_v35, 16  ;;  %v569_v52 = vshrl.u32 %v240_v35, 16  ;;  %v225_v19 = vld [vmem:[%s5284_s19 + $0x3c] sm:$0xf]  ;;  %s4240_s26 = sshll.u32 %s6354_s9, 4  ;;  %s4241_s26 = int_to_ptr.vmem [resolvable:$true] %s4240_s26 }
  0x24   : > { %v376_v49 = vsel %vm5296_vm3, %v371_v40, %v375_v24  ;;  %v386_v50 = vsel %vm5296_vm3, %v381_v41, %v385_v27  ;;  %v476_v51 = vor.u32 %v475_v42, %v471_v38  ;;  %v561_v56 = vrot.slane %v559_v47, 5  ;;  %v5324_v20 = vld [vmem:[%s5284_s19 + $0x40] sm:$0xf]  ;;  %v5329_v25 = vld [vmem:[%s5284_s19 + $0x44] sm:$0x1]  ;;  %s4242_s27 = sshll.u32 %s4239_s23, 4  ;;  %s4243_s27 = int_to_ptr.hbm [resolvable:$true] %s4242_s27 }
  0x25   : > { %v661_v53 = vunpack.c.l.b16 %v376_v49  ;;  %v662_v54 = vunpack.c.l.b16 %v386_v50  ;;  %v467_v55 = vrot.slane %v466_v44, 4  ;;  %v567_v58 = vrot.slane %v565_v48, 5  ;;  %v233_v33 = vld [vmem:[%s5284_s19 + $0x6c] sm:$0xf]  ;;  %v257_v47 = vld [vmem:[%s5284_s19 + $0x74] sm:$0x1] }
  0x26   : > { %v477_v57 = vrot.slane %v476_v51, 4  ;;  %v571_v59 = vrot.slane %v569_v52, 4  ;;  %v575_v60 = vshll.u32 %v260_v45, 16  ;;  %v562_v0 = vor.u32 %v561_v56, %v558_v46  ;;  %s4227_s15 = scalar_lea.sflag [#allocation3], %s199_s5  ;;  %s5116_s28 = sshra.s32 %s4243_s27, 4  ;;  %s5117_s28 = int_to_ptr.hbm [resolvable:$true] %s5116_s28 }
  0x27   : > { %v689_v62 = vpack.c.b16 %v662_v54, %v661_v53  ;;  %v472_v63 = vsel %vm5296_vm3, %v467_v55, %v471_v38  ;;  %v268_v9 = vshrl.u32 %v215_v61, 16  ;;  %v271_v10 = vshll.u32 %v215_v61, 16  ;;  %v241_v61 = vld [vmem:[%s5284_s19 + $0x9c] sm:$0xf]  ;;  %s5118_s29 = scalar_lea.hbm %s5117_s28, 256  ;;  %s5122_s6 = scalar_lea.hbm %s6689_s3, 512 }
  0x28   : > { %v482_v3 = vsel %vm5296_vm3, %v477_v57, %v481_v43  ;;  %v669_v4 = vunpack.c.l.b16 %v472_v63  ;;  %v572_v5 = vor.u32 %v571_v59, %v567_v58  ;;  %v577_v6 = vrot.slane %v575_v60, 5  ;;  %v234_v43 = vld [vmem:[%s5284_s19 + $0x70] sm:$0xf]  ;;  %p5119_p12 = scmp.ne.s32.totalorder %s5117_s28, %s5118_s29  ;;  %p5123_p1 = scmp.lt.s32.totalorder %s5117_s28, %s6689_s3 }
  0x29   : > { %4356 = vmatmul.msk.bf16.vlgmr.msra.gmra.mxu1 %vm701_vm4, %v689_v62  ;;  %v670_v7 = vunpack.c.l.b16 %v482_v3  ;;  %v563_v8 = vrot.slane %v562_v0, 4  ;;  %v277_v12 = vshll.u32 %v5309_v1, 16  ;;  %v281_v13 = vshrl.u32 %v5309_v1, 16  ;;  %v242_v3 = vld [vmem:[%s5284_s19 + $0xa0] sm:$0xf]  ;;  %p5124_p2 = scmp.lt.s32.totalorder %s5122_s6, %s5118_s29 }
  0x2a   : > { %v573_v11 = vrot.slane %v572_v5, 4  ;;  %v287_v14 = vshll.u32 %v5312_v2, 16  ;;  %v270_v17 = vrot.slane %v268_v9, 4  ;;  %v273_v18 = vrot.slane %v271_v10, 5  ;;  %p5120_p13 = pnand %p5119_p12, %p5244_p4 }
  0x2b   : > { %v693_v15 = vpack.c.b16 %v670_v7, %v669_v4  ;;  %v568_v16 = vsel %vm5296_vm3, %v563_v8, %v567_v58  ;;  %v279_v23 = vrot.slane %v277_v12, 5  ;;  %v283_v24 = vrot.slane %v281_v13, 4  ;;  %v261_v8 = vld [vmem:[%s5284_s19 + $0xa4] sm:$0x1]  ;;  %p5125_p3 = por %p5124_p2, %p5123_p1 }
  0x2c   : > { %v578_v21 = vsel %vm5296_vm3, %v573_v11, %v577_v6  ;;  %v677_v22 = vunpack.c.l.b16 %v568_v16  ;;  %v274_v27 = vor.u32 %v273_v18, %v270_v17  ;;  %v289_v28 = vrot.slane %v287_v14, 5  ;;  %p5121_p0 = pneg %p5120_p13 }
  0x2d   : > { %4360 = vmatmul.msk.bf16.vlgmr.msra.gmra.mxu2 %vm701_vm4, %v693_v15  ;;  %v678_v26 = vunpack.c.l.b16 %v578_v21  ;;  %v284_v29 = vor.u32 %v283_v24, %v279_v23  ;;  %v388_v30 = vshrl.u32 %v225_v19, 16  ;;  %v391_v31 = vshll.u32 %v225_v19, 16 }
  0x2e   : > { %v397_v32 = vshll.u32 %v5324_v20, 16  ;;  %v275_v35 = vrot.slane %v274_v27, 4  ;;  %v401_v37 = vshrl.u32 %v5324_v20, 16  ;;  %v407_v38 = vshll.u32 %v5329_v25, 16  ;;  %p5126_p5 = pnand %p5125_p3, %p5121_p0 }
  0x2f   : > { %v697_v34 = vpack.c.b16 %v678_v26, %v677_v22  ;;  %v285_v39 = vrot.slane %v284_v29, 4  ;;  %v390_v40 = vrot.slane %v388_v30, 4  ;;  %v393_v41 = vrot.slane %v391_v31, 5  ;;  %v217_v22 = vld [vmem:[%s5284_s19 + $0xc] sm:$0xf] }
  0x30   : > { %v399_v42 = vrot.slane %v397_v32, 5  ;;  %v280_v44 = vsel %vm5296_vm3, %v275_v35, %v279_v23  ;;  %v403_v45 = vrot.slane %v401_v37, 4  ;;  %v409_v46 = vrot.slane %v407_v38, 5  ;;  %v5358_v32 = vld [vmem:[%s5284_s19 + $0x14] sm:$0x1] }
  0x31   : > { %4364 = vmatmul.msk.bf16.vlgmr.msra.gmra.mxu3 %vm701_vm4, %v697_v34  ;;  %v484_v48 = vshrl.u32 %v233_v33, 16  ;;  %v290_v49 = vsel %vm5296_vm3, %v285_v39, %v289_v28  ;;  %v653_v50 = vunpack.c.l.b16 %v280_v44  ;;  %v394_v51 = vor.u32 %v393_v41, %v390_v40  ;;  %v5355_v28 = vld [vmem:[%s5284_s19 + $0x10] sm:$0xf] }
  0x32   : > { %v487_v52 = vshll.u32 %v233_v33, 16  ;;  %v654_v53 = vunpack.c.l.b16 %v290_v49  ;;  %v404_v54 = vor.u32 %v403_v45, %v399_v42  ;;  %v493_v56 = vshll.u32 %v234_v43, 16 }
  0x33   : > { %v486_v55 = vrot.slane %v484_v48, 4  ;;  %v395_v57 = vrot.slane %v394_v51, 4  ;;  %v497_v59 = vshrl.u32 %v234_v43, 16  ;;  %v503_v60 = vshll.u32 %v257_v47, 16  ;;  %v5368_v47 = vld [vmem:[%s5284_s19 + $0x4c] sm:$0xf] }
  0x34   : > { %v489_v58 = vrot.slane %v487_v52, 5  ;;  %v685_v62 = vpack.c.b16 %v654_v53, %v653_v50  ;;  %v405_v63 = vrot.slane %v404_v54, 4  ;;  %v495_v0 = vrot.slane %v493_v56, 5  ;;  %v5373_v56 = vld [vmem:[%s5284_s19 + $0x50] sm:$0x1] }
  0x35   : > { %v400_v4 = vsel %vm5296_vm3, %v395_v57, %v399_v42  ;;  %v499_v6 = vrot.slane %v497_v59, 4  ;;  %v505_v7 = vrot.slane %v503_v60, 5  ;;  %v580_v11 = vshrl.u32 %v241_v61, 16  ;;  %v227_v42 = vld [vmem:[%s5284_s19 + $0x48] sm:$0xf] }
  0x36   : > { %v490_v5 = vor.u32 %v489_v58, %v486_v55  ;;  %4352 = vmatmul.msk.bf16.vlgmr.msra.gmra.mxu0 %vm701_vm4, %v685_v62  ;;  %v410_v9 = vsel %vm5296_vm3, %v405_v63, %v409_v46  ;;  %v663_v10 = vunpack.c.l.b16 %v400_v4  ;;  %v583_v12 = vshll.u32 %v241_v61, 16 }
  0x37   : > { %v664_v13 = vunpack.c.l.b16 %v410_v9  ;;  %v500_v15 = vor.u32 %v499_v6, %v495_v0  ;;  %v589_v16 = vshll.u32 %v242_v3, 16  ;;  %v582_v17 = vrot.slane %v580_v11, 4 }
  0x38   : > { %v491_v14 = vrot.slane %v490_v5, 4  ;;  %v585_v18 = vrot.slane %v583_v12, 5  ;;  %v593_v19 = vshrl.u32 %v242_v3, 16  ;;  %v599_v21 = vshll.u32 %v261_v8, 16  ;;  %v235_v3 = vld [vmem:[%s5284_s19 + $0x78] sm:$0xf] }
  0x39   : > { %v690_v23 = vpack.c.b16 %v664_v13, %v663_v10  ;;  %v501_v26 = vrot.slane %v500_v15, 4  ;;  %v591_v27 = vrot.slane %v589_v16, 5  ;;  %v292_v35 = vshrl.u32 %v217_v22, 16  ;;  %v236_v8 = vld [vmem:[%s5284_s19 + $0x7c] sm:$0xf] }
  0x3a   : > { %v496_v24 = vsel %vm5296_vm3, %v491_v14, %v495_v0  ;;  %v586_v30 = vor.u32 %v585_v18, %v582_v17  ;;  %v595_v31 = vrot.slane %v593_v19, 4  ;;  %v601_v34 = vrot.slane %v599_v21, 5  ;;  %v258_v16 = vld [vmem:[%s5284_s19 + $0x80] sm:$0x1] }
  0x3b   : > { %v671_v29 = vunpack.c.l.b16 %v496_v24  ;;  %4357 = vmatmul.msk.bf16.gmra.mxu1 %vm701_vm4, %v690_v23  ;;  %v506_v33 = vsel %vm5296_vm3, %v501_v26, %v505_v7  ;;  %v295_v37 = vshll.u32 %v217_v22, 16  ;;  %v301_v41 = vshll.u32 %v5355_v28, 16 }
  0x3c   : > { %v672_v38 = vunpack.c.l.b16 %v506_v33  ;;  %v587_v39 = vrot.slane %v586_v30, 4  ;;  %v596_v40 = vor.u32 %v595_v31, %v591_v27  ;;  %v294_v43 = vrot.slane %v292_v35, 4 }
  0x3d   : > { %v297_v44 = vrot.slane %v295_v37, 5  ;;  %v305_v45 = vshrl.u32 %v5355_v28, 16  ;;  %v311_v46 = vshll.u32 %v5358_v32, 16  ;;  %v303_v51 = vrot.slane %v301_v41, 5 }
  0x3e   : > { %v694_v48 = vpack.c.b16 %v672_v38, %v671_v29  ;;  %v592_v49 = vsel %vm5296_vm3, %v587_v39, %v591_v27  ;;  %v597_v50 = vrot.slane %v596_v40, 4  ;;  %v412_v58 = vshrl.u32 %v227_v42, 16  ;;  %v244_v39 = vld [vmem:[%s5284_s19 + $0xac] sm:$0xf]  ;;  %v262_v40 = vld [vmem:[%s5284_s19 + $0xb0] sm:$0x1] }
  0x3f   : > { %v679_v52 = vunpack.c.l.b16 %v592_v49  ;;  %v298_v53 = vor.u32 %v297_v44, %v294_v43  ;;  %v307_v54 = vrot.slane %v305_v45, 4  ;;  %v313_v55 = vrot.slane %v311_v46, 5 }
  0x40   : > { %4361 = vmatmul.msk.bf16.gmra.mxu2 %vm701_vm4, %v694_v48  ;;  %v602_v57 = vsel %vm5296_vm3, %v597_v50, %v601_v34  ;;  %v415_v59 = vshll.u32 %v227_v42, 16  ;;  %v421_v60 = vshll.u32 %v5368_v47, 16  ;;  %v425_v0 = vshrl.u32 %v5368_v47, 16  ;;  %v243_v34 = vld [vmem:[%s5284_s19 + $0xa8] sm:$0xf] }
  0x41   : > { %v680_v61 = vunpack.c.l.b16 %v602_v57  ;;  %v299_v62 = vrot.slane %v298_v53, 4  ;;  %v308_v63 = vor.u32 %v307_v54, %v303_v51  ;;  %v414_v4 = vrot.slane %v412_v58, 4 }
  0x42   : > { %v417_v5 = vrot.slane %v415_v59, 5  ;;  %v423_v6 = vrot.slane %v421_v60, 5  ;;  %v431_v7 = vshll.u32 %v5373_v56, 16  ;;  %v427_v12 = vrot.slane %v425_v0, 4  ;;  %v219_v59 = vld [vmem:[%s5284_s19 + $0x18] sm:$0xf] }
  0x43   : > { %v698_v9 = vpack.c.b16 %v680_v61, %v679_v52  ;;  %v304_v10 = vsel %vm5296_vm3, %v299_v62, %v303_v51  ;;  %v309_v11 = vrot.slane %v308_v63, 4  ;;  %v508_v17 = vshrl.u32 %v235_v3, 16  ;;  %v5401_v63 = vld [vmem:[%s5284_s19 + $0x1c] sm:$0xf]  ;;  %v5404_v0 = vld [vmem:[%s5284_s19 + $0x20] sm:$0x1] }
  0x44   : > { %v655_v13 = vunpack.c.l.b16 %v304_v10  ;;  %v418_v14 = vor.u32 %v417_v5, %v414_v4  ;;  %v433_v15 = vrot.slane %v431_v7, 5  ;;  %v428_v19 = vor.u32 %v427_v12, %v423_v6 }
  0x45   : > { %4365 = vmatmul.msk.bf16.gmra.mxu3 %vm701_vm4, %v698_v9  ;;  %v314_v18 = vsel %vm5296_vm3, %v309_v11, %v313_v55  ;;  %v511_v21 = vshll.u32 %v235_v3, 16  ;;  %v517_v22 = vshll.u32 %v236_v8, 16  ;;  %v510_v26 = vrot.slane %v508_v17, 4 }
  0x46   : > { %v656_v23 = vunpack.c.l.b16 %v314_v18  ;;  %v419_v24 = vrot.slane %v418_v14, 4  ;;  %v521_v27 = vshrl.u32 %v236_v8, 16  ;;  %v429_v29 = vrot.slane %v428_v19, 4 }
  0x47   : > { %v513_v30 = vrot.slane %v511_v21, 5  ;;  %v519_v31 = vrot.slane %v517_v22, 5  ;;  %v527_v33 = vshll.u32 %v258_v16, 16  ;;  %v604_v48 = vshrl.u32 %v243_v34, 16  ;;  %v5414_v21 = vld [vmem:[%s5284_s19 + $0x58] sm:$0xf] }
  0x48   : > { %v686_v35 = vpack.c.b16 %v656_v23, %v655_v13  ;;  %v424_v37 = vsel %vm5296_vm3, %v419_v24, %v423_v6  ;;  %v523_v38 = vrot.slane %v521_v27, 4  ;;  %v434_v41 = vsel %vm5296_vm3, %v429_v29, %v433_v15  ;;  %v229_v15 = vld [vmem:[%s5284_s19 + $0x54] sm:$0xf]  ;;  %v5419_v27 = vld [vmem:[%s5284_s19 + $0x5c] sm:$0x1] }
  0x49   : > { %v665_v42 = vunpack.c.l.b16 %v424_v37  ;;  %v514_v43 = vor.u32 %v513_v30, %v510_v26  ;;  %v529_v44 = vrot.slane %v527_v33, 5  ;;  %v666_v45 = vunpack.c.l.b16 %v434_v41 }
  0x4a   : > { %4353 = vmatmul.msk.bf16.gmra.mxu0 %vm701_vm4, %v686_v35  ;;  %v524_v46 = vor.u32 %v523_v38, %v519_v31  ;;  %v607_v49 = vshll.u32 %v243_v34, 16  ;;  %v613_v51 = vshll.u32 %v244_v39, 16  ;;  %v617_v52 = vshrl.u32 %v244_v39, 16  ;;  %v237_v39 = vld [vmem:[%s5284_s19 + $0x84] sm:$0xf] }
  0x4b   : > { %v515_v50 = vrot.slane %v514_v43, 4  ;;  %v623_v53 = vshll.u32 %v262_v40, 16  ;;  %v691_v54 = vpack.c.b16 %v666_v45, %v665_v42  ;;  %v606_v57 = vrot.slane %v604_v48, 4 }
  0x4c   : > { %v525_v55 = vrot.slane %v524_v46, 4  ;;  %v609_v58 = vrot.slane %v607_v49, 5  ;;  %v615_v61 = vrot.slane %v613_v51, 5  ;;  %v619_v62 = vrot.slane %v617_v52, 4  ;;  %v238_v49 = vld [vmem:[%s5284_s19 + $0x88] sm:$0xf] }
  0x4d   : > { %v520_v60 = vsel %vm5296_vm3, %v515_v50, %v519_v31  ;;  %4358 = vmatmul.msk.bf16.gmra.mxu1 %vm701_vm4, %v691_v54  ;;  %v625_v6 = vrot.slane %v623_v53, 5  ;;  %v316_v9 = vshrl.u32 %v219_v59, 16  ;;  %v319_v10 = vshll.u32 %v219_v59, 16  ;;  %v259_v53 = vld [vmem:[%s5284_s19 + $0x8c] sm:$0x1] }
  0x4e   : > { %v530_v3 = vsel %vm5296_vm3, %v525_v55, %v529_v44  ;;  %v673_v4 = vunpack.c.l.b16 %v520_v60  ;;  %v610_v5 = vor.u32 %v609_v58, %v606_v57  ;;  %v620_v8 = vor.u32 %v619_v62, %v615_v61 }
  0x4f   : > { %v674_v7 = vunpack.c.l.b16 %v530_v3  ;;  %v325_v12 = vshll.u32 %v5401_v63, 16  ;;  %v329_v13 = vshrl.u32 %v5401_v63, 16  ;;  %v335_v14 = vshll.u32 %v5404_v0, 16 }
  0x50   : > { %v611_v11 = vrot.slane %v610_v5, 4  ;;  %v621_v17 = vrot.slane %v620_v8, 4  ;;  %v318_v18 = vrot.slane %v316_v9, 4  ;;  %v321_v19 = vrot.slane %v319_v10, 5  ;;  %v245_v8 = vld [vmem:[%s5284_s19 + $0xb4] sm:$0xf] }
  0x51   : > { %v695_v16 = vpack.c.b16 %v674_v7, %v673_v4  ;;  %v327_v23 = vrot.slane %v325_v12, 5  ;;  %v331_v24 = vrot.slane %v329_v13, 4  ;;  %v337_v26 = vrot.slane %v335_v14, 5  ;;  %v246_v12 = vld [vmem:[%s5284_s19 + $0xb8] sm:$0xf] }
  0x52   : > { %v616_v22 = vsel %vm5296_vm3, %v611_v11, %v615_v61  ;;  %v626_v29 = vsel %vm5296_vm3, %v621_v17, %v625_v6  ;;  %v322_v31 = vor.u32 %v321_v19, %v318_v18  ;;  %v436_v33 = vshrl.u32 %v229_v15, 16  ;;  %v263_v17 = vld [vmem:[%s5284_s19 + $0xbc] sm:$0x1] }
  0x53   : > { %4362 = vmatmul.msk.bf16.gmra.mxu2 %vm701_vm4, %v695_v16  ;;  %v681_v30 = vunpack.c.l.b16 %v616_v22  ;;  %v682_v34 = vunpack.c.l.b16 %v626_v29  ;;  %v332_v35 = vor.u32 %v331_v24, %v327_v23  ;;  %v439_v37 = vshll.u32 %v229_v15, 16 }
  0x54   : > { %v445_v38 = vshll.u32 %v5414_v21, 16  ;;  %v323_v40 = vrot.slane %v322_v31, 4  ;;  %v438_v41 = vrot.slane %v436_v33, 4  ;;  %v449_v42 = vshrl.u32 %v5414_v21, 16 }
  0x55   : > { %v455_v43 = vshll.u32 %v5419_v27, 16  ;;  %v699_v44 = vpack.c.b16 %v682_v34, %v681_v30  ;;  %v333_v45 = vrot.slane %v332_v35, 4  ;;  %v441_v46 = vrot.slane %v439_v37, 5  ;;  %v221_v37 = vld [vmem:[%s5284_s19 + $0x24] sm:$0xf] }
  0x56   : > { %v447_v48 = vrot.slane %v445_v38, 5  ;;  %v328_v50 = vsel %vm5296_vm3, %v323_v40, %v327_v23  ;;  %v451_v51 = vrot.slane %v449_v42, 4  ;;  %v532_v54 = vshrl.u32 %v237_v39, 16  ;;  %v5447_v42 = vld [vmem:[%s5284_s19 + $0x28] sm:$0xf] }
  0x57   : > { %v457_v52 = vrot.slane %v455_v43, 5  ;;  %4366 = vmatmul.msk.bf16.gmra.mxu3 %vm701_vm4, %v699_v44  ;;  %v338_v55 = vsel %vm5296_vm3, %v333_v45, %v337_v26  ;;  %v657_v57 = vunpack.c.l.b16 %v328_v50  ;;  %v442_v58 = vor.u32 %v441_v46, %v438_v41 }
  0x58   : > { %v535_v59 = vshll.u32 %v237_v39, 16  ;;  %v658_v60 = vunpack.c.l.b16 %v338_v55  ;;  %v452_v61 = vor.u32 %v451_v51, %v447_v48  ;;  %v534_v62 = vrot.slane %v532_v54, 4 }
  0x59   : > { %v541_v3 = vshll.u32 %v238_v49, 16  ;;  %v443_v4 = vrot.slane %v442_v58, 4  ;;  %v545_v6 = vshrl.u32 %v238_v49, 16  ;;  %v551_v7 = vshll.u32 %v259_v53, 16 }
  0x5a   : > { %v537_v5 = vrot.slane %v535_v59, 5  ;;  %v687_v9 = vpack.c.b16 %v658_v60, %v657_v57  ;;  %v453_v10 = vrot.slane %v452_v61, 4  ;;  %v628_v22 = vshrl.u32 %v245_v8, 16  ;;  %v1063_v61 = vld [vmem:[%s5284_s19] sm:$0xe] }
  0x5b   : > { %v543_v11 = vrot.slane %v541_v3, 5  ;;  %v448_v13 = vsel %vm5296_vm3, %v443_v4, %v447_v48  ;;  %v547_v15 = vrot.slane %v545_v6, 4  ;;  %v553_v16 = vrot.slane %v551_v7, 5  ;;  %v5451_v48 = vld [vmem:[%s5284_s19 + $0x2c] sm:$0x1] }
  0x5c   : > { %v538_v14 = vor.u32 %v537_v5, %v534_v62  ;;  %4354 = vmatmul.msk.bf16.gmra.mxu0 %vm701_vm4, %v687_v9  ;;  %v458_v18 = vsel %vm5296_vm3, %v453_v10, %v457_v52  ;;  %v667_v19 = vunpack.c.l.b16 %v448_v13  ;;  %v631_v23 = vshll.u32 %v245_v8, 16  ;;  %v4594_v6 = vld [vmem:[%s5284_s19 + $0xc] sm:$0xf] }
  0x5d   : > { %v668_v24 = vunpack.c.l.b16 %v458_v18  ;;  %v548_v29 = vor.u32 %v547_v15, %v543_v11  ;;  %v637_v30 = vshll.u32 %v246_v12, 16  ;;  %v630_v31 = vrot.slane %v628_v22, 4 }
  0x5e   : > { %v539_v26 = vrot.slane %v538_v14, 4  ;;  %v633_v33 = vrot.slane %v631_v23, 5  ;;  %v641_v34 = vshrl.u32 %v246_v12, 16  ;;  %v647_v35 = vshll.u32 %v263_v17, 16  ;;  %v4595_v12 = vld [vmem:[%s5284_s19 + $0x10] sm:$0xf] }
  0x5f   : > { %v692_v38 = vpack.c.b16 %v668_v24, %v667_v19  ;;  %v549_v40 = vrot.slane %v548_v29, 4  ;;  %v639_v41 = vrot.slane %v637_v30, 5  ;;  %v1119_v43 = vrot.slane %v5312_v2, 5 }
  0x60   : > { %v544_v39 = vsel %vm5296_vm3, %v539_v26, %v543_v11  ;;  %v634_v45 = vor.u32 %v633_v33, %v630_v31  ;;  %v643_v46 = vrot.slane %v641_v34, 4  ;;  %v649_v50 = vrot.slane %v647_v35, 5  ;;  %v4740_v11 = vld [vmem:[%s6687_s1 + $0x18] sm:$0xf] }
  0x61   : > { %v675_v44 = vunpack.c.l.b16 %v544_v39  ;;  %4359 = vmatmul.msk.bf16.gmra.mxu1 %vm701_vm4, %v692_v38  ;;  %v554_v49 = vsel %vm5296_vm3, %v549_v40, %v553_v16  ;;  %v340_v51 = vshrl.u32 %v221_v37, 16  ;;  %v343_v52 = vshll.u32 %v221_v37, 16  ;;  %v4596_v38 = vld [vmem:[%s5284_s19 + $0x14] sm:$0x1] }
  0x62   : > { %v676_v53 = vunpack.c.l.b16 %v554_v49  ;;  %v635_v54 = vrot.slane %v634_v45, 4  ;;  %v644_v55 = vor.u32 %v643_v46, %v639_v41  ;;  %v349_v2 = vshll.u32 %v5447_v42, 16  ;;  %v4869_v45 = vld [vmem:[%s6687_s1 + $0x1c] sm:$0xf] }
  0x63   : > { %v342_v57 = vrot.slane %v340_v51, 4  ;;  %v345_v58 = vrot.slane %v343_v52, 5  ;;  %v353_v59 = vshrl.u32 %v5447_v42, 16  ;;  %v359_v60 = vshll.u32 %v5451_v48, 16  ;;  %v4940_v51 = vld [vmem:[%s5284_s19] sm:$0xff] }
  0x64   : > { %v696_v62 = vpack.c.b16 %v676_v53, %v675_v44  ;;  %v640_v3 = vsel %vm5296_vm3, %v635_v54, %v639_v41  ;;  %v645_v4 = vrot.slane %v644_v55, 4  ;;  %v351_v5 = vrot.slane %v349_v2, 5  ;;  %v4918_v2 = vld [vmem:[%s6687_s1 + $0x20] sm:$0xf] }
  0x65   : > { %v683_v7 = vunpack.c.l.b16 %v640_v3  ;;  %v346_v8 = vor.u32 %v345_v58, %v342_v57  ;;  %v355_v9 = vrot.slane %v353_v59, 4  ;;  %v361_v10 = vrot.slane %v359_v60, 5 }
  0x66   : > { %4363 = vmatmul.msk.bf16.gmra.mxu2 %vm701_vm4, %v696_v62  ;;  %v650_v13 = vsel %vm5296_vm3, %v645_v4, %v649_v50  ;;  %v4448_v14 = vrot.slane %v1063_v61, 9  ;;  %v1116_v19 = vrot.slane %v5309_v1, 5  ;;  %v2951_v22 = vsel %vm750_vm0, %v4740_v11, 0  ;;  %v4691_v50 = vld [vmem:[%s6687_s1 + $0x14] sm:$0xf] }
  0x67   : > { %v684_v15 = vunpack.c.l.b16 %v650_v13  ;;  %v347_v16 = vrot.slane %v346_v8, 4  ;;  %v356_v17 = vor.u32 %v355_v9, %v351_v5  ;;  %v1784_v23 = vshrl.u32 %v4594_v6, 16  ;;  %2960 = vmatpush.bf16.msra.mxu2 %v2951_v22  ;;  %v1064_v8 = vld [vmem:[%s5284_s19 + $0xc] sm:$0xe] }
  0x68   : > { %v1787_v24 = vshll.u32 %v4594_v6, 16  ;;  %v1793_v26 = vshll.u32 %v4595_v12, 16  ;;  %v1117_v33 = vsel %vm5470_vm7, %v4448_v14, %v1116_v19  ;;  %v1118_v35 = vrot.slane %v1116_v19, 4  ;;  %v4598_v6 = vld [vmem:[%s5284_s19 + $0x1c] sm:$0xf] }
  0x69   : > { %v700_v29 = vpack.c.b16 %v684_v15, %v683_v7  ;;  %v352_v30 = vsel %vm5296_vm3, %v347_v16, %v351_v5  ;;  %v357_v31 = vrot.slane %v356_v17, 4  ;;  %v1228_v37 = vunpack.c.l.b16 %v1117_v33  ;;  %v4597_v5 = vld [vmem:[%s5284_s19 + $0x18] sm:$0xf]  ;;  %v4956_v15 = vld [vmem:[%s5284_s19 + $0xc] sm:$0xff] }
  0x6a   : > { %v659_v34 = vunpack.c.l.b16 %v352_v30  ;;  %v1786_v1 = vrot.slane %v1784_v23, 4  ;;  %v1789_v40 = vrot.slane %v1787_v24, 5  ;;  %v1795_v41 = vrot.slane %v1793_v26, 5  ;;  %v4599_v30 = vld [vmem:[%s5284_s19 + $0x20] sm:$0x1] }
  0x6b   : > { %4367 = vmatmul.msk.bf16.gmra.mxu3 %vm701_vm4, %v700_v29  ;;  %v362_v39 = vsel %vm5296_vm3, %v357_v31, %v361_v10  ;;  %v1797_v44 = vshrl.u32 %v4595_v12, 16  ;;  %v1120_v49 = vsel %vm5470_vm7, %v1118_v35, %v1119_v43  ;;  %v1803_v55 = vshll.u32 %v4596_v38, 16  ;;  %v4941_v35 = vld [vmem:[%s5284_s19 + $0xc] sm:$0xff] }
  0x6c   : > { %v660_v46 = vunpack.c.l.b16 %v362_v39  ;;  %v1229_v52 = vunpack.c.l.b16 %v1120_v49  ;;  %v1790_v53 = vor.u32 %v1789_v40, %v1786_v1  ;;  %v3605_v58 = vsel %vm750_vm0, %v4869_v45, 0 }
  0x6d   : > { %v1799_v54 = vrot.slane %v1797_v44, 4  ;;  %3614 = vmatpush.bf16.msra.mxu3 %v3605_v58  ;;  %v2664_v60 = vsel %vm750_vm0, %v4691_v50, 0  ;;  %v4003_v61 = vsel %vm750_vm0, %v4918_v2, 0  ;;  %v1805_v4 = vrot.slane %v1803_v55, 5  ;;  %v1065_v50 = vld [vmem:[%s5284_s19 + $0x18] sm:$0xe] }
  0x6e   : > { %v688_v57 = vpack.c.b16 %v660_v46, %v659_v34  ;;  %v1260_v43 = vpack.c.b16 %v1229_v52, %v1228_v37  ;;  %2673 = vmatpush.bf16.msra.mxu1 %v2664_v60  ;;  %v1791_v62 = vrot.slane %v1790_v53, 4  ;;  %4012 = vmatpush.bf16.msra.mxu0 %v4003_v61  ;;  %v1123_v7 = vrot.slane %v5355_v28, 5  ;;  %v4601_v46 = vld [vmem:[%s5284_s19 + $0x28] sm:$0xf] }
  0x6f   : > { %v1800_v59 = vor.u32 %v1799_v54, %v1795_v41  ;;  %v1808_v9 = vshrl.u32 %v4597_v5, 16  ;;  %v1811_v10 = vshll.u32 %v4597_v5, 16  ;;  %v1817_v13 = vshll.u32 %v4598_v6, 16 }
  0x70   : > { %4355 = vmatmul.msk.bf16.gmra.mxu0 %vm701_vm4, %v688_v57  ;;  %v1796_v11 = vsel %vm5296_vm3, %v1791_v62, %v1795_v41  ;;  %v1821_v14 = vshrl.u32 %v4598_v6, 16  ;;  %v4449_v16 = vrot.slane %v1064_v8, 9  ;;  %v1125_v17 = vrot.slane %v1123_v7, 4  ;;  %v4600_v41 = vld [vmem:[%s5284_s19 + $0x24] sm:$0xf] }
  0x71   : > { %4432 = vmatmul.msk.bf16.vlgmr.msrb.gmra.mxu1 %vm701_vm4, %v4940_v51  ;;  %v1801_v3 = vrot.slane %v1800_v59, 4  ;;  %v1126_v28 = vrot.slane %v5358_v32, 5  ;;  %v2169_v19 = vunpack.c.l.b16 %v1796_v11  ;;  %v1810_v23 = vrot.slane %v1808_v9, 4  ;;  %v4602_v6 = vld [vmem:[%s5284_s19 + $0x2c] sm:$0x1] }
  0x72   : > { %v1813_v24 = vrot.slane %v1811_v10, 5  ;;  %v1819_v26 = vrot.slane %v1817_v13, 5  ;;  %v1823_v29 = vrot.slane %v1821_v14, 4  ;;  %v1124_v31 = vsel %vm5470_vm7, %v4449_v16, %v1123_v7 }
  0x73   : > { %v1806_v12 = vsel %vm5296_vm3, %v1801_v3, %v1805_v4  ;;  %v1127_v33 = vsel %vm5470_vm7, %v1125_v17, %v1126_v28  ;;  %v1827_v38 = vshll.u32 %v4599_v30, 16  ;;  %v1230_v1 = vunpack.c.l.b16 %v1124_v31 }
  0x74   : > { %v2170_v22 = vunpack.c.l.b16 %v1806_v12  ;;  %v1814_v32 = vor.u32 %v1813_v24, %v1810_v23  ;;  %v1824_v37 = vor.u32 %v1823_v29, %v1819_v26  ;;  %v1231_v39 = vunpack.c.l.b16 %v1127_v33  ;;  %v4942_v12 = vld [vmem:[%s5284_s19 + $0x18] sm:$0xff]  ;;  %v1066_v29 = vld [vmem:[%s5284_s19 + $0x24] sm:$0xe] }
  0x75   : > { %v1829_v45 = vrot.slane %v1827_v38, 5  ;;  %v1130_v51 = vrot.slane %v5401_v63, 5  ;;  %v1832_v52 = vshrl.u32 %v4600_v41, 16  ;;  %v1835_v54 = vshll.u32 %v4600_v41, 16 }
  0x76   : > { %4465 = vmatmul.msk.bf16.vlgmr.msrb.gmra.mxu2 %vm701_vm4, %v1260_v43  ;;  %v2201_v34 = vpack.c.b16 %v2170_v22, %v2169_v19  ;;  %v1815_v40 = vrot.slane %v1814_v32, 4  ;;  %v1825_v44 = vrot.slane %v1824_v37, 4  ;;  %v1261_v49 = vpack.c.b16 %v1231_v39, %v1230_v1  ;;  %v4957_v43 = vld [vmem:[%s5284_s19 + $0x18] sm:$0xff]  ;;  %v4603_v19 = vld [vmem:[%s5284_s19 + $0x30] sm:$0xf]  ;;  %v4958_v32 = vld [vmem:[%s5284_s19 + $0x24] sm:$0xff] }
  0x77   : > { %v1841_v55 = vshll.u32 %v4601_v46, 16  ;;  %v1845_v2 = vshrl.u32 %v4601_v46, 16  ;;  %v4450_v58 = vrot.slane %v1065_v50, 9  ;;  %v1132_v60 = vrot.slane %v1130_v51, 4  ;;  %v4604_v22 = vld [vmem:[%s5284_s19 + $0x34] sm:$0xf] }
  0x78   : > { %v1820_v53 = vsel %vm5296_vm3, %v1815_v40, %v1819_v26  ;;  %v1830_v57 = vsel %vm5296_vm3, %v1825_v44, %v1829_v45  ;;  %v1133_v63 = vrot.slane %v5404_v0, 5  ;;  %v1834_v61 = vrot.slane %v1832_v52, 4  ;;  %v4605_v45 = vld [vmem:[%s5284_s19 + $0x38] sm:$0x1] }
  0x79   : > { %v2171_v59 = vunpack.c.l.b16 %v1820_v53  ;;  %v2172_v62 = vunpack.c.l.b16 %v1830_v57  ;;  %v1837_v3 = vrot.slane %v1835_v54, 5  ;;  %v1843_v4 = vrot.slane %v1841_v55, 5  ;;  %v4607_v57 = vld [vmem:[%s5284_s19 + $0x40] sm:$0xf] }
  0x7a   : > { %v1847_v5 = vrot.slane %v1845_v2, 4  ;;  %v1131_v7 = vsel %vm5470_vm7, %v4450_v58, %v1130_v51  ;;  %v1134_v8 = vsel %vm5470_vm7, %v1132_v60, %v1133_v63  ;;  %v1851_v0 = vshll.u32 %v4602_v6, 16  ;;  %v4606_v2 = vld [vmem:[%s5284_s19 + $0x3c] sm:$0xf]  ;;  %v5051_v63 = vld [vmem:[%s5284_s19 + $0x34] sm:$0xf] }
  0x7b   : > { %4578 = vmatmul.msk.bf16.vlgmr.msrb.gmra.mxu3 %vm701_vm4, %v4956_v15  ;;  %v2202_v9 = vpack.c.b16 %v2172_v62, %v2171_v59  ;;  %v1838_v10 = vor.u32 %v1837_v3, %v1834_v61  ;;  %v1232_v13 = vunpack.c.l.b16 %v1131_v7  ;;  %v1233_v14 = vunpack.c.l.b16 %v1134_v8  ;;  %v1067_v62 = vld [vmem:[%s5284_s19 + $0x30] sm:$0xe] }
  0x7c   : > { %v1848_v11 = vor.u32 %v1847_v5, %v1843_v4  ;;  %v1853_v17 = vrot.slane %v1851_v0, 5  ;;  %v1137_v23 = vrot.slane %v5447_v42, 5  ;;  %v1856_v30 = vshrl.u32 %v4603_v19, 16  ;;  %v5052_v0 = vld [vmem:[%s5284_s19 + $0x38] sm:$0x1] }
  0x7d   : > { %v1839_v15 = vrot.slane %v1838_v10, 4  ;;  %v1262_v28 = vpack.c.b16 %v1233_v14, %v1232_v13  ;;  %v1859_v31 = vshll.u32 %v4603_v19, 16  ;;  %v1865_v33 = vshll.u32 %v4604_v22, 16  ;;  %v4959_v13 = vld [vmem:[%s5284_s19 + $0x30] sm:$0xff] }
  0x7e   : > { %v1849_v16 = vrot.slane %v1848_v11, 4  ;;  %v1139_v37 = vrot.slane %v1137_v23, 4  ;;  %v1140_v42 = vrot.slane %v5451_v48, 5  ;;  %v1858_v39 = vrot.slane %v1856_v30, 4  ;;  %v4943_v48 = vld [vmem:[%s5284_s19 + $0x24] sm:$0xff] }
  0x7f   : > { %v1844_v24 = vsel %vm5296_vm3, %v1839_v15, %v1843_v4  ;;  %v1861_v40 = vrot.slane %v1859_v31, 5  ;;  %v1867_v41 = vrot.slane %v1865_v33, 5  ;;  %v1875_v53 = vshll.u32 %v4605_v45, 16  ;;  %v4944_v33 = vld [vmem:[%s5284_s19 + $0x30] sm:$0xff] }
  0x80   : > { %4643 = vmatmul.msk.bf16.vlgmr.msrb.gmra.mxu0 %vm701_vm4, %v2201_v34  ;;  %v1854_v26 = vsel %vm5296_vm3, %v1849_v16, %v1853_v17  ;;  %v1869_v34 = vshrl.u32 %v4604_v22, 16  ;;  %v2173_v38 = vunpack.c.l.b16 %v1844_v24  ;;  %v1144_v61 = vrot.slane %v5051_v63, 5  ;;  %v4608_v22 = vld [vmem:[%s5284_s19 + $0x44] sm:$0x1] }
  0x81   : > { %4433 = vmatmul.msk.bf16.gmra.mxu1 %vm701_vm4, %v4941_v35  ;;  %v4451_v35 = vrot.slane %v1066_v29, 9  ;;  %v2174_v1 = vunpack.c.l.b16 %v1854_v26  ;;  %v1862_v51 = vor.u32 %v1861_v40, %v1858_v39  ;;  %v1877_v59 = vrot.slane %v1875_v53, 5  ;;  %v4609_v39 = vld [vmem:[%s5284_s19 + $0x48] sm:$0xf]  ;;  %v4610_v40 = vld [vmem:[%s5284_s19 + $0x4c] sm:$0xf] }
  0x82   : > { %v1871_v44 = vrot.slane %v1869_v34, 4  ;;  %v1880_v3 = vshrl.u32 %v4606_v2, 16  ;;  %v1883_v4 = vshll.u32 %v4606_v2, 16  ;;  %v1889_v5 = vshll.u32 %v4607_v57, 16  ;;  %v4960_v2 = vld [vmem:[%s5284_s19 + $0x3c] sm:$0xff] }
  0x83   : > { %v1138_v46 = vsel %vm5470_vm7, %v4451_v35, %v1137_v23  ;;  %v2203_v50 = vpack.c.b16 %v2174_v1, %v2173_v38  ;;  %v1863_v58 = vrot.slane %v1862_v51, 4  ;;  %v1893_v6 = vshrl.u32 %v4607_v57, 16 }
  0x84   : > { %v1872_v52 = vor.u32 %v1871_v44, %v1867_v41  ;;  %v1234_v54 = vunpack.c.l.b16 %v1138_v46  ;;  %v4452_v10 = vrot.slane %v1067_v62, 9  ;;  %v1146_v11 = vrot.slane %v1144_v61, 4 }
  0x85   : > { %v1868_v8 = vsel %vm5296_vm3, %v1863_v58, %v1867_v41  ;;  %v1882_v14 = vrot.slane %v1880_v3, 4  ;;  %v1885_v15 = vrot.slane %v1883_v4, 5  ;;  %v1891_v16 = vrot.slane %v1889_v5, 5  ;;  %v4611_v4 = vld [vmem:[%s5284_s19 + $0x50] sm:$0x1] }
  0x86   : > { %4466 = vmatmul.msk.bf16.gmra.mxu2 %vm701_vm4, %v1261_v49  ;;  %v1141_v49 = vsel %vm5470_vm7, %v1139_v37, %v1140_v42  ;;  %v1895_v17 = vrot.slane %v1893_v6, 4  ;;  %v1145_v23 = vsel %vm5470_vm7, %v4452_v10, %v1144_v61  ;;  %v1899_v30 = vshll.u32 %v4608_v22, 16 }
  0x87   : > { %v1235_v55 = vunpack.c.l.b16 %v1141_v49  ;;  %v1886_v26 = vor.u32 %v1885_v15, %v1882_v14  ;;  %v1904_v51 = vshrl.u32 %v4609_v39, 16  ;;  %v1913_v53 = vshll.u32 %v4610_v40, 16 }
  0x88   : > { %v1896_v29 = vor.u32 %v1895_v17, %v1891_v16  ;;  %v1901_v1 = vrot.slane %v1899_v30, 5 }
  0x89   : > { %v1263_v60 = vpack.c.b16 %v1235_v55, %v1234_v54  ;;  %v1887_v42 = vrot.slane %v1886_v26, 4  ;;  %v1917_v54 = vshrl.u32 %v4610_v40, 16  ;;  %v1915_v62 = vrot.slane %v1913_v53, 5 }
  0x8a   : > { %v1897_v38 = vrot.slane %v1896_v29, 4  ;;  %v1158_v26 = vrot.slane %v5368_v47, 5 }
  0x8b   : > { %4579 = vmatmul.msk.bf16.gmra.mxu3 %vm701_vm4, %v4957_v43  ;;  %v1873_v43 = vrot.slane %v1872_v52, 4  ;;  %v1892_v45 = vsel %vm5296_vm3, %v1887_v42, %v1891_v16  ;;  %v1907_v52 = vshll.u32 %v4609_v39, 16  ;;  %v1919_v3 = vrot.slane %v1917_v54, 4  ;;  %v4614_v54 = vld [vmem:[%s5284_s19 + $0x5c] sm:$0x1] }
  0x8c   : > { %v1902_v46 = vsel %vm5296_vm3, %v1897_v38, %v1901_v1  ;;  %v2177_v55 = vunpack.c.l.b16 %v1892_v45  ;;  %v4961_v1 = vld [vmem:[%s5284_s19 + $0x48] sm:$0xff]  ;;  %v1160_v40 = vrot.slane %v1158_v26, 4 }
  0x8d   : > { %v2178_v57 = vunpack.c.l.b16 %v1902_v46  ;;  %v1909_v61 = vrot.slane %v1907_v52, 5  ;;  %v1920_v10 = vor.u32 %v1919_v3, %v1915_v62 }
  0x8f   : > { %v1921_v16 = vrot.slane %v1920_v10, 4 }
  0x90   : > { %4644 = vmatmul.msk.bf16.gmra.mxu0 %vm701_vm4, %v2202_v9  ;;  %v1878_v9 = vsel %vm5296_vm3, %v1873_v43, %v1877_v59 }
  0x91   : > { %4434 = vmatmul.msk.bf16.gmra.mxu1 %vm701_vm4, %v4942_v12  ;;  %v1147_v12 = vrot.slane %v5052_v0, 5  ;;  %v2176_v19 = vunpack.c.l.b16 %v1878_v9 }
  0x93   : > { %v1148_v24 = vsel %vm5470_vm7, %v1146_v11, %v1147_v12  ;;  %v1923_v11 = vshll.u32 %v4611_v4, 16  ;;  %v4945_v12 = vld [vmem:[%s5284_s19 + $0x3c] sm:$0xff] }
  0x94   : > { %v1237_v35 = vunpack.c.l.b16 %v1148_v24  ;;  %v4613_v24 = vld [vmem:[%s5284_s19 + $0x58] sm:$0xf]  ;;  %v4615_v4 = vld [vmem:[%s5284_s19 + $0x60] sm:$0xf] }
  0x95   : > { %v1925_v17 = vrot.slane %v1923_v11, 5  ;;  %v1941_v42 = vshrl.u32 %v4613_v24, 16 }
  0x96   : > { %4467 = vmatmul.msk.bf16.gmra.mxu2 %vm701_vm4, %v1262_v28  ;;  %v2175_v28 = vunpack.c.l.b16 %v1868_v8  ;;  %v2205_v8 = vpack.c.b16 %v2178_v57, %v2177_v55 }
  0x97   : > { %v1926_v30 = vsel %vm5296_vm3, %v1921_v16, %v1925_v17  ;;  %v1943_v52 = vrot.slane %v1941_v42, 4 }
  0x98   : > { %v2204_v31 = vpack.c.b16 %v2176_v19, %v2175_v28  ;;  %v2180_v46 = vunpack.c.l.b16 %v1926_v30 }
  0x9b   : > { %4580 = vmatmul.msk.bf16.gmra.mxu3 %vm701_vm4, %v4958_v32  ;;  %v1236_v32 = vunpack.c.l.b16 %v1145_v23  ;;  %v4612_v23 = vld [vmem:[%s5284_s19 + $0x54] sm:$0xf] }
  0x9d   : > { %v1264_v44 = vpack.c.b16 %v1237_v35, %v1236_v32  ;;  %v1931_v32 = vshll.u32 %v4612_v23, 16  ;;  %v1937_v35 = vshll.u32 %v4613_v24, 16 }
  0xa0   : > { %4645 = vmatmul.msk.bf16.gmra.mxu0 %vm701_vm4, %v2203_v50  ;;  %v1151_v50 = vrot.slane %v5324_v20, 5  ;;  %v1906_v20 = vrot.slane %v1904_v51, 4  ;;  %v1939_v51 = vrot.slane %v1937_v35, 5  ;;  %v1168_v35 = vrot.slane %v5419_v27, 5 }
  0xa1   : > { %4435 = vmatmul.msk.bf16.gmra.mxu1 %vm701_vm4, %v4943_v48  ;;  %v1068_v48 = vld [vmem:[%s5284_s19 + $0x3c] sm:$0xe] }
  0xa2   : > { %v4453_v43 = vrot.slane %v1068_v48, 9  ;;  %v1153_v59 = vrot.slane %v1151_v50, 4  ;;  %v1933_v48 = vrot.slane %v1931_v32, 5 }
  0xa4   : > { %v1152_v5 = vsel %vm5470_vm7, %v4453_v43, %v1151_v50  ;;  %v4946_v43 = vld [vmem:[%s5284_s19 + $0x48] sm:$0xff] }
  0xa6   : > { %v5565_v7 = vpop.f32.mrf.mxu1  ;;  %4468 = vmatmul.msk.bf16.gmra.mxu2 %vm701_vm4, %v1263_v60  ;;  %v1154_v60 = vrot.slane %v5329_v25, 5  ;;  %v1910_v25 = vor.u32 %v1909_v61, %v1906_v20  ;;  %v1947_v20 = vshll.u32 %v4614_v54, 16  ;;  %v4947_v54 = vld [vmem:[%s5284_s19 + $0x54] sm:$0xff] }
  0xa8   : > { %v1155_v6 = vsel %vm5470_vm7, %v1153_v59, %v1154_v60  ;;  %v1911_v15 = vrot.slane %v1910_v25, 4  ;;  %v1944_v60 = vor.u32 %v1943_v52, %v1939_v51  ;;  %v1949_v10 = vrot.slane %v1947_v20, 5 }
  0xa9   : > { %v1239_v14 = vunpack.c.l.b16 %v1155_v6 }
  0xaa   : > { %v1916_v29 = vsel %vm5296_vm3, %v1911_v15, %v1915_v62  ;;  %v1945_v25 = vrot.slane %v1944_v60, 4  ;;  %v1165_v15 = vrot.slane %v5414_v21, 5 }
  0xab   : > { %4581 = vmatmul.msk.bf16.gmra.mxu3 %vm701_vm4, %v4959_v13  ;;  %v1238_v13 = vunpack.c.l.b16 %v1152_v5  ;;  %v2179_v45 = vunpack.c.l.b16 %v1916_v29  ;;  %v4616_v5 = vld [vmem:[%s5284_s19 + $0x64] sm:$0xf] }
  0xac   : > { %v1965_v16 = vshrl.u32 %v4616_v5, 16  ;;  %v1950_v24 = vsel %vm5296_vm3, %v1945_v25, %v1949_v10  ;;  %v1167_v32 = vrot.slane %v1165_v15, 4  ;;  %v5053_v10 = vld [vmem:[%s5284_s19 + $0x64] sm:$0xf] }
  0xad   : > { %v1265_v19 = vpack.c.b16 %v1239_v14, %v1238_v13  ;;  %v2206_v57 = vpack.c.b16 %v2180_v46, %v2179_v45  ;;  %v1955_v13 = vshll.u32 %v4615_v4, 16  ;;  %v1961_v14 = vshll.u32 %v4616_v5, 16 }
  0xae   : > { %v5581_v34 = vpop.f32.mrf.mxu1  ;;  %v1967_v42 = vrot.slane %v1965_v16, 4 }
  0xaf   : > { %v1957_v30 = vrot.slane %v1955_v13, 5  ;;  %v1071_v13 = vld [vmem:[%s5284_s19 + $0x60] sm:$0xe] }
  0xb0   : > { %v5583_v37 = vpop.f32.mrf.mxu2  ;;  %4646 = vmatmul.msk.bf16.gmra.mxu0 %vm701_vm4, %v2204_v31  ;;  %v1069_v31 = vld [vmem:[%s5284_s19 + $0x48] sm:$0xe] }
  0xb1   : > { %4436 = vmatmul.msk.bf16.gmra.mxu1 %vm701_vm4, %v4944_v33  ;;  %v1928_v33 = vshrl.u32 %v4612_v23, 16  ;;  %v4454_v47 = vrot.slane %v1069_v31, 9  ;;  %v1963_v31 = vrot.slane %v1961_v14, 5 }
  0xb3   : > { %v5589_v41 = vpop.f32.mrf.mxu0  ;;  %v1930_v50 = vrot.slane %v1928_v33, 4  ;;  %v4962_v33 = vld [vmem:[%s5284_s19 + $0x54] sm:$0xff]  ;;  %v1968_v27 = vor.u32 %v1967_v42, %v1963_v31 }
  0xb4   : > { %v5595_v49 = vpop.f32.mrf.mxu3 }
  0xb5   : > { %v1934_v59 = vor.u32 %v1933_v48, %v1930_v50  ;;  %v1169_v48 = vsel %vm5470_vm7, %v1167_v32, %v1168_v35  ;;  %v1969_v60 = vrot.slane %v1968_v27, 4 }
  0xb6   : > { %4469 = vmatmul.msk.bf16.gmra.mxu2 %vm701_vm4, %v1264_v44  ;;  %v1161_v44 = vrot.slane %v5373_v56, 5 }
  0xb8   : > { %v5601_v58 = vpop.f32.mrf.mxu1  ;;  %v5604_v63 = vpop.f32.mrf.mxu2  ;;  %v1162_v56 = vsel %vm5470_vm7, %v1160_v40, %v1161_v44  ;;  %v4617_v40 = vld [vmem:[%s5284_s19 + $0x68] sm:$0x1] }
  0xb9   : > { %v1241_v62 = vunpack.c.l.b16 %v1162_v56 }
  0xbb   : > { %4582 = vmatmul.msk.bf16.gmra.mxu3 %vm701_vm4, %v4960_v2  ;;  %v5612_v9 = vpop.f32.mrf.mxu0  ;;  %v1159_v2 = vsel %vm5470_vm7, %v4454_v47, %v1158_v26  ;;  %v2182_v47 = vunpack.c.l.b16 %v1950_v24 }
  0xbc   : > { %v5614_v0 = vpop.f32.mrf.mxu3  ;;  %v1240_v61 = vunpack.c.l.b16 %v1159_v2 }
  0xbe   : > { %v1266_v11 = vpack.c.b16 %v1241_v62, %v1240_v61  ;;  %v4618_v61 = vld [vmem:[%s5284_s19 + $0x6c] sm:$0xf]  ;;  %v4619_v62 = vld [vmem:[%s5284_s19 + $0x70] sm:$0xf] }
  0xbf   : > { %v1976_v14 = vshrl.u32 %v4618_v61, 16  ;;  %v1985_v16 = vshll.u32 %v4619_v62, 16 }
  0xc0   : > { %4647 = vmatmul.msk.bf16.gmra.mxu0 %vm701_vm4, %v2205_v8  ;;  %v5618_v28 = vpop.f32.mrf.mxu1  ;;  %v1935_v8 = vrot.slane %v1934_v59, 4 }
  0xc1   : > { %4437 = vmatmul.msk.bf16.gmra.mxu1 %vm701_vm4, %v4945_v12  ;;  %v1952_v12 = vshrl.u32 %v4615_v4, 16  ;;  %v1978_v35 = vrot.slane %v1976_v14, 4  ;;  %v4622_v14 = vld [vmem:[%s5284_s19 + $0x7c] sm:$0xf] }
  0xc2   : > { %v1940_v23 = vsel %vm5296_vm3, %v1935_v8, %v1939_v51  ;;  %v1971_v51 = vshll.u32 %v4617_v40, 16 }
  0xc3   : > { %v5621_v22 = vpop.f32.mrf.mxu2  ;;  %v1954_v29 = vrot.slane %v1952_v12, 4 }
  0xc4   : > { %v1973_v20 = vrot.slane %v1971_v51, 5 }
  0xc5   : > { %v1958_v46 = vor.u32 %v1957_v30, %v1954_v29  ;;  %v4963_v30 = vld [vmem:[%s5284_s19 + $0x60] sm:$0xff] }
  0xc6   : > { %4470 = vmatmul.msk.bf16.gmra.mxu2 %vm701_vm4, %v1265_v19  ;;  %v1070_v19 = vld [vmem:[%s5284_s19 + $0x54] sm:$0xe]  ;;  %v1974_v25 = vsel %vm5296_vm3, %v1969_v60, %v1973_v20 }
  0xc7   : > { %v5631_v38 = vpop.f32.mrf.mxu0  ;;  %v4455_v21 = vrot.slane %v1070_v19, 9  ;;  %v1959_v59 = vrot.slane %v1958_v46, 4  ;;  %v1989_v19 = vshrl.u32 %v4619_v62, 16  ;;  %v4620_v46 = vld [vmem:[%s5284_s19 + $0x74] sm:$0x1] }
  0xc8   : > { %v5635_v39 = vpop.f32.mrf.mxu3 }
  0xc9   : > { %v1166_v50 = vsel %vm5470_vm7, %v4455_v21, %v1165_v15  ;;  %v1964_v8 = vsel %vm5296_vm3, %v1959_v59, %v1963_v31  ;;  %v1979_v15 = vshll.u32 %v4618_v61, 16  ;;  %v4456_v21 = vrot.slane %v1071_v13, 9  ;;  %v4621_v13 = vld [vmem:[%s5284_s19 + $0x78] sm:$0xf] }
  0xca   : > { %v5638_v53 = vpop.f32.mrf.mxu1  ;;  %v1242_v56 = vunpack.c.l.b16 %v1166_v50  ;;  %v2183_v31 = vunpack.c.l.b16 %v1964_v8 }
  0xcb   : > { %4583 = vmatmul.msk.bf16.gmra.mxu3 %vm701_vm4, %v4961_v1  ;;  %v5642_v55 = vpop.f32.mrf.mxu2  ;;  %v2181_v1 = vunpack.c.l.b16 %v1940_v23  ;;  %v5054_v23 = vld [vmem:[%s5284_s19 + $0x68] sm:$0x1]  ;;  %v1981_v42 = vrot.slane %v1979_v15, 5  ;;  %v5055_v15 = vld [vmem:[%s5284_s19 + $0x70] sm:$0xf] }
  0xcc   : > { %v1175_v24 = vrot.slane %v5054_v23, 5  ;;  %v1072_v23 = vld [vmem:[%s5284_s19 + $0x6c] sm:$0xe] }
  0xcd   : > { %v2207_v52 = vpack.c.b16 %v2182_v47, %v2181_v1  ;;  %v1987_v1 = vrot.slane %v1985_v16, 5  ;;  %v1991_v47 = vrot.slane %v1989_v19, 4  ;;  %v1982_v51 = vor.u32 %v1981_v42, %v1978_v35  ;;  %v5056_v42 = vld [vmem:[%s5284_s19 + $0x74] sm:$0x1] }
  0xce   : > { %v1179_v16 = vrot.slane %v5055_v15, 5 }
  0xcf   : > { %v5649_v3 = vpop.f32.mrf.mxu0 }
  0xd0   : > { %4648 = vmatmul.msk.bf16.gmra.mxu0 %vm701_vm4, %v2206_v57  ;;  %v5654_v6 = vpop.f32.mrf.mxu3  ;;  %v1243_v57 = vunpack.c.l.b16 %v1169_v48 }
  0xd1   : > { %4438 = vmatmul.msk.bf16.gmra.mxu1 %vm701_vm4, %v4946_v43 }
  0xd2   : > { %v5658_v17 = vpop.f32.mrf.mxu1  ;;  %v1267_v4 = vpack.c.b16 %v1243_v57, %v1242_v56  ;;  %v4948_v57 = vld [vmem:[%s5284_s19 + $0x60] sm:$0xff] }
  0xd6   : > { %v5665_v26 = vpop.f32.mrf.mxu2  ;;  %4471 = vmatmul.msk.bf16.gmra.mxu2 %vm701_vm4, %v1266_v11  ;;  %v1172_v11 = vrot.slane %v5053_v10, 5 }
  0xd8   : > { %v1174_v32 = vrot.slane %v1172_v11, 4  ;;  %v1173_v50 = vsel %vm5470_vm7, %v4456_v21, %v1172_v11  ;;  %v2013_v21 = vshrl.u32 %v4622_v14, 16 }
  0xd9   : > { %v5671_v44 = vpop.f32.mrf.mxu0  ;;  %v1244_v20 = vunpack.c.l.b16 %v1173_v50  ;;  %v4457_v50 = vrot.slane %v1072_v23, 9 }
  0xda   : > { %v5673_v45 = vpop.f32.mrf.mxu3  ;;  %v1176_v48 = vsel %vm5470_vm7, %v1174_v32, %v1175_v24 }
  0xdb   : > { %4584 = vmatmul.msk.bf16.gmra.mxu3 %vm701_vm4, %v4962_v33  ;;  %v2184_v33 = vunpack.c.l.b16 %v1974_v25  ;;  %v1245_v61 = vunpack.c.l.b16 %v1176_v48  ;;  %v1181_v48 = vrot.slane %v1179_v16, 4 }
  0xdd   : > { %v2208_v27 = vpack.c.b16 %v2184_v33, %v2183_v31  ;;  %v1268_v11 = vpack.c.b16 %v1245_v61, %v1244_v20  ;;  %v2003_v31 = vshll.u32 %v4621_v13, 16  ;;  %v2009_v33 = vshll.u32 %v4622_v14, 16 }
  0xde   : > { %v5681_v2 = vpop.f32.mrf.mxu1  ;;  %v5683_v43 = vpop.f32.mrf.mxu2  ;;  %v2015_v20 = vrot.slane %v2013_v21, 4 }
  0xe0   : > { %4649 = vmatmul.msk.bf16.gmra.mxu0 %vm701_vm4, %v2207_v52  ;;  %v1992_v52 = vor.u32 %v1991_v47, %v1987_v1  ;;  %v1182_v47 = vrot.slane %v5056_v42, 5 }
  0xe1   : > { %4439 = vmatmul.msk.bf16.gmra.mxu1 %vm701_vm4, %v4947_v54  ;;  %v5689_v5 = vpop.f32.mrf.mxu0  ;;  %v1995_v54 = vshll.u32 %v4620_v46, 16  ;;  %v4964_v46 = vld [vmem:[%s5284_s19 + $0x6c] sm:$0xff] }
  0xe2   : > { %v5696_v12 = vpop.f32.mrf.mxu3  ;;  %v1993_v8 = vrot.slane %v1992_v52, 4 }
  0xe3   : > { %v1997_v25 = vrot.slane %v1995_v54, 5 }
  0xe6   : > { %4472 = vmatmul.msk.bf16.gmra.mxu2 %vm701_vm4, %v1267_v4  ;;  %v5701_v29 = vpop.f32.mrf.mxu1  ;;  %v1983_v4 = vrot.slane %v1982_v51, 4 }
  0xe8   : > { %v1988_v19 = vsel %vm5296_vm3, %v1983_v4, %v1987_v1  ;;  %v4623_v4 = vld [vmem:[%s5284_s19 + $0x80] sm:$0x1] }
  0xe9   : > { %v5704_v40 = vpop.f32.mrf.mxu2 }
  0xeb   : > { %4585 = vmatmul.msk.bf16.gmra.mxu3 %vm701_vm4, %v4963_v30  ;;  %v2000_v30 = vshrl.u32 %v4621_v13, 16  ;;  %v4949_v13 = vld [vmem:[%s5284_s19 + $0x6c] sm:$0xff] }
  0xed   : > { %v5712_v56 = vpop.f32.mrf.mxu0  ;;  %v2002_v54 = vrot.slane %v2000_v30, 4 }
  0xee   : > { %v5715_v59 = vpop.f32.mrf.mxu3  ;;  %v983_v60 = vpop.f32.mrf.mxu1 }
  0xef   : > { %v984_v62 = vadd.f32 %v983_v60, %v5589_v41  ;;  %v1998_v41 = vsel %vm5296_vm3, %v1993_v8, %v1997_v25  ;;  %v2011_v60 = vrot.slane %v2009_v33, 5  ;;  %v1180_v8 = vsel %vm5470_vm7, %v4457_v50, %v1179_v16 }
  0xf0   : > { %4650 = vmatmul.msk.bf16.gmra.mxu0 %vm701_vm4, %v2208_v27  ;;  %v2185_v27 = vunpack.c.l.b16 %v1988_v19  ;;  %v2186_v51 = vunpack.c.l.b16 %v1998_v41  ;;  %v2019_v19 = vshll.u32 %v4623_v4, 16 }
  0xf1   : > { %v5719_v10 = vpop.f32.mrf.mxu2  ;;  %4440 = vmatmul.msk.bf16.gmra.mxu1 %vm701_vm4, %v4948_v57  ;;  %v2005_v57 = vrot.slane %v2003_v31, 5  ;;  %v2016_v15 = vor.u32 %v2015_v20, %v2011_v60 }
  0xf2   : > { %v2209_v25 = vpack.c.b16 %v2186_v51, %v2185_v27  ;;  %v2021_v42 = vrot.slane %v2019_v19, 5  ;;  %v4625_v27 = vld [vmem:[%s5284_s19 + $0x88] sm:$0xf]  ;;  %v5057_v51 = vld [vmem:[%s5284_s19 + $0x7c] sm:$0xf] }
  0xf3   : > { %v2006_v14 = vor.u32 %v2005_v57, %v2002_v54  ;;  %v1073_v54 = vld [vmem:[%s5284_s19 + $0x78] sm:$0xe] }
  0xf5   : > { %v5730_v24 = vpop.f32.mrf.mxu0  ;;  %v2007_v21 = vrot.slane %v2006_v14, 4 }
  0xf6   : > { %v5732_v32 = vpop.f32.mrf.mxu3  ;;  %4473 = vmatmul.msk.bf16.gmra.mxu2 %vm701_vm4, %v1268_v11  ;;  %v985_v35 = vpop.f32.mrf.mxu1 }
  0xf7   : > { %v986_v1 = vadd.f32 %v985_v35, %v5612_v9  ;;  %v1183_v9 = vsel %vm5470_vm7, %v1181_v48, %v1182_v47  ;;  %v2017_v35 = vrot.slane %v2016_v15, 4  ;;  %v4624_v47 = vld [vmem:[%s5284_s19 + $0x84] sm:$0xf]  ;;  %v4965_v15 = vld [vmem:[%s5284_s19 + $0x78] sm:$0xff] }
  0xf8   : > { %v1247_v30 = vunpack.c.l.b16 %v1183_v9  ;;  %v2027_v57 = vshll.u32 %v4624_v47, 16  ;;  %v2037_v9 = vshrl.u32 %v4625_v27, 16 }
  0xf9   : > { %v1336_v52 = vpop.f32.mrf.mxu2  ;;  %v2022_v4 = vsel %vm5296_vm3, %v2017_v35, %v2021_v42 }
  0xfa   : > { %v1416_v61 = vadd.f32 %v1336_v52, %v984_v62  ;;  %v1246_v62 = vunpack.c.l.b16 %v1180_v8  ;;  %v1186_v52 = vrot.slane %v5057_v51, 5  ;;  %v2033_v8 = vshll.u32 %v4625_v27, 16 }
  0xfb   : > { %4586 = vmatmul.msk.bf16.gmra.mxu3 %vm701_vm4, %v4964_v46  ;;  %v2039_v35 = vrot.slane %v2037_v9, 4 }
  0xfc   : > { %v1269_v48 = vpack.c.b16 %v1247_v30, %v1246_v62 }
  0xfd   : > { %v2277_v11 = vpop.f32.mrf.mxu0 }
  0xfe   : > { %v1623_v41 = vpop.f32.mrf.mxu3  ;;  %v988_v23 = vpop.f32.mrf.mxu1 }
  0xff   : > { %v1703_v31 = vadd.f32 %v1623_v41, %v1416_v61  ;;  %v989_v16 = vadd.f32 %v988_v23, %v5631_v38  ;;  %v2024_v38 = vshrl.u32 %v4624_v47, 16  ;;  %v2012_v61 = vsel %vm5296_vm3, %v2007_v21, %v2011_v60 }
 0x100   : > { %4651 = vmatmul.msk.bf16.gmra.mxu0 %vm701_vm4, %v2209_v25  ;;  %v5058_v25 = vld [vmem:[%s5284_s19 + $0x80] sm:$0x1]  ;;  %v4458_v41 = vrot.slane %v1073_v54, 9  ;;  %v1188_v23 = vrot.slane %v1186_v52, 4  ;;  %v2187_v62 = vunpack.c.l.b16 %v2012_v61  ;;  %v2188_v60 = vunpack.c.l.b16 %v2022_v4 }
 0x101   : > { %v1338_v33 = vpop.f32.mrf.mxu2  ;;  %4441 = vmatmul.msk.bf16.gmra.mxu1 %vm701_vm4, %v4949_v13  ;;  %v5749_v46 = vadd.f32 %v2277_v11, %v1703_v31  ;;  %v1189_v11 = vrot.slane %v5058_v25, 5  ;;  %v2026_v30 = vrot.slane %v2024_v38, 4  ;;  %v2029_v31 = vrot.slane %v2027_v57, 5  ;;  %v4950_v38 = vld [vmem:[%s5284_s19 + $0x78] sm:$0xff] }
 0x102   : > { %v1417_v50 = vadd.f32 %v1338_v33, %v986_v1  ;;  %v2035_v21 = vrot.slane %v2033_v8, 5  ;;  %v2210_v27 = vpack.c.b16 %v2188_v60, %v2187_v62  ;;  %v4628_v62 = vld [vmem:[%s5284_s19 + $0x94] sm:$0xf]  ;;  %v5059_v60 = vld [vmem:[%s5284_s19 + $0x88] sm:$0xf] }
 0x103   : > { %v2030_v51 = vor.u32 %v2029_v31, %v2026_v30  ;;  %v1193_v30 = vrot.slane %v5059_v60, 5  ;;  %v1074_v31 = vld [vmem:[%s5284_s19 + $0x84] sm:$0xe] }
 0x104   : > { %v2040_v57 = vor.u32 %v2039_v35, %v2035_v21 }
 0x105   : > { %v2279_v20 = vpop.f32.mrf.mxu0  ;;  %v2031_v25 = vrot.slane %v2030_v51, 4 }
 0x106   : > { %v1625_v1 = vpop.f32.mrf.mxu3  ;;  %4474 = vmatmul.msk.bf16.gmra.mxu2 %vm701_vm4, %v1269_v48  ;;  %v990_v13 = vpop.f32.mrf.mxu1  ;;  %v4626_v48 = vld [vmem:[%s5284_s19 + $0x8c] sm:$0x1] }
 0x107   : > { %v1704_v14 = vadd.f32 %v1625_v1, %v1417_v50  ;;  %v991_v19 = vadd.f32 %v990_v13, %v5649_v3  ;;  %v1187_v50 = vsel %vm5470_vm7, %v4458_v41, %v1186_v52  ;;  %v1190_v3 = vsel %vm5470_vm7, %v1188_v23, %v1189_v11 }
 0x108   : > { %v2043_v61 = vshll.u32 %v4626_v48, 16  ;;  %v1249_v8 = vunpack.c.l.b16 %v1190_v3  ;;  %v2041_v1 = vrot.slane %v2040_v57, 4  ;;  %v2061_v3 = vshrl.u32 %v4628_v62, 16  ;;  %v4966_v57 = vld [vmem:[%s5284_s19 + $0x84] sm:$0xff] }
 0x109   : > { %v1341_v33 = vpop.f32.mrf.mxu2  ;;  %v5762_v42 = vadd.f32 %v2279_v20, %v1704_v14  ;;  %v4627_v14 = vld [vmem:[%s5284_s19 + $0x90] sm:$0xf] }
 0x10a   : > { %v1418_v47 = vadd.f32 %v1341_v33, %v989_v16  ;;  %v1248_v16 = vunpack.c.l.b16 %v1187_v50  ;;  %v2045_v13 = vrot.slane %v2043_v61, 5  ;;  %v2048_v33 = vshrl.u32 %v4627_v14, 16 }
 0x10b   : > { %4587 = vmatmul.msk.bf16.gmra.mxu3 %vm701_vm4, %v4965_v15  ;;  %v2051_v48 = vshll.u32 %v4627_v14, 16  ;;  %v2057_v50 = vshll.u32 %v4628_v62, 16  ;;  %v4459_v61 = vrot.slane %v1074_v31, 9 }
 0x10c   : > { %v1270_v23 = vpack.c.b16 %v1249_v8, %v1248_v16  ;;  %v2050_v8 = vrot.slane %v2048_v33, 4 }
 0x10d   : > { %v2282_v54 = vpop.f32.mrf.mxu0 }
 0x10e   : > { %v1628_v4 = vpop.f32.mrf.mxu3  ;;  %v993_v20 = vpop.f32.mrf.mxu1 }
 0x10f   : > { %v1705_v9 = vadd.f32 %v1628_v4, %v1418_v47  ;;  %v994_v52 = vadd.f32 %v993_v20, %v5671_v44  ;;  %v2036_v44 = vsel %vm5296_vm3, %v2031_v25, %v2035_v21  ;;  %v2046_v47 = vsel %vm5296_vm3, %v2041_v1, %v2045_v13 }
 0x110   : > { %4652 = vmatmul.msk.bf16.gmra.mxu0 %vm701_vm4, %v2210_v27  ;;  %v5060_v27 = vld [vmem:[%s5284_s19 + $0x8c] sm:$0x1]  ;;  %v1195_v4 = vrot.slane %v1193_v30, 4  ;;  %v2189_v20 = vunpack.c.l.b16 %v2036_v44  ;;  %v2190_v16 = vunpack.c.l.b16 %v2046_v47  ;;  %v2053_v25 = vrot.slane %v2051_v48, 5  ;;  %v4951_v44 = vld [vmem:[%s5284_s19 + $0x84] sm:$0xff] }
 0x111   : > { %v1343_v11 = vpop.f32.mrf.mxu2  ;;  %4442 = vmatmul.msk.bf16.gmra.mxu1 %vm701_vm4, %v4950_v38  ;;  %v5775_v15 = vadd.f32 %v2282_v54, %v1705_v9  ;;  %v1196_v51 = vrot.slane %v5060_v27, 5  ;;  %v2063_v1 = vrot.slane %v2061_v3, 4 }
 0x112   : > { %v1419_v41 = vadd.f32 %v1343_v11, %v991_v19  ;;  %v2059_v11 = vrot.slane %v2057_v50, 5  ;;  %v2211_v62 = vpack.c.b16 %v2190_v16, %v2189_v20  ;;  %v2054_v31 = vor.u32 %v2053_v25, %v2050_v8  ;;  %v4631_v20 = vld [vmem:[%s5284_s19 + $0xa0] sm:$0xf]  ;;  %v5061_v16 = vld [vmem:[%s5284_s19 + $0x94] sm:$0xf] }
 0x113   : > { %v1200_v8 = vrot.slane %v5061_v16, 5 }
 0x114   : > { %v2064_v33 = vor.u32 %v2063_v1, %v2059_v11 }
 0x115   : > { %v2284_v35 = vpop.f32.mrf.mxu0 }
 0x116   : > { %v1630_v19 = vpop.f32.mrf.mxu3  ;;  %4475 = vmatmul.msk.bf16.gmra.mxu2 %vm701_vm4, %v1270_v23  ;;  %v995_v54 = vpop.f32.mrf.mxu1  ;;  %v4629_v23 = vld [vmem:[%s5284_s19 + $0x98] sm:$0x1] }
 0x117   : > { %v1706_v38 = vadd.f32 %v1630_v19, %v1419_v41  ;;  %v996_v21 = vadd.f32 %v995_v54, %v5689_v5  ;;  %v1194_v41 = vsel %vm5470_vm7, %v4459_v61, %v1193_v30  ;;  %v1197_v5 = vsel %vm5470_vm7, %v1195_v4, %v1196_v51 }
 0x118   : > { %v2067_v47 = vshll.u32 %v4629_v23, 16  ;;  %v1251_v50 = vunpack.c.l.b16 %v1197_v5  ;;  %v2055_v51 = vrot.slane %v2054_v31, 4  ;;  %v2065_v19 = vrot.slane %v2064_v33, 4  ;;  %v4967_v33 = vld [vmem:[%s5284_s19 + $0x90] sm:$0xff] }
 0x119   : > { %v1346_v9 = vpop.f32.mrf.mxu2  ;;  %v5788_v13 = vadd.f32 %v2284_v35, %v1706_v38  ;;  %v4630_v38 = vld [vmem:[%s5284_s19 + $0x9c] sm:$0xf]  ;;  %v2085_v5 = vshrl.u32 %v4631_v20, 16 }
 0x11a   : > { %v1420_v14 = vadd.f32 %v1346_v9, %v994_v52  ;;  %v1250_v52 = vunpack.c.l.b16 %v1194_v41  ;;  %v2069_v54 = vrot.slane %v2067_v47, 5  ;;  %v1075_v9 = vld [vmem:[%s5284_s19 + $0x90] sm:$0xe]  ;;  %v2075_v25 = vshll.u32 %v4630_v38, 16 }
 0x11b   : > { %4588 = vmatmul.msk.bf16.gmra.mxu3 %vm701_vm4, %v4966_v57  ;;  %v2081_v41 = vshll.u32 %v4631_v20, 16 }
 0x11c   : > { %v1271_v4 = vpack.c.b16 %v1251_v50, %v1250_v52  ;;  %v2070_v23 = vsel %vm5296_vm3, %v2065_v19, %v2069_v54  ;;  %v2087_v19 = vrot.slane %v2085_v5, 4 }
 0x11d   : > { %v2287_v60 = vpop.f32.mrf.mxu0 }
 0x11e   : > { %v1633_v48 = vpop.f32.mrf.mxu3  ;;  %v998_v35 = vpop.f32.mrf.mxu1 }
 0x11f   : > { %v1707_v3 = vadd.f32 %v1633_v48, %v1420_v14  ;;  %v999_v30 = vadd.f32 %v998_v35, %v5712_v56  ;;  %v2072_v56 = vshrl.u32 %v4630_v38, 16  ;;  %v2060_v14 = vsel %vm5296_vm3, %v2055_v51, %v2059_v11 }
 0x120   : > { %4653 = vmatmul.msk.bf16.gmra.mxu0 %vm701_vm4, %v2211_v62  ;;  %v5062_v62 = vld [vmem:[%s5284_s19 + $0x98] sm:$0x1]  ;;  %v4460_v48 = vrot.slane %v1075_v9, 9  ;;  %v1202_v35 = vrot.slane %v1200_v8, 4  ;;  %v2191_v52 = vunpack.c.l.b16 %v2060_v14  ;;  %v2192_v11 = vunpack.c.l.b16 %v2070_v23 }
 0x121   : > { %v1348_v27 = vpop.f32.mrf.mxu2  ;;  %4443 = vmatmul.msk.bf16.gmra.mxu1 %vm701_vm4, %v4951_v44  ;;  %v5801_v57 = vadd.f32 %v2287_v60, %v1707_v3  ;;  %v1203_v60 = vrot.slane %v5062_v62, 5  ;;  %v2074_v50 = vrot.slane %v2072_v56, 4  ;;  %v2077_v3 = vrot.slane %v2075_v25, 5  ;;  %v4952_v56 = vld [vmem:[%s5284_s19 + $0x90] sm:$0xff] }
 0x122   : > { %v1421_v61 = vadd.f32 %v1348_v27, %v996_v21  ;;  %v2083_v51 = vrot.slane %v2081_v41, 5  ;;  %v2212_v20 = vpack.c.b16 %v2192_v11, %v2191_v52  ;;  %v4634_v11 = vld [vmem:[%s5284_s19 + $0xac] sm:$0xf] }
 0x123   : > { %v2078_v16 = vor.u32 %v2077_v3, %v2074_v50  ;;  %v1076_v50 = vld [vmem:[%s5284_s19 + $0x9c] sm:$0xe] }
 0x124   : > { %v2088_v25 = vor.u32 %v2087_v19, %v2083_v51 }
 0x125   : > { %v2289_v1 = vpop.f32.mrf.mxu0 }
 0x126   : > { %v1635_v21 = vpop.f32.mrf.mxu3  ;;  %4476 = vmatmul.msk.bf16.gmra.mxu2 %vm701_vm4, %v1271_v4  ;;  %v1000_v44 = vpop.f32.mrf.mxu1  ;;  %v4632_v4 = vld [vmem:[%s5284_s19 + $0xa4] sm:$0x1] }
 0x127   : > { %v1708_v31 = vadd.f32 %v1635_v21, %v1421_v61  ;;  %v1001_v47 = vadd.f32 %v1000_v44, %v5730_v24  ;;  %v1201_v61 = vsel %vm5470_vm7, %v4460_v48, %v1200_v8  ;;  %v1204_v24 = vsel %vm5470_vm7, %v1202_v35, %v1203_v60  ;;  %v4633_v44 = vld [vmem:[%s5284_s19 + $0xa8] sm:$0xf]  ;;  %v5063_v35 = vld [vmem:[%s5284_s19 + $0xa0] sm:$0xf] }
 0x128   : > { %v2091_v14 = vshll.u32 %v4632_v4, 16  ;;  %v1253_v41 = vunpack.c.l.b16 %v1204_v24  ;;  %v2079_v8 = vrot.slane %v2078_v16, 4  ;;  %v2089_v60 = vrot.slane %v2088_v25, 4 }
 0x129   : > { %v1351_v27 = vpop.f32.mrf.mxu2  ;;  %v5814_v54 = vadd.f32 %v2289_v1, %v1708_v31  ;;  %v1207_v52 = vrot.slane %v5063_v35, 5  ;;  %v2099_v19 = vshll.u32 %v4633_v44, 16  ;;  %v2109_v24 = vshrl.u32 %v4634_v11, 16 }
 0x12a   : > { %v1422_v38 = vadd.f32 %v1351_v27, %v999_v30  ;;  %v1252_v30 = vunpack.c.l.b16 %v1201_v61  ;;  %v2093_v21 = vrot.slane %v2091_v14, 5  ;;  %v2084_v3 = vsel %vm5296_vm3, %v2079_v8, %v2083_v51 }
 0x12b   : > { %4589 = vmatmul.msk.bf16.gmra.mxu3 %vm701_vm4, %v4967_v33  ;;  %v2096_v27 = vshrl.u32 %v4633_v44, 16  ;;  %v2105_v61 = vshll.u32 %v4634_v11, 16  ;;  %v1209_v25 = vrot.slane %v1207_v52, 4  ;;  %v2193_v51 = vunpack.c.l.b16 %v2084_v3  ;;  %v4635_v11 = vld [vmem:[%s5284_s19 + $0xb0] sm:$0x1]  ;;  %v4953_v3 = vld [vmem:[%s5284_s19 + $0x9c] sm:$0xff] }
 0x12c   : > { %v1272_v48 = vpack.c.b16 %v1253_v41, %v1252_v30  ;;  %v2094_v4 = vsel %vm5296_vm3, %v2089_v60, %v2093_v21  ;;  %v2101_v8 = vrot.slane %v2099_v19, 5  ;;  %v2111_v21 = vrot.slane %v2109_v24, 4 }
 0x12d   : > { %v2292_v9 = vpop.f32.mrf.mxu0  ;;  %v2194_v41 = vunpack.c.l.b16 %v2094_v4  ;;  %v2107_v60 = vrot.slane %v2105_v61, 5  ;;  %v2115_v4 = vshll.u32 %v4635_v11, 16 }
 0x12e   : > { %v1638_v1 = vpop.f32.mrf.mxu3  ;;  %v1003_v23 = vpop.f32.mrf.mxu1 }
 0x12f   : > { %v1709_v5 = vadd.f32 %v1638_v1, %v1422_v38  ;;  %v4968_v1 = vld [vmem:[%s5284_s19 + $0x9c] sm:$0xff]  ;;  %v1004_v30 = vadd.f32 %v1003_v23, %v5565_v7  ;;  %v2213_v7 = vpack.c.b16 %v2194_v41, %v2193_v51  ;;  %v2117_v51 = vrot.slane %v2115_v4, 5 }
 0x130   : > { %4654 = vmatmul.msk.bf16.gmra.mxu0 %vm701_vm4, %v2212_v20  ;;  %v5064_v20 = vld [vmem:[%s5284_s19 + $0xa4] sm:$0x1] }
 0x131   : > { %v1353_v62 = vpop.f32.mrf.mxu2  ;;  %4444 = vmatmul.msk.bf16.gmra.mxu1 %vm701_vm4, %v4952_v56  ;;  %v5826_v31 = vadd.f32 %v2292_v9, %v1709_v5  ;;  %v1210_v16 = vrot.slane %v5064_v20, 5  ;;  %v4461_v56 = vrot.slane %v1076_v50, 9  ;;  %v2098_v5 = vrot.slane %v2096_v27, 4 }
 0x132   : > { %v1423_v33 = vadd.f32 %v1353_v62, %v1001_v47 }
 0x133   : > { %v2102_v23 = vor.u32 %v2101_v8, %v2098_v5 }
 0x135   : > { %v2294_v38 = vpop.f32.mrf.mxu0 }
 0x136   : > { %v1640_v47 = vpop.f32.mrf.mxu3  ;;  %4477 = vmatmul.msk.bf16.gmra.mxu2 %vm701_vm4, %v1272_v48  ;;  %v1005_v9 = vpop.f32.mrf.mxu1  ;;  %v1208_v48 = vsel %vm5470_vm7, %v4461_v56, %v1207_v52  ;;  %v4636_v52 = vld [vmem:[%s5284_s19 + $0xb4] sm:$0xf]  ;;  %v2103_v56 = vrot.slane %v2102_v23, 4 }
 0x137   : > { %v1710_v14 = vadd.f32 %v1640_v47, %v1423_v33  ;;  %v1211_v33 = vsel %vm5470_vm7, %v1209_v25, %v1210_v16  ;;  %v1254_v27 = vunpack.c.l.b16 %v1208_v48  ;;  %v4637_v47 = vld [vmem:[%s5284_s19 + $0xb8] sm:$0xf]  ;;  %v1006_v16 = vadd.f32 %v1005_v9, %v5581_v34 }
 0x138   : > { %v1255_v19 = vunpack.c.l.b16 %v1211_v33  ;;  %v2120_v5 = vshrl.u32 %v4636_v52, 16  ;;  %v2123_v8 = vshll.u32 %v4636_v52, 16  ;;  %v2133_v48 = vshrl.u32 %v4637_v47, 16  ;;  %v1077_v33 = vld [vmem:[%s5284_s19 + $0xa8] sm:$0xe] }
 0x139   : > { %v1356_v62 = vpop.f32.mrf.mxu2  ;;  %v5839_v44 = vadd.f32 %v2294_v38, %v1710_v14  ;;  %v2112_v38 = vor.u32 %v2111_v21, %v2107_v60  ;;  %v5065_v21 = vld [vmem:[%s5284_s19 + $0xac] sm:$0xf]  ;;  %v2108_v9 = vsel %vm5296_vm3, %v2103_v56, %v2107_v60 }
 0x13a   : > { %v1424_v35 = vadd.f32 %v1356_v62, %v1004_v30  ;;  %v1273_v14 = vpack.c.b16 %v1255_v19, %v1254_v27  ;;  %v2129_v62 = vshll.u32 %v4637_v47, 16  ;;  %v2122_v27 = vrot.slane %v2120_v5, 4 }
 0x13b   : > { %4590 = vmatmul.msk.bf16.gmra.mxu3 %vm701_vm4, %v4968_v1  ;;  %v2113_v1 = vrot.slane %v2112_v38, 4  ;;  %v2125_v19 = vrot.slane %v2123_v8, 5  ;;  %v2135_v47 = vrot.slane %v2133_v48, 4  ;;  %v4954_v48 = vld [vmem:[%s5284_s19 + $0xa8] sm:$0xff] }
 0x13c   : > { %v2131_v38 = vrot.slane %v2129_v62, 5 }
 0x13d   : > { %v2297_v50 = vpop.f32.mrf.mxu0  ;;  %v2118_v11 = vsel %vm5296_vm3, %v2113_v1, %v2117_v51 }
 0x13e   : > { %v1643_v61 = vpop.f32.mrf.mxu3  ;;  %v1008_v24 = vpop.f32.mrf.mxu1  ;;  %v2196_v56 = vunpack.c.l.b16 %v2118_v11  ;;  %v2136_v8 = vor.u32 %v2135_v47, %v2131_v38 }
 0x13f   : > { %v1711_v20 = vadd.f32 %v1643_v61, %v1424_v35  ;;  %v1214_v35 = vrot.slane %v5065_v21, 5  ;;  %v4969_v61 = vld [vmem:[%s5284_s19 + $0xa8] sm:$0xff]  ;;  %v1009_v60 = vadd.f32 %v1008_v24, %v5601_v58 }
 0x140   : > { %4655 = vmatmul.msk.bf16.gmra.mxu0 %vm701_vm4, %v2213_v7  ;;  %v5066_v7 = vld [vmem:[%s5284_s19 + $0xb0] sm:$0x1] }
 0x141   : > { %v1358_v25 = vpop.f32.mrf.mxu2  ;;  %4445 = vmatmul.msk.bf16.gmra.mxu1 %vm701_vm4, %v4953_v3  ;;  %v5853_v30 = vadd.f32 %v2297_v50, %v1711_v20  ;;  %v1217_v23 = vrot.slane %v5066_v7, 5  ;;  %v4462_v20 = vrot.slane %v1077_v33, 9  ;;  %v1216_v52 = vrot.slane %v1214_v35, 4 }
 0x142   : > { %v1425_v41 = vadd.f32 %v1358_v25, %v1006_v16  ;;  %v2195_v16 = vunpack.c.l.b16 %v2108_v9  ;;  %v4638_v25 = vld [vmem:[%s5284_s19 + $0xbc] sm:$0x1] }
 0x143   : > { %v1218_v5 = vsel %vm5470_vm7, %v1216_v52, %v1217_v23  ;;  %v2139_v58 = vshll.u32 %v4638_v25, 16  ;;  %v4640_v52 = vld [vmem:[%s5284_s19 + $0xc4] sm:$0xf] }
 0x144   : > { %v2214_v24 = vpack.c.b16 %v2196_v56, %v2195_v16  ;;  %v1257_v11 = vunpack.c.l.b16 %v1218_v5  ;;  %v1078_v16 = vld [vmem:[%s5284_s19 + $0xb4] sm:$0xe]  ;;  %v5068_v56 = vld [vmem:[%s5284_s19 + $0xb8] sm:$0xf]  ;;  %v2157_v5 = vshrl.u32 %v4640_v52, 16 }
 0x145   : > { %v2299_v34 = vpop.f32.mrf.mxu0  ;;  %v1221_v25 = vrot.slane %v5068_v56, 5 }
 0x146   : > { %v1645_v50 = vpop.f32.mrf.mxu3  ;;  %4478 = vmatmul.msk.bf16.gmra.mxu2 %vm701_vm4, %v1273_v14  ;;  %v1010_v3 = vpop.f32.mrf.mxu1  ;;  %v2126_v14 = vor.u32 %v2125_v19, %v2122_v27  ;;  %v2141_v27 = vrot.slane %v2139_v58, 5  ;;  %v4639_v19 = vld [vmem:[%s5284_s19 + $0xc0] sm:$0xf]  ;;  %v5069_v58 = vld [vmem:[%s5284_s19 + $0x14] sm:$0x1] }
 0x147   : > { %v1712_v4 = vadd.f32 %v1645_v50, %v1425_v41  ;;  %v1215_v41 = vsel %vm5470_vm7, %v4462_v20, %v1214_v35  ;;  %v2137_v35 = vrot.slane %v2136_v8, 4  ;;  %v1011_v23 = vadd.f32 %v1010_v3, %v5618_v28 }
 0x148   : > { %v1256_v9 = vunpack.c.l.b16 %v1215_v41  ;;  %v2127_v50 = vrot.slane %v2126_v14, 4  ;;  %v2144_v3 = vshrl.u32 %v4639_v19, 16  ;;  %v2147_v14 = vshll.u32 %v4639_v19, 16  ;;  %v4970_v19 = vld [vmem:[%s5284_s19 + $0xb4] sm:$0xff] }
 0x149   : > { %v1361_v1 = vpop.f32.mrf.mxu2  ;;  %v5866_v51 = vadd.f32 %v2299_v34, %v1712_v4  ;;  %v5067_v4 = vld [vmem:[%s5284_s19 + $0x10] sm:$0xf]  ;;  %v2142_v28 = vsel %vm5296_vm3, %v2137_v35, %v2141_v27  ;;  %v2153_v41 = vshll.u32 %v4640_v52, 16  ;;  %v1223_v35 = vrot.slane %v1221_v25, 4  ;;  %v4659_v27 = vld [vmem:[%s5284_s19 + $0xc] sm:$0xe] }
 0x14a   : > { %v1426_v21 = vadd.f32 %v1361_v1, %v1009_v60  ;;  %v1274_v60 = vpack.c.b16 %v1257_v11, %v1256_v9  ;;  %v5070_v9 = vld [vmem:[%s5284_s19 + $0xbc] sm:$0x1]  ;;  %v4675_v52 = vrot.slane %v4659_v27, 9 }
 0x14b   : > { %4591 = vmatmul.msk.bf16.gmra.mxu3 %vm701_vm4, %v4969_v61  ;;  %v2455_v61 = vrot.slane %v5067_v4, 5  ;;  %v2146_v4 = vrot.slane %v2144_v3, 4 }
 0x14d   : > { %v2302_v62 = vpop.f32.mrf.mxu0  ;;  %v2457_v8 = vrot.slane %v2455_v61, 4 }
 0x14e   : > { %v1648_v33 = vpop.f32.mrf.mxu3  ;;  %v1013_v34 = vpop.f32.mrf.mxu1 }
 0x14f   : > { %v1713_v7 = vadd.f32 %v1648_v33, %v1426_v21  ;;  %v2132_v21 = vsel %vm5296_vm3, %v2127_v50, %v2131_v38  ;;  %v4463_v33 = vrot.slane %v1078_v16, 9  ;;  %v1014_v56 = vadd.f32 %v1013_v34, %v5638_v53 }
 0x150   : > { %4656 = vmatmul.msk.bf16.gmra.mxu0 %vm701_vm4, %v2214_v24  ;;  %v2458_v24 = vrot.slane %v5069_v58, 5  ;;  %v2197_v38 = vunpack.c.l.b16 %v2132_v21  ;;  %v2155_v16 = vrot.slane %v2153_v41, 5  ;;  %v2159_v58 = vrot.slane %v2157_v5, 4  ;;  %v4641_v21 = vld [vmem:[%s5284_s19 + $0xc8] sm:$0x1] }
 0x151   : > { %v1363_v20 = vpop.f32.mrf.mxu2  ;;  %4446 = vmatmul.msk.bf16.gmra.mxu1 %vm701_vm4, %v4954_v48  ;;  %v5882_v1 = vadd.f32 %v2302_v62, %v1713_v7  ;;  %v1224_v62 = vrot.slane %v5070_v9, 5  ;;  %v2198_v7 = vunpack.c.l.b16 %v2142_v28  ;;  %v2456_v28 = vsel %vm5470_vm7, %v4675_v52, %v2455_v61  ;;  %v4821_v41 = vld [vmem:[%s5284_s19 + $0x18] sm:$0xf] }
 0x152   : > { %v1427_v47 = vadd.f32 %v1363_v20, %v1011_v23  ;;  %v2149_v20 = vrot.slane %v2147_v14, 5  ;;  %v2567_v53 = vunpack.c.l.b16 %v2456_v28  ;;  %v2163_v27 = vshll.u32 %v4641_v21, 16 }
 0x153   : > { %v1225_v14 = vsel %vm5470_vm7, %v1223_v35, %v1224_v62  ;;  %v2215_v5 = vpack.c.b16 %v2198_v7, %v2197_v38  ;;  %v3123_v62 = vshrl.u32 %v4821_v41, 16  ;;  %v3126_v35 = vshll.u32 %v4821_v41, 16 }
 0x155   : > { %v2304_v48 = vpop.f32.mrf.mxu0  ;;  %v3125_v21 = vrot.slane %v3123_v62, 4 }
 0x156   : > { %v1650_v11 = vpop.f32.mrf.mxu3  ;;  %4479 = vmatmul.msk.bf16.gmra.mxu2 %vm701_vm4, %v1274_v60  ;;  %v1015_v50 = vpop.f32.mrf.mxu1  ;;  %v1222_v60 = vsel %vm5470_vm7, %v4463_v33, %v1221_v25  ;;  %v5906_v25 = vld [vmem:[%s5284_s19 + $0x1c] sm:$0xf]  ;;  %v2160_v33 = vor.u32 %v2159_v58, %v2155_v16 }
 0x157   : > { %v1714_v23 = vadd.f32 %v1650_v11, %v1427_v47  ;;  %v2459_v47 = vsel %vm5470_vm7, %v2457_v8, %v2458_v24  ;;  %v2150_v11 = vor.u32 %v2149_v20, %v2146_v4  ;;  %v4955_v24 = vld [vmem:[%s5284_s19 + $0xb4] sm:$0xff]  ;;  %v3136_v38 = vshrl.u32 %v5906_v25, 16 }
 0x158   : > { %v2568_v34 = vunpack.c.l.b16 %v2459_v47  ;;  %v1016_v4 = vadd.f32 %v1015_v50, %v5658_v17 }
 0x159   : > { %v1366_v9 = vpop.f32.mrf.mxu2  ;;  %v5910_v52 = vadd.f32 %v2304_v48, %v1714_v23  ;;  %v2151_v48 = vrot.slane %v2150_v11, 4  ;;  %v2161_v23 = vrot.slane %v2160_v33, 4  ;;  %v3138_v41 = vrot.slane %v3136_v38, 4 }
 0x15a   : > { %v1428_v3 = vadd.f32 %v1366_v9, %v1014_v56  ;;  %v5908_v61 = vpack.c.b16 %v2568_v34, %v2567_v53  ;;  %v1258_v56 = vunpack.c.l.b16 %v1222_v60  ;;  %v1259_v9 = vunpack.c.l.b16 %v1225_v14 }
 0x15b   : > { %4592 = vmatmul.msk.bf16.gmra.mxu3 %vm701_vm4, %v4970_v19  ;;  %6696 = vst [vmem:[#allocation5_spill] sm:$0xff] %v5910_v52  ;;  %v3132_v19 = vshll.u32 %v5906_v25, 16  ;;  %v2165_v60 = vrot.slane %v2163_v27, 5  ;;  %v3128_v14 = vrot.slane %v3126_v35, 5  ;;  %v2156_v17 = vsel %vm5296_vm3, %v2151_v48, %v2155_v16  ;;  %v4886_v48 = vld [vmem:[%s5284_s19 + $0x18] sm:$0xe] }
 0x15c   : > { %v1275_v58 = vpack.c.b16 %v1259_v9, %v1258_v56  ;;  %v4971_v9 = vld [vmem:[%s5284_s19 + $0xc0] sm:$0xff]  ;;  %v2199_v16 = vunpack.c.l.b16 %v2156_v17 }
 0x15d   : > { %v2307_v8 = vpop.f32.mrf.mxu0  ;;  %v3134_v34 = vrot.slane %v3132_v19, 5  ;;  %v2166_v50 = vsel %vm5296_vm3, %v2161_v23, %v2165_v60  ;;  %v3129_v27 = vor.u32 %v3128_v14, %v3125_v21  ;;  %v4824_v23 = vld [vmem:[%s5284_s19 + $0x24] sm:$0xf]  ;;  %v5936_v60 = vld [vmem:[%s5284_s19 + $0x28] sm:$0xf] }
 0x15e   : > { %v1653_v28 = vpop.f32.mrf.mxu3  ;;  %v1018_v47 = vpop.f32.mrf.mxu1  ;;  %v2200_v35 = vunpack.c.l.b16 %v2166_v50 }
 0x15f   : > { %v1715_v7 = vadd.f32 %v1653_v28, %v1428_v3  ;;  %v5921_v3 = vld [vmem:[%s5284_s19 + $0x20] sm:$0x1]  ;;  %v1019_v62 = vadd.f32 %v1018_v47, %v5681_v2  ;;  %v3130_v38 = vrot.slane %v3129_v27, 4  ;;  %v5071_v47 = vld [vmem:[%s5284_s19 + $0x1c] sm:$0xf] }
 0x160   : > { %4657 = vmatmul.msk.bf16.gmra.mxu0 %vm701_vm4, %v2215_v5  ;;  %v2462_v14 = vrot.slane %v5071_v47, 5  ;;  %v4660_v27 = vld [vmem:[%s5284_s19 + $0x18] sm:$0xe] }
 0x161   : > { %v1368_v20 = vpop.f32.mrf.mxu2  ;;  %4447 = vmatmul.msk.bf16.gmra.mxu1 %vm701_vm4, %v4955_v24  ;;  %v5918_v52 = vadd.f32 %v2307_v8, %v1715_v7  ;;  %v3139_v24 = vor.u32 %v3138_v41, %v3134_v34  ;;  %v3142_v8 = vshll.u32 %v5921_v3, 16  ;;  %v3135_v17 = vsel %vm5296_vm3, %v3130_v38, %v3134_v34 }
 0x162   : > { %v1429_v53 = vadd.f32 %v1368_v20, %v1016_v4  ;;  %v2216_v20 = vpack.c.b16 %v2200_v35, %v2199_v16  ;;  %v3797_v34 = vrot.slane %v5921_v3, 5  ;;  %v5072_v16 = vld [vmem:[%s5284_s19 + $0x20] sm:$0x1]  ;;  %v4676_v38 = vrot.slane %v4660_v27, 9 }
 0x163   : > { %v3140_v7 = vrot.slane %v3139_v24, 4  ;;  %v3144_v4 = vrot.slane %v3142_v8, 5  ;;  %v3147_v24 = vshrl.u32 %v4824_v23, 16  ;;  %v3150_v8 = vshll.u32 %v4824_v23, 16 }
 0x164   : > { %v2465_v35 = vrot.slane %v5072_v16, 5  ;;  %v2463_v27 = vsel %vm5470_vm7, %v4676_v38, %v2462_v14  ;;  %v4827_v38 = vld [vmem:[%s5284_s19 + $0x30] sm:$0xf] }
 0x165   : > { %v2309_v5 = vpop.f32.mrf.mxu0  ;;  %v3145_v50 = vsel %vm5296_vm3, %v3140_v7, %v3144_v4  ;;  %v2464_v7 = vrot.slane %v2462_v14, 4  ;;  %v3152_v3 = vrot.slane %v3150_v8, 5 }
 0x166   : > { %v1655_v11 = vpop.f32.mrf.mxu3  ;;  %4480 = vmatmul.msk.bf16.gmra.mxu2 %vm701_vm4, %v1275_v58  ;;  %v1020_v33 = vpop.f32.mrf.mxu1  ;;  %v3794_v58 = vrot.slane %v5906_v25, 5  ;;  %v3509_v23 = vunpack.c.l.b16 %v3145_v50 }
 0x167   : > { %v1716_v56 = vadd.f32 %v1655_v11, %v1429_v53  ;;  %v4902_v11 = vrot.slane %v4886_v48, 9  ;;  %v4972_v48 = vld [vmem:[%s5284_s19 + $0x18] sm:$0xff]  ;;  %v2466_v50 = vsel %vm5470_vm7, %v2464_v7, %v2465_v35  ;;  %v5976_v7 = vld [vmem:[%s5284_s19 + $0x34] sm:$0xf] }
 0x169   : > { %v1371_v28 = vpop.f32.mrf.mxu2  ;;  %v5938_v21 = vadd.f32 %v2309_v5, %v1716_v56  ;;  %v3156_v5 = vshll.u32 %v5936_v60, 16  ;;  %v3160_v56 = vshrl.u32 %v5936_v60, 16 }
 0x16a   : > { %v1430_v19 = vadd.f32 %v1371_v28, %v1019_v62  ;;  %v3796_v62 = vrot.slane %v3794_v58, 4 }
 0x16b   : > { %4593 = vmatmul.msk.bf16.gmra.mxu3 %vm701_vm4, %v4971_v9  ;;  %v1021_v9 = vadd.f32 %v1020_v33, %v5701_v29  ;;  %v3149_v33 = vrot.slane %v3147_v24, 4  ;;  %v5959_v47 = vrot.slane %v3156_v5, 5 }
 0x16d   : > { %v2312_v2 = vpop.f32.mrf.mxu0  ;;  %v3153_v5 = vor.u32 %v3152_v3, %v3149_v33  ;;  %v4887_v33 = vld [vmem:[%s5284_s19 + $0x24] sm:$0xe] }
 0x16e   : > { %v1658_v53 = vpop.f32.mrf.mxu3  ;;  %v1023_v41 = vpop.f32.mrf.mxu1 }
 0x16f   : > { %v1717_v25 = vadd.f32 %v1658_v53, %v1430_v19  ;;  %v3508_v19 = vunpack.c.l.b16 %v3135_v17  ;;  %v3162_v53 = vrot.slane %v3160_v56, 4  ;;  %v1024_v14 = vadd.f32 %v1023_v41, %v5583_v37 }
 0x170   : > { %4658 = vmatmul.msk.bf16.gmra.mxu0 %vm701_vm4, %v2216_v20  ;;  %v3795_v20 = vsel %vm5470_vm7, %v4902_v11, %v3794_v58  ;;  %v3801_v37 = vrot.slane %v5936_v60, 5 }
 0x171   : > { %v1373_v28 = vpop.f32.mrf.mxu2  ;;  %4692 = vmatmul.msk.bf16.vlgmr.msra.gmra.mxu1 %vm701_vm4, %v5908_v61  ;;  %v5957_v29 = vadd.f32 %v2312_v2, %v1717_v25  ;;  %v3798_v61 = vsel %vm5470_vm7, %v3796_v62, %v3797_v34  ;;  %v3540_v2 = vpack.c.b16 %v3509_v23, %v3508_v19  ;;  %v3906_v11 = vunpack.c.l.b16 %v3795_v20 }
 0x172   : > { %v1431_v4 = vadd.f32 %v1373_v28, %v1021_v9  ;;  %v5968_v9 = vld [vmem:[%s5284_s19 + $0x2c] sm:$0x1]  ;;  %v3907_v8 = vunpack.c.l.b16 %v3798_v61  ;;  %v3163_v56 = vor.u32 %v3162_v53, %v5959_v47  ;;  %v2569_v62 = vunpack.c.l.b16 %v2463_v27 }
 0x173   : > { %v2570_v34 = vunpack.c.l.b16 %v2466_v50  ;;  %v3166_v16 = vshll.u32 %v5968_v9, 16  ;;  %v3171_v53 = vshrl.u32 %v4827_v38, 16  ;;  %v3174_v61 = vshll.u32 %v4827_v38, 16 }
 0x174   : > { %v3938_v19 = vpack.c.b16 %v3907_v8, %v3906_v11  ;;  %v3180_v27 = vshll.u32 %v5976_v7, 16  ;;  %v3184_v50 = vshrl.u32 %v5976_v7, 16  ;;  %v5073_v11 = vld [vmem:[%s5284_s19 + $0x28] sm:$0xf]  ;;  %v3804_v60 = vrot.slane %v5968_v9, 5 }
 0x175   : > { %v2314_v17 = vpop.f32.mrf.mxu0  ;;  %v2600_v23 = vpack.c.b16 %v2570_v34, %v2569_v62  ;;  %v3168_v20 = vrot.slane %v3166_v16, 5  ;;  %v2469_v8 = vrot.slane %v5073_v11, 5  ;;  %v4903_v62 = vrot.slane %v4887_v33, 9  ;;  %v4973_v11 = vld [vmem:[%s5284_s19 + $0x24] sm:$0xff] }
 0x176   : > { %v1660_v58 = vpop.f32.mrf.mxu3  ;;  %4805 = vmatmul.msk.bf16.vlgmr.msra.gmra.mxu2 %vm701_vm4, %v4972_v48  ;;  %v1025_v24 = vpop.f32.mrf.mxu1  ;;  %v3164_v48 = vrot.slane %v3163_v56, 4  ;;  %v3176_v33 = vrot.slane %v3174_v61, 5  ;;  %v5997_v9 = vrot.slane %v3180_v27, 5 }
 0x177   : > { %v1718_v25 = vadd.f32 %v1660_v58, %v1431_v4  ;;  %v3154_v4 = vrot.slane %v3153_v5, 4  ;;  %v5074_v5 = vld [vmem:[%s5284_s19 + $0x2c] sm:$0x1] }
 0x178   : > { %v2472_v56 = vrot.slane %v5074_v5, 5  ;;  %v3169_v16 = vsel %vm5296_vm3, %v3164_v48, %v3168_v20  ;;  %v3802_v20 = vsel %vm5470_vm7, %v4903_v62, %v3801_v37 }
 0x179   : > { %v1376_v35 = vpop.f32.mrf.mxu2  ;;  %v5981_v41 = vadd.f32 %v2314_v17, %v1718_v25  ;;  %v4661_v17 = vld [vmem:[%s5284_s19 + $0x24] sm:$0xe]  ;;  %v1026_v25 = vadd.f32 %v1025_v24, %v5604_v63  ;;  %v3159_v34 = vsel %vm5296_vm3, %v3154_v4, %v5959_v47  ;;  %v2471_v24 = vrot.slane %v2469_v8, 4 }
 0x17a   : > { %v1432_v28 = vadd.f32 %v1376_v35, %v1024_v14  ;;  %v3803_v35 = vrot.slane %v3801_v37, 4  ;;  %v4677_v63 = vrot.slane %v4661_v17, 9  ;;  %v3510_v47 = vunpack.c.l.b16 %v3159_v34 }
 0x17b   : > { %4870 = vmatmul.msk.bf16.vlgmr.msra.gmra.mxu3 %vm701_vm4, %v3540_v2  ;;  %6697 = vst [vmem:[#allocation6_spill] sm:$0xff] %v5981_v41  ;;  %v3511_v4 = vunpack.c.l.b16 %v3169_v16  ;;  %v6003_v41 = vld [vmem:[%s5284_s19 + $0x38] sm:$0x1] }
 0x17c   : > { %v3190_v37 = vshll.u32 %v6003_v41, 16 }
 0x17d   : > { %v2317_v3 = vpop.f32.mrf.mxu0  ;;  %v3541_v17 = vpack.c.b16 %v3511_v4, %v3510_v47  ;;  %v5075_v4 = vld [vmem:[%s5284_s19 + $0x34] sm:$0xf] }
 0x17e   : > { %v1663_v58 = vpop.f32.mrf.mxu3  ;;  %v1028_v2 = vpop.f32.mrf.mxu1 }
 0x17f   : > { %v1719_v14 = vadd.f32 %v1663_v58, %v1432_v28  ;;  %v3173_v28 = vrot.slane %v3171_v53, 4  ;;  %v3186_v58 = vrot.slane %v3184_v50, 4  ;;  %v2473_v50 = vsel %vm5470_vm7, %v2471_v24, %v2472_v56  ;;  %v6022_v24 = vld [vmem:[%s5284_s19 + $0x40] sm:$0xf] }
 0x180   : > { %4919 = vmatmul.msk.bf16.vlgmr.msra.gmra.mxu0 %vm701_vm4, %v3938_v19 }
 0x181   : > { %v1378_v38 = vpop.f32.mrf.mxu2  ;;  %4693 = vmatmul.msk.bf16.gmra.mxu1 %vm701_vm4, %v2600_v23  ;;  %v6000_v5 = vadd.f32 %v2317_v3, %v1719_v14  ;;  %v3805_v23 = vsel %vm5470_vm7, %v3803_v35, %v3804_v60  ;;  %v3177_v53 = vor.u32 %v3176_v33, %v3173_v28  ;;  %v2470_v3 = vsel %vm5470_vm7, %v4677_v63, %v2469_v8 }
 0x182   : > { %v1433_v19 = vadd.f32 %v1378_v38, %v1026_v25  ;;  %v3187_v14 = vor.u32 %v3186_v58, %v5997_v9  ;;  %v1029_v60 = vadd.f32 %v1028_v2, %v5621_v22  ;;  %v3908_v25 = vunpack.c.l.b16 %v3802_v20  ;;  %v4888_v58 = vld [vmem:[%s5284_s19 + $0x30] sm:$0xe] }
 0x183   : > { %v3909_v34 = vunpack.c.l.b16 %v3805_v23  ;;  %v2571_v35 = vunpack.c.l.b16 %v2470_v3  ;;  %v2572_v8 = vunpack.c.l.b16 %v2473_v50  ;;  %v3178_v28 = vrot.slane %v3177_v53, 4 }
 0x184   : > { %v3188_v56 = vrot.slane %v3187_v14, 4  ;;  %v3192_v33 = vrot.slane %v3190_v37, 5  ;;  %v3808_v63 = vrot.slane %v5976_v7, 5  ;;  %v2476_v20 = vrot.slane %v5075_v4, 5  ;;  %v4662_v7 = vld [vmem:[%s5284_s19 + $0x30] sm:$0xe] }
 0x185   : > { %v2319_v48 = vpop.f32.mrf.mxu0  ;;  %v2601_v47 = vpack.c.b16 %v2572_v8, %v2571_v35  ;;  %v4904_v50 = vrot.slane %v4888_v58, 9 }
 0x186   : > { %v1665_v61 = vpop.f32.mrf.mxu3  ;;  %4806 = vmatmul.msk.bf16.gmra.mxu2 %vm701_vm4, %v4973_v11  ;;  %v1030_v27 = vpop.f32.mrf.mxu1  ;;  %v4830_v11 = vld [vmem:[%s5284_s19 + $0x3c] sm:$0xf]  ;;  %v3193_v3 = vsel %vm5296_vm3, %v3188_v56, %v3192_v33  ;;  %v4974_v33 = vld [vmem:[%s5284_s19 + $0x30] sm:$0xff] }
 0x187   : > { %v1720_v62 = vadd.f32 %v1665_v61, %v1433_v19  ;;  %v3939_v19 = vpack.c.b16 %v3909_v34, %v3908_v25  ;;  %v3183_v61 = vsel %vm5296_vm3, %v3178_v28, %v5997_v9  ;;  %v3195_v14 = vshrl.u32 %v4830_v11, 16  ;;  %v5076_v34 = vld [vmem:[%s5284_s19 + $0x38] sm:$0x1] }
 0x188   : > { %v3810_v25 = vrot.slane %v3808_v63, 4  ;;  %v3811_v9 = vrot.slane %v6003_v41, 5  ;;  %v3512_v8 = vunpack.c.l.b16 %v3183_v61  ;;  %v2478_v28 = vrot.slane %v2476_v20, 4 }
 0x189   : > { %v1381_v16 = vpop.f32.mrf.mxu2  ;;  %v6024_v22 = vadd.f32 %v2319_v48, %v1720_v62  ;;  %v3198_v48 = vshll.u32 %v4830_v11, 16  ;;  %v3204_v62 = vshll.u32 %v6022_v24, 16  ;;  %v3513_v58 = vunpack.c.l.b16 %v3193_v3 }
 0x18a   : > { %v1434_v38 = vadd.f32 %v1381_v16, %v1029_v60  ;;  %v1031_v60 = vadd.f32 %v1030_v27, %v5642_v55  ;;  %v2479_v16 = vrot.slane %v5076_v34, 5  ;;  %v3809_v11 = vsel %vm5470_vm7, %v4904_v50, %v3808_v63 }
 0x18b   : > { %4871 = vmatmul.msk.bf16.gmra.mxu3 %vm701_vm4, %v3541_v17  ;;  %v3208_v17 = vshrl.u32 %v6022_v24, 16  ;;  %v3197_v55 = vrot.slane %v3195_v14, 4  ;;  %v3200_v27 = vrot.slane %v3198_v48, 5  ;;  %v6045_v41 = vrot.slane %v3204_v62, 5 }
 0x18c   : > { %v2480_v3 = vsel %vm5470_vm7, %v2478_v28, %v2479_v16  ;;  %v3910_v50 = vunpack.c.l.b16 %v3809_v11  ;;  %v4889_v11 = vld [vmem:[%s5284_s19 + $0x3c] sm:$0xe] }
 0x18d   : > { %v2322_v2 = vpop.f32.mrf.mxu0  ;;  %v3210_v4 = vrot.slane %v3208_v17, 4  ;;  %v3201_v62 = vor.u32 %v3200_v27, %v3197_v55 }
 0x18e   : > { %v1668_v23 = vpop.f32.mrf.mxu3  ;;  %v1033_v53 = vpop.f32.mrf.mxu1 }
 0x18f   : > { %v1721_v37 = vadd.f32 %v1668_v23, %v1434_v38  ;;  %v4678_v38 = vrot.slane %v4662_v7, 9  ;;  %v6054_v7 = vld [vmem:[%s5284_s19 + $0x44] sm:$0x1]  ;;  %v3211_v17 = vor.u32 %v3210_v4, %v6045_v41  ;;  %v3202_v28 = vrot.slane %v3201_v62, 4 }
 0x190   : > { %4920 = vmatmul.msk.bf16.gmra.mxu0 %vm701_vm4, %v3939_v19 }
 0x191   : > { %v1383_v35 = vpop.f32.mrf.mxu2  ;;  %4694 = vmatmul.msk.bf16.gmra.mxu1 %vm701_vm4, %v2601_v47  ;;  %v6043_v19 = vadd.f32 %v2322_v2, %v1721_v37  ;;  %v3812_v47 = vsel %vm5470_vm7, %v3810_v25, %v3811_v9  ;;  %v2477_v61 = vsel %vm5470_vm7, %v4678_v38, %v2476_v20  ;;  %v3542_v2 = vpack.c.b16 %v3513_v58, %v3512_v8  ;;  %v6062_v38 = vld [vmem:[%s5284_s19 + $0x4c] sm:$0xf] }
 0x192   : > { %v1435_v56 = vadd.f32 %v1383_v35, %v1031_v60  ;;  %v3911_v48 = vunpack.c.l.b16 %v3812_v47  ;;  %v1034_v20 = vadd.f32 %v1033_v53, %v5665_v26  ;;  %v2573_v60 = vunpack.c.l.b16 %v2477_v61  ;;  %v4833_v35 = vld [vmem:[%s5284_s19 + $0x48] sm:$0xf] }
 0x193   : > { %v2574_v25 = vunpack.c.l.b16 %v2480_v3  ;;  %v3214_v9 = vshll.u32 %v6054_v7, 16  ;;  %v3815_v26 = vrot.slane %v6022_v24, 5  ;;  %v3219_v27 = vshrl.u32 %v4833_v35, 16 }
 0x194   : > { %v3940_v8 = vpack.c.b16 %v3911_v48, %v3910_v50  ;;  %v3222_v4 = vshll.u32 %v4833_v35, 16  ;;  %v3228_v47 = vshll.u32 %v6062_v38, 16  ;;  %v3232_v61 = vshrl.u32 %v6062_v38, 16  ;;  %v5078_v48 = vld [vmem:[%s5284_s19 + $0x44] sm:$0x1] }
 0x195   : > { %v2324_v23 = vpop.f32.mrf.mxu0  ;;  %v3216_v58 = vrot.slane %v3214_v9, 5  ;;  %v2486_v62 = vrot.slane %v5078_v48, 5  ;;  %v3818_v24 = vrot.slane %v6054_v7, 5  ;;  %v3817_v9 = vrot.slane %v3815_v26, 4  ;;  %v6089_v48 = vld [vmem:[%s5284_s19 + $0x50] sm:$0x1] }
 0x196   : > { %v1670_v63 = vpop.f32.mrf.mxu3  ;;  %4807 = vmatmul.msk.bf16.gmra.mxu2 %vm701_vm4, %v4974_v33  ;;  %v1035_v14 = vpop.f32.mrf.mxu1  ;;  %v2602_v33 = vpack.c.b16 %v2574_v25, %v2573_v60  ;;  %v3207_v60 = vsel %vm5296_vm3, %v3202_v28, %v6045_v41  ;;  %v3224_v35 = vrot.slane %v3222_v4, 5  ;;  %v6083_v7 = vrot.slane %v3228_v47, 5 }
 0x197   : > { %v1722_v37 = vadd.f32 %v1670_v63, %v1435_v56  ;;  %v3212_v56 = vrot.slane %v3211_v17, 4  ;;  %v3514_v41 = vunpack.c.l.b16 %v3207_v60 }
 0x199   : > { %v1386_v34 = vpop.f32.mrf.mxu2  ;;  %v6067_v53 = vadd.f32 %v2324_v23, %v1722_v37  ;;  %v4663_v23 = vld [vmem:[%s5284_s19 + $0x3c] sm:$0xe]  ;;  %v1036_v37 = vadd.f32 %v1035_v14, %v5683_v43  ;;  %v3217_v25 = vsel %vm5296_vm3, %v3212_v56, %v3216_v58 }
 0x19a   : > { %v1436_v16 = vadd.f32 %v1386_v34, %v1034_v20  ;;  %v4905_v20 = vrot.slane %v4889_v11, 9  ;;  %v3234_v11 = vrot.slane %v3232_v61, 4  ;;  %v4679_v43 = vrot.slane %v4663_v23, 9 }
 0x19b   : > { %4872 = vmatmul.msk.bf16.gmra.mxu3 %vm701_vm4, %v3542_v2  ;;  %v5077_v2 = vld [vmem:[%s5284_s19 + $0x40] sm:$0xf]  ;;  %v3515_v28 = vunpack.c.l.b16 %v3217_v25 }
 0x19c   : > { %v2483_v50 = vrot.slane %v5077_v2, 5  ;;  %v3816_v58 = vsel %vm5470_vm7, %v4905_v20, %v3815_v26  ;;  %v3238_v26 = vshll.u32 %v6089_v48, 16 }
 0x19d   : > { %v2327_v55 = vpop.f32.mrf.mxu0  ;;  %v3543_v23 = vpack.c.b16 %v3515_v28, %v3514_v41  ;;  %v5079_v28 = vld [vmem:[%s5284_s19 + $0x4c] sm:$0xf] }
 0x19e   : > { %v1673_v3 = vpop.f32.mrf.mxu3  ;;  %v1038_v63 = vpop.f32.mrf.mxu1  ;;  %v2485_v14 = vrot.slane %v2483_v50, 4 }
 0x19f   : > { %v1723_v17 = vadd.f32 %v1673_v3, %v1436_v16  ;;  %v3221_v16 = vrot.slane %v3219_v27, 4  ;;  %v4975_v3 = vld [vmem:[%s5284_s19 + $0x3c] sm:$0xff] }
 0x1a0   : > { %4921 = vmatmul.msk.bf16.gmra.mxu0 %vm701_vm4, %v3940_v8  ;;  %v2487_v61 = vsel %vm5470_vm7, %v2485_v14, %v2486_v62  ;;  %v6108_v14 = vld [vmem:[%s5284_s19 + $0x58] sm:$0xf] }
 0x1a1   : > { %v1388_v34 = vpop.f32.mrf.mxu2  ;;  %4695 = vmatmul.msk.bf16.gmra.mxu1 %vm701_vm4, %v2602_v33  ;;  %v6086_v2 = vadd.f32 %v2327_v55, %v1723_v17  ;;  %v3819_v33 = vsel %vm5470_vm7, %v3817_v9, %v3818_v24  ;;  %v3225_v27 = vor.u32 %v3224_v35, %v3221_v16  ;;  %v2484_v55 = vsel %vm5470_vm7, %v4679_v43, %v2483_v50 }
 0x1a2   : > { %v1437_v8 = vadd.f32 %v1388_v34, %v1036_v37  ;;  %v3235_v17 = vor.u32 %v3234_v11, %v6083_v7  ;;  %v1039_v24 = vadd.f32 %v1038_v63, %v5704_v40  ;;  %v3912_v37 = vunpack.c.l.b16 %v3816_v58  ;;  %v4890_v11 = vld [vmem:[%s5284_s19 + $0x48] sm:$0xe] }
 0x1a3   : > { %v3913_v60 = vunpack.c.l.b16 %v3819_v33  ;;  %v2575_v9 = vunpack.c.l.b16 %v2484_v55  ;;  %v2576_v50 = vunpack.c.l.b16 %v2487_v61  ;;  %v3226_v16 = vrot.slane %v3225_v27, 4 }
 0x1a4   : > { %v3236_v62 = vrot.slane %v3235_v17, 4  ;;  %v3240_v35 = vrot.slane %v3238_v26, 5  ;;  %v3822_v43 = vrot.slane %v6062_v38, 5  ;;  %v2490_v58 = vrot.slane %v5079_v28, 5  ;;  %v4664_v38 = vld [vmem:[%s5284_s19 + $0x48] sm:$0xe] }
 0x1a5   : > { %v2329_v56 = vpop.f32.mrf.mxu0  ;;  %v2603_v41 = vpack.c.b16 %v2576_v50, %v2575_v9  ;;  %v4906_v61 = vrot.slane %v4890_v11, 9 }
 0x1a6   : > { %v1675_v4 = vpop.f32.mrf.mxu3  ;;  %4808 = vmatmul.msk.bf16.gmra.mxu2 %vm701_vm4, %v4975_v3  ;;  %v1040_v47 = vpop.f32.mrf.mxu1  ;;  %v4836_v3 = vld [vmem:[%s5284_s19 + $0x54] sm:$0xf]  ;;  %v3241_v55 = vsel %vm5296_vm3, %v3236_v62, %v3240_v35  ;;  %v4976_v35 = vld [vmem:[%s5284_s19 + $0x48] sm:$0xff] }
 0x1a7   : > { %v1724_v20 = vadd.f32 %v1675_v4, %v1437_v8  ;;  %v3941_v8 = vpack.c.b16 %v3913_v60, %v3912_v37  ;;  %v3231_v4 = vsel %vm5296_vm3, %v3226_v16, %v6083_v7  ;;  %v3243_v17 = vshrl.u32 %v4836_v3, 16  ;;  %v5080_v60 = vld [vmem:[%s5284_s19 + $0x50] sm:$0x1] }
 0x1a8   : > { %v3824_v37 = vrot.slane %v3822_v43, 4  ;;  %v3825_v7 = vrot.slane %v6089_v48, 5  ;;  %v3516_v50 = vunpack.c.l.b16 %v3231_v4  ;;  %v2492_v16 = vrot.slane %v2490_v58, 4 }
 0x1a9   : > { %v1391_v25 = vpop.f32.mrf.mxu2  ;;  %v6110_v40 = vadd.f32 %v2329_v56, %v1724_v20  ;;  %v3246_v56 = vshll.u32 %v4836_v3, 16  ;;  %v3252_v20 = vshll.u32 %v6108_v14, 16  ;;  %v3517_v11 = vunpack.c.l.b16 %v3241_v55 }
 0x1aa   : > { %v1438_v34 = vadd.f32 %v1391_v25, %v1039_v24  ;;  %v1041_v24 = vadd.f32 %v1040_v47, %v5719_v10  ;;  %v2493_v25 = vrot.slane %v5080_v60, 5  ;;  %v3823_v3 = vsel %vm5470_vm7, %v4906_v61, %v3822_v43 }
 0x1ab   : > { %4873 = vmatmul.msk.bf16.gmra.mxu3 %vm701_vm4, %v3543_v23  ;;  %v3256_v23 = vshrl.u32 %v6108_v14, 16  ;;  %v3245_v10 = vrot.slane %v3243_v17, 4  ;;  %v3248_v47 = vrot.slane %v3246_v56, 5  ;;  %v6131_v48 = vrot.slane %v3252_v20, 5 }
 0x1ac   : > { %v2494_v55 = vsel %vm5470_vm7, %v2492_v16, %v2493_v25  ;;  %v3914_v61 = vunpack.c.l.b16 %v3823_v3  ;;  %v4891_v3 = vld [vmem:[%s5284_s19 + $0x54] sm:$0xe] }
 0x1ad   : > { %v2332_v63 = vpop.f32.mrf.mxu0  ;;  %v3258_v28 = vrot.slane %v3256_v23, 4  ;;  %v3249_v20 = vor.u32 %v3248_v47, %v3245_v10 }
 0x1ae   : > { %v1678_v33 = vpop.f32.mrf.mxu3  ;;  %v1043_v27 = vpop.f32.mrf.mxu1 }
 0x1af   : > { %v1725_v26 = vadd.f32 %v1678_v33, %v1438_v34  ;;  %v4680_v34 = vrot.slane %v4664_v38, 9  ;;  %v6140_v38 = vld [vmem:[%s5284_s19 + $0x5c] sm:$0x1]  ;;  %v3259_v23 = vor.u32 %v3258_v28, %v6131_v48  ;;  %v3250_v16 = vrot.slane %v3249_v20, 4 }
 0x1b0   : > { %4922 = vmatmul.msk.bf16.gmra.mxu0 %vm701_vm4, %v3941_v8 }
 0x1b1   : > { %v1393_v9 = vpop.f32.mrf.mxu2  ;;  %4696 = vmatmul.msk.bf16.gmra.mxu1 %vm701_vm4, %v2603_v41  ;;  %v6129_v8 = vadd.f32 %v2332_v63, %v1725_v26  ;;  %v3826_v41 = vsel %vm5470_vm7, %v3824_v37, %v3825_v7  ;;  %v2491_v4 = vsel %vm5470_vm7, %v4680_v34, %v2490_v58  ;;  %v3544_v63 = vpack.c.b16 %v3517_v11, %v3516_v50  ;;  %v6148_v34 = vld [vmem:[%s5284_s19 + $0x64] sm:$0xf] }
 0x1b2   : > { %v1439_v62 = vadd.f32 %v1393_v9, %v1041_v24  ;;  %v3915_v56 = vunpack.c.l.b16 %v3826_v41  ;;  %v1044_v58 = vadd.f32 %v1043_v27, %v5595_v49  ;;  %v2577_v24 = vunpack.c.l.b16 %v2491_v4  ;;  %v4839_v9 = vld [vmem:[%s5284_s19 + $0x60] sm:$0xf] }
 0x1b3   : > { %v2578_v37 = vunpack.c.l.b16 %v2494_v55  ;;  %v3262_v7 = vshll.u32 %v6140_v38, 16  ;;  %v3829_v49 = vrot.slane %v6108_v14, 5  ;;  %v3267_v47 = vshrl.u32 %v4839_v9, 16 }
 0x1b4   : > { %v3942_v50 = vpack.c.b16 %v3915_v56, %v3914_v61  ;;  %v3270_v28 = vshll.u32 %v4839_v9, 16  ;;  %v3276_v41 = vshll.u32 %v6148_v34, 16  ;;  %v3280_v4 = vshrl.u32 %v6148_v34, 16  ;;  %v5082_v56 = vld [vmem:[%s5284_s19 + $0x5c] sm:$0x1] }
 0x1b5   : > { %v2334_v33 = vpop.f32.mrf.mxu0  ;;  %v3264_v11 = vrot.slane %v3262_v7, 5  ;;  %v2500_v20 = vrot.slane %v5082_v56, 5  ;;  %v3832_v14 = vrot.slane %v6140_v38, 5  ;;  %v3831_v7 = vrot.slane %v3829_v49, 4 }
 0x1b6   : > { %v1680_v43 = vpop.f32.mrf.mxu3  ;;  %4809 = vmatmul.msk.bf16.gmra.mxu2 %vm701_vm4, %v4976_v35  ;;  %v1045_v17 = vpop.f32.mrf.mxu1  ;;  %v2604_v35 = vpack.c.b16 %v2578_v37, %v2577_v24  ;;  %v3255_v24 = vsel %vm5296_vm3, %v3250_v16, %v6131_v48  ;;  %v3272_v9 = vrot.slane %v3270_v28, 5  ;;  %v3278_v38 = vrot.slane %v3276_v41, 5  ;;  %v6173_v16 = vld [vmem:[%s5284_s19 + $0x68] sm:$0x1] }
 0x1b7   : > { %v1726_v26 = vadd.f32 %v1680_v43, %v1439_v62  ;;  %v3260_v62 = vrot.slane %v3259_v23, 4  ;;  %v3518_v56 = vunpack.c.l.b16 %v3255_v24 }
 0x1b9   : > { %v1396_v60 = vpop.f32.mrf.mxu2  ;;  %v6153_v27 = vadd.f32 %v2334_v33, %v1726_v26  ;;  %v4665_v33 = vld [vmem:[%s5284_s19 + $0x54] sm:$0xe]  ;;  %v1046_v26 = vadd.f32 %v1045_v17, %v5614_v0  ;;  %v3265_v37 = vsel %vm5296_vm3, %v3260_v62, %v3264_v11 }
 0x1ba   : > { %v1440_v25 = vadd.f32 %v1396_v60, %v1044_v58  ;;  %v4907_v58 = vrot.slane %v4891_v3, 9  ;;  %v3282_v3 = vrot.slane %v3280_v4, 4  ;;  %v3519_v48 = vunpack.c.l.b16 %v3265_v37 }
 0x1bb   : > { %4874 = vmatmul.msk.bf16.gmra.mxu3 %vm701_vm4, %v3544_v63  ;;  %6698 = vst [vmem:[#allocation7_spill] sm:$0xff] %v6153_v27  ;;  %v5081_v63 = vld [vmem:[%s5284_s19 + $0x58] sm:$0xf] }
 0x1bc   : > { %v2497_v61 = vrot.slane %v5081_v63, 5  ;;  %v4681_v63 = vrot.slane %v4665_v33, 9  ;;  %v3830_v62 = vsel %vm5470_vm7, %v4907_v58, %v3829_v49  ;;  %v3283_v4 = vor.u32 %v3282_v3, %v3278_v38 }
 0x1bd   : > { %v2337_v10 = vpop.f32.mrf.mxu0  ;;  %v3545_v58 = vpack.c.b16 %v3519_v48, %v3518_v56  ;;  %v3916_v33 = vunpack.c.l.b16 %v3830_v62 }
 0x1be   : > { %v1683_v55 = vpop.f32.mrf.mxu3  ;;  %v1048_v43 = vpop.f32.mrf.mxu1  ;;  %v2499_v0 = vrot.slane %v2497_v61, 4 }
 0x1bf   : > { %v1727_v23 = vadd.f32 %v1683_v55, %v1440_v25  ;;  %v3269_v25 = vrot.slane %v3267_v47, 4 }
 0x1c0   : > { %4923 = vmatmul.msk.bf16.gmra.mxu0 %vm701_vm4, %v3942_v50  ;;  %v4977_v50 = vld [vmem:[%s5284_s19 + $0x54] sm:$0xff]  ;;  %v2501_v41 = vsel %vm5470_vm7, %v2499_v0, %v2500_v20  ;;  %v3836_v0 = vrot.slane %v6148_v34, 5  ;;  %v5084_v34 = vld [vmem:[%s5284_s19 + $0x68] sm:$0x1] }
 0x1c1   : > { %v1398_v60 = vpop.f32.mrf.mxu2  ;;  %4697 = vmatmul.msk.bf16.gmra.mxu1 %vm701_vm4, %v2604_v35  ;;  %v6170_v17 = vadd.f32 %v2337_v10, %v1727_v23  ;;  %v3833_v35 = vsel %vm5470_vm7, %v3831_v7, %v3832_v14  ;;  %v3273_v11 = vor.u32 %v3272_v9, %v3269_v25  ;;  %v2498_v10 = vsel %vm5470_vm7, %v4681_v63, %v2497_v61  ;;  %v4842_v9 = vld [vmem:[%s5284_s19 + $0x6c] sm:$0xf]  ;;  %v4892_v63 = vld [vmem:[%s5284_s19 + $0x60] sm:$0xe] }
 0x1c2   : > { %v1441_v55 = vadd.f32 %v1398_v60, %v1046_v26  ;;  %v3286_v23 = vshll.u32 %v6173_v16, 16  ;;  %v1049_v14 = vadd.f32 %v1048_v43, %v5635_v39  ;;  %v3917_v26 = vunpack.c.l.b16 %v3833_v35 }
 0x1c3   : > { %v2579_v37 = vunpack.c.l.b16 %v2498_v10  ;;  %v2580_v7 = vunpack.c.l.b16 %v2501_v41  ;;  %v3274_v61 = vrot.slane %v3273_v11, 4  ;;  %v3284_v25 = vrot.slane %v3283_v4, 4  ;;  %v5083_v11 = vld [vmem:[%s5284_s19 + $0x64] sm:$0xf] }
 0x1c4   : > { %v3288_v20 = vrot.slane %v3286_v23, 5  ;;  %v3943_v3 = vpack.c.b16 %v3917_v26, %v3916_v33  ;;  %v3291_v10 = vshrl.u32 %v4842_v9, 16  ;;  %v3294_v4 = vshll.u32 %v4842_v9, 16 }
 0x1c5   : > { %v2339_v27 = vpop.f32.mrf.mxu0  ;;  %v2605_v43 = vpack.c.b16 %v2580_v7, %v2579_v37  ;;  %v3279_v62 = vsel %vm5296_vm3, %v3274_v61, %v3278_v38  ;;  %v3838_v37 = vrot.slane %v3836_v0, 4  ;;  %v3839_v7 = vrot.slane %v6173_v16, 5  ;;  %v4978_v61 = vld [vmem:[%s5284_s19 + $0x60] sm:$0xff] }
 0x1c6   : > { %v1685_v47 = vpop.f32.mrf.mxu3  ;;  %4810 = vmatmul.msk.bf16.gmra.mxu2 %vm701_vm4, %v4977_v50  ;;  %v1050_v28 = vpop.f32.mrf.mxu1  ;;  %v3289_v35 = vsel %vm5296_vm3, %v3284_v25, %v3288_v20  ;;  %v3520_v26 = vunpack.c.l.b16 %v3279_v62 }
 0x1c7   : > { %v1728_v49 = vadd.f32 %v1685_v47, %v1441_v55  ;;  %v6189_v55 = vld [vmem:[%s5284_s19 + $0x70] sm:$0xf]  ;;  %v2504_v47 = vrot.slane %v5083_v11, 5  ;;  %v1051_v38 = vadd.f32 %v1050_v28, %v5654_v6  ;;  %v6214_v28 = vld [vmem:[%s5284_s19 + $0x74] sm:$0x1]  ;;  %v3840_v16 = vsel %vm5470_vm7, %v3838_v37, %v3839_v7 }
 0x1c8   : > { %v3300_v23 = vshll.u32 %v6189_v55, 16 }
 0x1c9   : > { %v1401_v24 = vpop.f32.mrf.mxu2  ;;  %v6191_v50 = vadd.f32 %v2339_v27, %v1728_v49  ;;  %v4666_v27 = vld [vmem:[%s5284_s19 + $0x60] sm:$0xe]  ;;  %v3304_v49 = vshrl.u32 %v6189_v55, 16  ;;  %v2506_v20 = vrot.slane %v2504_v47, 4 }
 0x1ca   : > { %v1442_v60 = vadd.f32 %v1401_v24, %v1049_v14  ;;  %v4908_v14 = vrot.slane %v4892_v63, 9  ;;  %v3521_v24 = vunpack.c.l.b16 %v3289_v35  ;;  %v4682_v25 = vrot.slane %v4666_v27, 9 }
 0x1cb   : > { %4875 = vmatmul.msk.bf16.gmra.mxu3 %vm701_vm4, %v3545_v58  ;;  %v2507_v58 = vrot.slane %v5084_v34, 5  ;;  %v6211_v11 = vrot.slane %v3300_v23, 5  ;;  %v3306_v6 = vrot.slane %v3304_v49, 4  ;;  %v3310_v23 = vshll.u32 %v6214_v28, 16 }
 0x1cd   : > { %v2342_v39 = vpop.f32.mrf.mxu0  ;;  %v3312_v7 = vrot.slane %v3310_v23, 5 }
 0x1ce   : > { %v1688_v56 = vpop.f32.mrf.mxu3  ;;  %v1053_v48 = vpop.f32.mrf.mxu1 }
 0x1cf   : > { %v1729_v41 = vadd.f32 %v1688_v56, %v1442_v60  ;;  %v3293_v56 = vrot.slane %v3291_v10, 4  ;;  %v2505_v10 = vsel %vm5470_vm7, %v4682_v25, %v2504_v47  ;;  %v1054_v49 = vadd.f32 %v1053_v48, %v5673_v45  ;;  %v4845_v47 = vld [vmem:[%s5284_s19 + $0x78] sm:$0xf] }
 0x1d0   : > { %4924 = vmatmul.msk.bf16.gmra.mxu0 %vm701_vm4, %v3943_v3  ;;  %v3296_v3 = vrot.slane %v3294_v4, 5  ;;  %v3843_v25 = vrot.slane %v6189_v55, 5 }
 0x1d1   : > { %v1403_v33 = vpop.f32.mrf.mxu2  ;;  %4698 = vmatmul.msk.bf16.gmra.mxu1 %vm701_vm4, %v2605_v43  ;;  %v6209_v9 = vadd.f32 %v2342_v39, %v1729_v41  ;;  %v3837_v43 = vsel %vm5470_vm7, %v4908_v14, %v3836_v0  ;;  %v3546_v39 = vpack.c.b16 %v3521_v24, %v3520_v26  ;;  %v2508_v41 = vsel %vm5470_vm7, %v2506_v20, %v2507_v58 }
 0x1d2   : > { %v1443_v60 = vadd.f32 %v1403_v33, %v1051_v38  ;;  %v3297_v4 = vor.u32 %v3296_v3, %v3293_v56  ;;  %v3307_v0 = vor.u32 %v3306_v6, %v6211_v11  ;;  %v3918_v34 = vunpack.c.l.b16 %v3837_v43  ;;  %v6235_v56 = vld [vmem:[%s5284_s19 + $0x7c] sm:$0xf] }
 0x1d3   : > { %v3919_v38 = vunpack.c.l.b16 %v3840_v16  ;;  %v2581_v33 = vunpack.c.l.b16 %v2505_v10  ;;  %v2582_v26 = vunpack.c.l.b16 %v2508_v41  ;;  %v3315_v3 = vshrl.u32 %v4845_v47, 16  ;;  %v5085_v10 = vld [vmem:[%s5284_s19 + $0x70] sm:$0xf] }
 0x1d4   : > { %v3298_v58 = vrot.slane %v3297_v4, 4  ;;  %v3308_v37 = vrot.slane %v3307_v0, 4  ;;  %v3318_v6 = vshll.u32 %v4845_v47, 16  ;;  %v2511_v41 = vrot.slane %v5085_v10, 5 }
 0x1d5   : > { %v2344_v63 = vpop.f32.mrf.mxu0  ;;  %v2606_v20 = vpack.c.b16 %v2582_v26, %v2581_v33  ;;  %v3845_v23 = vrot.slane %v3843_v25, 4 }
 0x1d6   : > { %v1690_v62 = vpop.f32.mrf.mxu3  ;;  %4811 = vmatmul.msk.bf16.gmra.mxu2 %vm701_vm4, %v4978_v61  ;;  %v1055_v35 = vpop.f32.mrf.mxu1  ;;  %v3944_v61 = vpack.c.b16 %v3919_v38, %v3918_v34  ;;  %v3303_v55 = vsel %vm5296_vm3, %v3298_v58, %v6211_v11  ;;  %v3328_v34 = vshrl.u32 %v6235_v56, 16  ;;  %v3317_v11 = vrot.slane %v3315_v3, 4  ;;  %v6259_v3 = vld [vmem:[%s5284_s19 + $0x80] sm:$0x1] }
 0x1d7   : > { %v1730_v27 = vadd.f32 %v1690_v62, %v1443_v60  ;;  %v4893_v60 = vld [vmem:[%s5284_s19 + $0x6c] sm:$0xe]  ;;  %v1056_v0 = vadd.f32 %v1055_v35, %v5696_v12  ;;  %v3320_v33 = vrot.slane %v3318_v6, 5  ;;  %v2513_v47 = vrot.slane %v2511_v41, 4 }
 0x1d8   : > { %v4909_v62 = vrot.slane %v4893_v60, 9  ;;  %v3522_v12 = vunpack.c.l.b16 %v3303_v55 }
 0x1d9   : > { %v1406_v14 = vpop.f32.mrf.mxu2  ;;  %v6232_v45 = vadd.f32 %v2344_v63, %v1730_v27  ;;  %v3313_v63 = vsel %vm5296_vm3, %v3308_v37, %v3312_v7  ;;  %v3846_v27 = vrot.slane %v6214_v28, 5  ;;  %v5086_v28 = vld [vmem:[%s5284_s19 + $0x74] sm:$0x1]  ;;  %v3321_v6 = vor.u32 %v3320_v33, %v3317_v11  ;;  %v4894_v33 = vld [vmem:[%s5284_s19 + $0x78] sm:$0xe] }
 0x1da   : > { %v1444_v24 = vadd.f32 %v1406_v14, %v1054_v49  ;;  %v3324_v49 = vshll.u32 %v6235_v56, 16  ;;  %v2514_v58 = vrot.slane %v5086_v28, 5  ;;  %v3523_v35 = vunpack.c.l.b16 %v3313_v63  ;;  %v6273_v28 = vld [vmem:[%s5284_s19 + $0x88] sm:$0xf] }
 0x1db   : > { %4876 = vmatmul.msk.bf16.gmra.mxu3 %vm701_vm4, %v3546_v39  ;;  %v4667_v39 = vld [vmem:[%s5284_s19 + $0x6c] sm:$0xe]  ;;  %v3844_v7 = vsel %vm5470_vm7, %v4909_v62, %v3843_v25  ;;  %v3847_v60 = vsel %vm5470_vm7, %v3845_v23, %v3846_v27  ;;  %v3334_v23 = vshll.u32 %v6259_v3, 16  ;;  %v3322_v11 = vrot.slane %v3321_v6, 4 }
 0x1dc   : > { %v4683_v14 = vrot.slane %v4667_v39, 9  ;;  %v2515_v25 = vsel %vm5470_vm7, %v2513_v47, %v2514_v58  ;;  %v3920_v55 = vunpack.c.l.b16 %v3844_v7  ;;  %v3921_v63 = vunpack.c.l.b16 %v3847_v60 }
 0x1dd   : > { %v2347_v48 = vpop.f32.mrf.mxu0 }
 0x1de   : > { %v1693_v43 = vpop.f32.mrf.mxu3  ;;  %v1058_v16 = vpop.f32.mrf.mxu1  ;;  %v2512_v10 = vsel %vm5470_vm7, %v4683_v14, %v2511_v41  ;;  %v4848_v41 = vld [vmem:[%s5284_s19 + $0x84] sm:$0xf]  ;;  %v3945_v14 = vpack.c.b16 %v3921_v63, %v3920_v55 }
 0x1df   : > { %v1731_v4 = vadd.f32 %v1693_v43, %v1444_v24  ;;  %v4979_v24 = vld [vmem:[%s5284_s19 + $0x6c] sm:$0xff]  ;;  %v1059_v27 = vadd.f32 %v1058_v16, %v5715_v59  ;;  %v3336_v59 = vrot.slane %v3334_v23, 5  ;;  %v4910_v16 = vrot.slane %v4894_v33, 9  ;;  %v4980_v33 = vld [vmem:[%s5284_s19 + $0x78] sm:$0xff] }
 0x1e0   : > { %4925 = vmatmul.msk.bf16.gmra.mxu0 %vm701_vm4, %v3944_v61  ;;  %v3326_v61 = vrot.slane %v3324_v49, 5  ;;  %v3339_v60 = vshrl.u32 %v4848_v41, 16 }
 0x1e1   : > { %v1408_v38 = vpop.f32.mrf.mxu2  ;;  %4699 = vmatmul.msk.bf16.gmra.mxu1 %vm701_vm4, %v2606_v20  ;;  %v6252_v37 = vadd.f32 %v2347_v48, %v1731_v4  ;;  %v3330_v20 = vrot.slane %v3328_v34, 4  ;;  %v3547_v4 = vpack.c.b16 %v3523_v35, %v3522_v12  ;;  %v2583_v34 = vunpack.c.l.b16 %v2512_v10 }
 0x1e2   : > { %v1445_v26 = vadd.f32 %v1408_v38, %v1056_v0  ;;  %v2584_v38 = vunpack.c.l.b16 %v2515_v25  ;;  %v3327_v7 = vsel %vm5296_vm3, %v3322_v11, %v3326_v61  ;;  %v3853_v10 = vrot.slane %v6259_v3, 5  ;;  %v4668_v25 = vld [vmem:[%s5284_s19 + $0x78] sm:$0xe] }
 0x1e3   : > { %v3331_v0 = vor.u32 %v3330_v20, %v3326_v61  ;;  %v3342_v20 = vshll.u32 %v4848_v41, 16  ;;  %v5088_v41 = vld [vmem:[%s5284_s19 + $0x80] sm:$0x1] }
 0x1e4   : > { %v2607_v35 = vpack.c.b16 %v2584_v38, %v2583_v34  ;;  %v3341_v34 = vrot.slane %v3339_v60, 4 }
 0x1e5   : > { %v2349_v43 = vpop.f32.mrf.mxu0  ;;  %v3332_v47 = vrot.slane %v3331_v0, 4  ;;  %v3524_v0 = vunpack.c.l.b16 %v3327_v7  ;;  %v3344_v38 = vrot.slane %v3342_v20, 5  ;;  %v4850_v7 = vld [vmem:[%s5284_s19 + $0x8c] sm:$0x1] }
 0x1e6   : > { %v1695_v39 = vpop.f32.mrf.mxu3  ;;  %4812 = vmatmul.msk.bf16.gmra.mxu2 %vm701_vm4, %v4979_v24  ;;  %v1060_v48 = vpop.f32.mrf.mxu1 }
 0x1e7   : > { %v1732_v62 = vadd.f32 %v1695_v39, %v1445_v26  ;;  %v3850_v26 = vrot.slane %v6235_v56, 5  ;;  %v5087_v56 = vld [vmem:[%s5284_s19 + $0x7c] sm:$0xf]  ;;  %v1061_v61 = vadd.f32 %v1060_v48, %v5732_v32 }
 0x1e9   : > { %v1411_v49 = vpop.f32.mrf.mxu2  ;;  %v6275_v58 = vadd.f32 %v2349_v43, %v1732_v62  ;;  %v3852_v63 = vrot.slane %v3850_v26, 4  ;;  %v3348_v43 = vshll.u32 %v6273_v28, 16  ;;  %v3352_v62 = vshrl.u32 %v6273_v28, 16 }
 0x1ea   : > { %v1446_v24 = vadd.f32 %v1411_v49, %v1059_v27  ;;  %v3337_v27 = vsel %vm5296_vm3, %v3332_v47, %v3336_v59  ;;  %v3851_v23 = vsel %vm5470_vm7, %v4910_v16, %v3850_v26  ;;  %v4684_v49 = vrot.slane %v4668_v25, 9 }
 0x1eb   : > { %4877 = vmatmul.msk.bf16.gmra.mxu3 %vm701_vm4, %v3547_v4  ;;  %v2518_v4 = vrot.slane %v5087_v56, 5  ;;  %v3525_v48 = vunpack.c.l.b16 %v3337_v27  ;;  %v3854_v47 = vsel %vm5470_vm7, %v3852_v63, %v3853_v10  ;;  %v6297_v59 = vrot.slane %v3348_v43, 5 }
 0x1ec   : > { %v3922_v16 = vunpack.c.l.b16 %v3851_v23  ;;  %v3923_v20 = vunpack.c.l.b16 %v3854_v47  ;;  %v3345_v25 = vor.u32 %v3344_v38, %v3341_v34  ;;  %v3358_v43 = vshll.u32 %v4850_v7, 16  ;;  %v6311_v47 = vld [vmem:[%s5284_s19 + $0x94] sm:$0xf] }
 0x1ed   : > { %v2352_v12 = vpop.f32.mrf.mxu0 }
 0x1ee   : > { %v1698_v6 = vpop.f32.mrf.mxu3  ;;  %v2675_v39 = vpop.f32.mrf.mxu1  ;;  %v3360_v38 = vrot.slane %v3358_v43, 5 }
 0x1ef   : > { %v1733_v55 = vadd.f32 %v1698_v6, %v1446_v24  ;;  %v2520_v24 = vrot.slane %v2518_v4, 4  ;;  %v2755_v27 = vadd.f32 %v2675_v39, %v5749_v46 }
 0x1f0   : > { %4926 = vmatmul.msk.bf16.gmra.mxu0 %vm701_vm4, %v3945_v14  ;;  %v2521_v14 = vrot.slane %v5088_v41, 5  ;;  %v4851_v41 = vld [vmem:[%s5284_s19 + $0x90] sm:$0xf] }
 0x1f1   : > { %v1413_v3 = vpop.f32.mrf.mxu2  ;;  %4700 = vmatmul.msk.bf16.gmra.mxu1 %vm701_vm4, %v2607_v35  ;;  %v6293_v32 = vadd.f32 %v2352_v12, %v1733_v55  ;;  %v3354_v35 = vrot.slane %v3352_v62, 4  ;;  %v2519_v12 = vsel %vm5470_vm7, %v4684_v49, %v2518_v4  ;;  %v3548_v55 = vpack.c.b16 %v3525_v48, %v3524_v0  ;;  %v4895_v62 = vld [vmem:[%s5284_s19 + $0x84] sm:$0xe] }
 0x1f2   : > { %v1447_v11 = vadd.f32 %v1413_v3, %v1061_v61  ;;  %v2522_v10 = vsel %vm5470_vm7, %v2520_v24, %v2521_v14  ;;  %v3857_v61 = vrot.slane %v6273_v28, 5  ;;  %v2585_v23 = vunpack.c.l.b16 %v2519_v12  ;;  %v5089_v12 = vld [vmem:[%s5284_s19 + $0x88] sm:$0xf] }
 0x1f3   : > { %v3355_v63 = vor.u32 %v3354_v35, %v6297_v59  ;;  %v3946_v4 = vpack.c.b16 %v3923_v20, %v3922_v16  ;;  %v3346_v49 = vrot.slane %v3345_v25, 4  ;;  %v3860_v28 = vrot.slane %v4850_v7, 5  ;;  %v6323_v7 = vld [vmem:[%s6688_s2] ss:$0 sm:$0xff] }
 0x1f4   : > { %v3859_v24 = vrot.slane %v3857_v61, 4  ;;  %v3363_v46 = vshrl.u32 %v4851_v41, 16  ;;  %v3366_v35 = vshll.u32 %v4851_v41, 16  ;;  %v3372_v16 = vshll.u32 %v6311_v47, 16 }
 0x1f5   : > { %v2354_v26 = vpop.f32.mrf.mxu0  ;;  %v3356_v34 = vrot.slane %v3355_v63, 4  ;;  %v3376_v25 = vshrl.u32 %v6311_v47, 16 }
 0x1f6   : > { %v1700_v60 = vpop.f32.mrf.mxu3  ;;  %4813 = vmatmul.msk.bf16.gmra.mxu2 %vm701_vm4, %v4980_v33  ;;  %v2677_v6 = vpop.f32.mrf.mxu1  ;;  %v2586_v33 = vunpack.c.l.b16 %v2522_v10  ;;  %v2525_v10 = vrot.slane %v5089_v12, 5  ;;  %v6340_v41 = vrot.slane %v3372_v16, 5 }
 0x1f7   : > { %v1734_v56 = vadd.f32 %v1700_v60, %v1447_v11  ;;  %v4911_v11 = vrot.slane %v4895_v62, 9  ;;  %v3361_v63 = vsel %vm5296_vm3, %v3356_v34, %v3360_v38  ;;  %v3861_v62 = vsel %vm5470_vm7, %v3859_v24, %v3860_v28 }
 0x1f8   : > { %v2608_v48 = vpack.c.b16 %v2586_v33, %v2585_v23  ;;  %v3368_v33 = vrot.slane %v3366_v35, 5  ;;  %v3378_v38 = vrot.slane %v3376_v25, 4 }
 0x1f9   : > { %v2962_v3 = vpop.f32.mrf.mxu2  ;;  %v6314_v39 = vadd.f32 %v2354_v26, %v1734_v56  ;;  %v3351_v26 = vsel %vm5296_vm3, %v3346_v49, %v6297_v59  ;;  %v4669_v56 = vld [vmem:[%s5284_s19 + $0x84] sm:$0xe]  ;;  %v3858_v43 = vsel %vm5470_vm7, %v4911_v11, %v3857_v61  ;;  %v2756_v59 = vadd.f32 %v2677_v6, %v5762_v42  ;;  %v5090_v61 = vld [vmem:[%s5284_s19 + $0x8c] sm:$0x1] }
 0x1fa   : > { %v3042_v0 = vadd.f32 %v2962_v3, %v2755_v27  ;;  %v3365_v27 = vrot.slane %v3363_v46, 4  ;;  %v4685_v49 = vrot.slane %v4669_v56, 9  ;;  %v2528_v34 = vrot.slane %v5090_v61, 5 }
 0x1fb   : > { %4878 = vmatmul.msk.bf16.gmra.mxu3 %vm701_vm4, %v3548_v55  ;;  %v3526_v28 = vunpack.c.l.b16 %v3351_v26  ;;  %v3527_v46 = vunpack.c.l.b16 %v3361_v63  ;;  %v3379_v26 = vor.u32 %v3378_v38, %v6340_v41 }
 0x1fc   : > { %v2526_v12 = vsel %vm5470_vm7, %v4685_v49, %v2525_v10  ;;  %v6361_v49 = vld [vmem:[%s5284_s19 + $0xa0] sm:$0xf] }
 0x1fd   : > { %v4014_v14 = vpop.f32.mrf.mxu0  ;;  %v3549_v63 = vpack.c.b16 %v3527_v46, %v3526_v28  ;;  %v3396_v28 = vshll.u32 %v6361_v49, 16  ;;  %v3400_v46 = vshrl.u32 %v6361_v49, 16 }
 0x1fe   : > { %v3616_v60 = vpop.f32.mrf.mxu3  ;;  %v2680_v20 = vpop.f32.mrf.mxu1 }
 0x1ff   : > { %v3696_v55 = vadd.f32 %v3616_v60, %v3042_v0  ;;  %v2527_v0 = vrot.slane %v2525_v10, 4  ;;  %v3924_v60 = vunpack.c.l.b16 %v3858_v43  ;;  %v2587_v10 = vunpack.c.l.b16 %v2526_v12 }
 0x200   : > { %4927 = vmatmul.msk.bf16.gmra.mxu0 %vm701_vm4, %v3946_v4  ;;  %v4981_v4 = vld [vmem:[%s5284_s19 + $0x84] sm:$0xff] }
 0x201   : > { %v4094_v3 = vadd.f32 %v4014_v14, %v3696_v55  ;;  %v2964_v23 = vpop.f32.mrf.mxu2  ;;  %4701 = vmatmul.msk.bf16.gmra.mxu1 %vm701_vm4, %v2608_v48  ;;  %v6346_v14 = vld [vmem:[%s5284_s19 + $0x98] sm:$0x1]  ;;  %v3925_v48 = vunpack.c.l.b16 %v3861_v62  ;;  %v2529_v25 = vsel %vm5470_vm7, %v2527_v0, %v2528_v34  ;;  %v3369_v55 = vor.u32 %v3368_v33, %v3365_v27 }
 0x202   : > { %v3043_v24 = vadd.f32 %v2964_v23, %v2756_v59  ;;  %v3382_v43 = vshll.u32 %v6346_v14, 16  ;;  %v2588_v23 = vunpack.c.l.b16 %v2529_v25  ;;  %v3380_v0 = vrot.slane %v3379_v26, 4 }
 0x203   : > { %v4130_v11 = vadd.f32 %v6323_v7, %v4094_v3  ;;  %v2757_v3 = vadd.f32 %v2680_v20, %v5775_v15  ;;  %v3947_v27 = vpack.c.b16 %v3925_v48, %v3924_v60  ;;  %v3370_v33 = vrot.slane %v3369_v55, 4  ;;  %v5091_v55 = vld [vmem:[%s5284_s19 + $0x94] sm:$0xf] }
 0x204   : > { %v3384_v38 = vrot.slane %v3382_v43, 5  ;;  %v3864_v15 = vrot.slane %v6311_v47, 5  ;;  %v2609_v60 = vpack.c.b16 %v2588_v23, %v2587_v10  ;;  %v3867_v25 = vrot.slane %v6346_v14, 5 }
 0x205   : > { %v4162_v42 = vmax.f32 %v4130_v11, 0.0  ;;  %v4016_v6 = vpop.f32.mrf.mxu0  ;;  %v4896_v11 = vld [vmem:[%s5284_s19 + $0x90] sm:$0xe]  ;;  %v2532_v26 = vrot.slane %v5091_v55, 5  ;;  %v3402_v10 = vrot.slane %v3400_v46, 4 }
 0x206   : > { %v3618_v35 = vpop.f32.mrf.mxu3  ;;  %4814 = vmatmul.msk.bf16.gmra.mxu2 %vm701_vm4, %v4981_v4  ;;  %v2682_v16 = vpop.f32.mrf.mxu1  ;;  %v4854_v4 = vld [vmem:[%s5284_s19 + $0x9c] sm:$0xf]  ;;  %v4912_v12 = vrot.slane %v4896_v11, 9  ;;  %v3866_v43 = vrot.slane %v3864_v15, 4  ;;  %v5092_v11 = vld [vmem:[%s5284_s19 + $0x98] sm:$0x1] }
 0x207   : > { %4194 = vst [vmem:[%s6354_s9] sm:$0xff] %v4162_v42  ;;  %v3697_v56 = vadd.f32 %v3618_v35, %v3043_v24  ;;  %v3387_v20 = vshrl.u32 %v4854_v4, 16  ;;  %v3390_v24 = vshll.u32 %v4854_v4, 16  ;;  %v2758_v4 = vadd.f32 %v2682_v16, %v5788_v13 }
 0x208   : > { %v3868_v13 = vsel %vm5470_vm7, %v3866_v43, %v3867_v25 }
 0x209   : > { %v4095_v62 = vadd.f32 %v4016_v6, %v3697_v56  ;;  %v2967_v59 = vpop.f32.mrf.mxu2  ;;  %v3375_v56 = vsel %vm5296_vm3, %v3370_v33, %v6340_v41  ;;  %v3392_v14 = vrot.slane %v3390_v24, 5  ;;  %v6384_v41 = vld [vmem:[%s5284_s19 + $0xa4] sm:$0x1]  ;;  %v4982_v33 = vld [vmem:[%s5284_s19 + $0x90] sm:$0xff]  ;;  %v3927_v43 = vunpack.c.l.b16 %v3868_v13 }
 0x20a   : > { %v3044_v34 = vadd.f32 %v2967_v59, %v2757_v3  ;;  %v3389_v3 = vrot.slane %v3387_v20, 4  ;;  %v6379_v59 = vrot.slane %v3396_v28, 5  ;;  %v3865_v28 = vsel %vm5470_vm7, %v4912_v12, %v3864_v15 }
 0x20b   : > { %v4131_v61 = vadd.f32 %v6323_v7, %v4095_v62  ;;  %4879 = vmatmul.msk.bf16.gmra.mxu3 %vm701_vm4, %v3549_v63  ;;  %v3385_v63 = vsel %vm5296_vm3, %v3380_v0, %v3384_v38  ;;  %v4670_v62 = vld [vmem:[%s5284_s19 + $0x90] sm:$0xe]  ;;  %v3528_v0 = vunpack.c.l.b16 %v3375_v56  ;;  %v2534_v38 = vrot.slane %v2532_v26, 4 }
 0x20c   : > { %v3529_v24 = vunpack.c.l.b16 %v3385_v63  ;;  %v3393_v16 = vor.u32 %v3392_v14, %v3389_v3  ;;  %v3403_v46 = vor.u32 %v3402_v10, %v6379_v59  ;;  %v3926_v63 = vunpack.c.l.b16 %v3865_v28 }
 0x20d   : > { %v4163_v42 = vmax.f32 %v4131_v61, 0.0  ;;  %v4019_v6 = vpop.f32.mrf.mxu0  ;;  %v3871_v10 = vrot.slane %v6361_v49, 5 }
 0x20e   : > { %v3621_v48 = vpop.f32.mrf.mxu3  ;;  %v2685_v35 = vpop.f32.mrf.mxu1  ;;  %v3550_v25 = vpack.c.b16 %v3529_v24, %v3528_v0  ;;  %v3404_v3 = vrot.slane %v3403_v46, 4  ;;  %v3948_v0 = vpack.c.b16 %v3927_v43, %v3926_v63 }
 0x20f   : > { %4195 = vst [vmem:[%s6354_s9 + $0x8] sm:$0xff] %v4163_v42  ;;  %v3698_v47 = vadd.f32 %v3621_v48, %v3044_v34  ;;  %v4686_v34 = vrot.slane %v4670_v62, 9  ;;  %v2535_v42 = vrot.slane %v5092_v11, 5  ;;  %v3394_v62 = vrot.slane %v3393_v16, 4 }
 0x210   : > { %4928 = vmatmul.msk.bf16.gmra.mxu0 %vm701_vm4, %v3947_v27  ;;  %v3874_v16 = vrot.slane %v6384_v41, 5 }
 0x211   : > { %v4096_v23 = vadd.f32 %v4019_v6, %v3698_v47  ;;  %v2969_v61 = vpop.f32.mrf.mxu2  ;;  %4702 = vmatmul.msk.bf16.gmra.mxu1 %vm701_vm4, %v2609_v60  ;;  %v3406_v6 = vshll.u32 %v6384_v41, 16  ;;  %v2533_v56 = vsel %vm5470_vm7, %v4686_v34, %v2532_v26  ;;  %v2536_v15 = vsel %vm5470_vm7, %v2534_v38, %v2535_v42  ;;  %v4897_v34 = vld [vmem:[%s5284_s19 + $0x9c] sm:$0xe]  ;;  %v4857_v38 = vld [vmem:[%s5284_s19 + $0xa8] sm:$0xf] }
 0x212   : > { %v3045_v20 = vadd.f32 %v2969_v61, %v2758_v4  ;;  %v2759_v4 = vadd.f32 %v2685_v35, %v5801_v57  ;;  %v2589_v61 = vunpack.c.l.b16 %v2533_v56  ;;  %v3399_v49 = vsel %vm5296_vm3, %v3394_v62, %v6379_v59 }
 0x213   : > { %v4132_v27 = vadd.f32 %v6323_v7, %v4096_v23  ;;  %v3408_v14 = vrot.slane %v3406_v6, 5  ;;  %v4913_v35 = vrot.slane %v4897_v34, 9  ;;  %v3411_v46 = vshrl.u32 %v4857_v38, 16  ;;  %v5094_v34 = vld [vmem:[%s5284_s19 + $0xa4] sm:$0x1] }
 0x214   : > { %v3414_v56 = vshll.u32 %v4857_v38, 16  ;;  %v3530_v63 = vunpack.c.l.b16 %v3399_v49  ;;  %v2542_v38 = vrot.slane %v5094_v34, 5 }
 0x215   : > { %v4164_v60 = vmax.f32 %v4132_v27, 0.0  ;;  %v4021_v48 = vpop.f32.mrf.mxu0  ;;  %v3409_v57 = vsel %vm5296_vm3, %v3404_v3, %v3408_v14  ;;  %v3873_v27 = vrot.slane %v3871_v10, 4  ;;  %v3872_v41 = vsel %vm5470_vm7, %v4913_v35, %v3871_v10 }
 0x216   : > { %v3623_v55 = vpop.f32.mrf.mxu3  ;;  %4815 = vmatmul.msk.bf16.gmra.mxu2 %vm701_vm4, %v4982_v33  ;;  %v2687_v47 = vpop.f32.mrf.mxu1  ;;  %v2590_v33 = vunpack.c.l.b16 %v2536_v15  ;;  %v4671_v15 = vld [vmem:[%s5284_s19 + $0x9c] sm:$0xe]  ;;  %v3531_v43 = vunpack.c.l.b16 %v3409_v57  ;;  %v3928_v35 = vunpack.c.l.b16 %v3872_v41 }
 0x217   : > { %4196 = vst [vmem:[%s6354_s9 + $0x10] sm:$0xff] %v4164_v60  ;;  %v3699_v12 = vadd.f32 %v3623_v55, %v3045_v20  ;;  %v6413_v20 = vld [vmem:[%s5284_s19 + $0xac] sm:$0xf]  ;;  %v2760_v3 = vadd.f32 %v2687_v47, %v5814_v54  ;;  %v6434_v47 = vld [vmem:[%s5284_s19 + $0xb0] sm:$0x1] }
 0x218   : > { %v2610_v13 = vpack.c.b16 %v2590_v33, %v2589_v61  ;;  %v4687_v61 = vrot.slane %v4671_v15, 9 }
 0x219   : > { %v4097_v23 = vadd.f32 %v4021_v48, %v3699_v12  ;;  %v2972_v26 = vpop.f32.mrf.mxu2  ;;  %v5093_v48 = vld [vmem:[%s5284_s19 + $0xa0] sm:$0xf]  ;;  %v3420_v12 = vshll.u32 %v6413_v20, 16 }
 0x21a   : > { %v3046_v42 = vadd.f32 %v2972_v26, %v2759_v4  ;;  %v2539_v55 = vrot.slane %v5093_v48, 5  ;;  %v3413_v4 = vrot.slane %v3411_v46, 4  ;;  %v4983_v26 = vld [vmem:[%s5284_s19 + $0x9c] sm:$0xff]  ;;  %v3551_v48 = vpack.c.b16 %v3531_v43, %v3530_v63 }
 0x21b   : > { %v4133_v11 = vadd.f32 %v6323_v7, %v4097_v23  ;;  %4880 = vmatmul.msk.bf16.gmra.mxu3 %vm701_vm4, %v3550_v25  ;;  %v3424_v25 = vshrl.u32 %v6413_v20, 16  ;;  %v3875_v23 = vsel %vm5470_vm7, %v3873_v27, %v3874_v16 }
 0x21c   : > { %v2541_v33 = vrot.slane %v2539_v55, 4 }
 0x21d   : > { %v4165_v24 = vmax.f32 %v4133_v11, 0.0  ;;  %v4024_v28 = vpop.f32.mrf.mxu0  ;;  %v3416_v11 = vrot.slane %v3414_v56, 5  ;;  %v3426_v54 = vrot.slane %v3424_v25, 4 }
 0x21e   : > { %v3626_v6 = vpop.f32.mrf.mxu3  ;;  %v2690_v60 = vpop.f32.mrf.mxu1  ;;  %v2543_v16 = vsel %vm5470_vm7, %v2541_v33, %v2542_v38 }
 0x21f   : > { %4197 = vst [vmem:[%s6354_s9 + $0x18] sm:$0xff] %v4165_v24  ;;  %v3700_v59 = vadd.f32 %v3626_v6, %v3046_v42  ;;  %v6431_v42 = vrot.slane %v3420_v12, 5  ;;  %v3929_v24 = vunpack.c.l.b16 %v3875_v23  ;;  %v3417_v46 = vor.u32 %v3416_v11, %v3413_v4 }
 0x220   : > { %4929 = vmatmul.msk.bf16.gmra.mxu0 %vm701_vm4, %v3948_v0  ;;  %v2761_v12 = vadd.f32 %v2690_v60, %v5826_v31 }
 0x221   : > { %v4098_v62 = vadd.f32 %v4024_v28, %v3700_v59  ;;  %v2974_v14 = vpop.f32.mrf.mxu2  ;;  %4703 = vmatmul.msk.bf16.gmra.mxu1 %vm701_vm4, %v2610_v13  ;;  %v2540_v13 = vsel %vm5470_vm7, %v4687_v61, %v2539_v55  ;;  %v3427_v56 = vor.u32 %v3426_v54, %v6431_v42  ;;  %v3430_v59 = vshll.u32 %v6434_v47, 16  ;;  %v6447_v55 = vld [vmem:[%s5284_s19 + $0xb8] sm:$0xf]  ;;  %v4898_v61 = vld [vmem:[%s5284_s19 + $0xa8] sm:$0xe] }
 0x222   : > { %v3047_v0 = vadd.f32 %v2974_v14, %v2760_v3  ;;  %v2591_v41 = vunpack.c.l.b16 %v2540_v13  ;;  %v4860_v3 = vld [vmem:[%s5284_s19 + $0xb4] sm:$0xf]  ;;  %v3949_v14 = vpack.c.b16 %v3929_v24, %v3928_v35  ;;  %v3418_v23 = vrot.slane %v3417_v46, 4  ;;  %v4672_v46 = vld [vmem:[%s5284_s19 + $0xa8] sm:$0xe] }
 0x223   : > { %v4134_v10 = vadd.f32 %v6323_v7, %v4098_v62  ;;  %v2592_v62 = vunpack.c.l.b16 %v2543_v16  ;;  %v3428_v43 = vrot.slane %v3427_v56, 4  ;;  %v3435_v33 = vshrl.u32 %v4860_v3, 16 }
 0x224   : > { %v3438_v31 = vshll.u32 %v4860_v3, 16  ;;  %v3444_v60 = vshll.u32 %v6447_v55, 16  ;;  %v3448_v34 = vshrl.u32 %v6447_v55, 16  ;;  %v3423_v24 = vsel %vm5296_vm3, %v3418_v23, %v6431_v42 }
 0x225   : > { %v4166_v49 = vmax.f32 %v4134_v10, 0.0  ;;  %v4026_v57 = vpop.f32.mrf.mxu0  ;;  %v2611_v10 = vpack.c.b16 %v2592_v62, %v2591_v41  ;;  %v4914_v16 = vrot.slane %v4898_v61, 9  ;;  %v6470_v41 = vld [vmem:[%s5284_s19 + $0xbc] sm:$0x1]  ;;  %v4984_v62 = vld [vmem:[%s5284_s19 + $0xa8] sm:$0xff]  ;;  %v4688_v3 = vrot.slane %v4672_v46, 9 }
 0x226   : > { %v3628_v27 = vpop.f32.mrf.mxu3  ;;  %4816 = vmatmul.msk.bf16.gmra.mxu2 %vm701_vm4, %v4983_v26  ;;  %v2692_v28 = vpop.f32.mrf.mxu1  ;;  %v3432_v26 = vrot.slane %v3430_v59, 5  ;;  %v3450_v56 = vrot.slane %v3448_v34, 4 }
 0x227   : > { %4198 = vst [vmem:[%s6354_s9 + $0x20] sm:$0xff] %v4166_v49  ;;  %v3701_v6 = vadd.f32 %v3628_v27, %v3047_v0  ;;  %v3878_v0 = vrot.slane %v6413_v20, 5  ;;  %v3437_v20 = vrot.slane %v3435_v33, 4 }
 0x228   : > { %v3433_v13 = vsel %vm5296_vm3, %v3428_v43, %v3432_v26  ;;  %v3532_v26 = vunpack.c.l.b16 %v3423_v24 }
 0x229   : > { %v4099_v15 = vadd.f32 %v4026_v57, %v3701_v6  ;;  %v2977_v25 = vpop.f32.mrf.mxu2  ;;  %v5095_v57 = vld [vmem:[%s5284_s19 + $0xac] sm:$0xf]  ;;  %v3440_v6 = vrot.slane %v3438_v31, 5  ;;  %v3880_v42 = vrot.slane %v3878_v0, 4  ;;  %v3533_v61 = vunpack.c.l.b16 %v3433_v13 }
 0x22a   : > { %v3048_v63 = vadd.f32 %v2977_v25, %v2761_v12  ;;  %v2546_v35 = vrot.slane %v5095_v57, 5  ;;  %v3881_v25 = vrot.slane %v6434_v47, 5  ;;  %v3454_v47 = vshll.u32 %v6470_v41, 16 }
 0x22b   : > { %v4135_v4 = vadd.f32 %v6323_v7, %v4099_v15  ;;  %4881 = vmatmul.msk.bf16.gmra.mxu3 %vm701_vm4, %v3551_v48  ;;  %v6464_v48 = vrot.slane %v3444_v60, 5  ;;  %v2762_v15 = vadd.f32 %v2692_v28, %v5839_v44  ;;  %v3879_v44 = vsel %vm5470_vm7, %v4914_v16, %v3878_v0 }
 0x22c   : > { %v2548_v23 = vrot.slane %v2546_v35, 4  ;;  %v3441_v28 = vor.u32 %v3440_v6, %v3437_v20  ;;  %v3882_v34 = vsel %vm5470_vm7, %v3880_v42, %v3881_v25  ;;  %v3552_v57 = vpack.c.b16 %v3533_v61, %v3532_v26 }
 0x22d   : > { %v4167_v38 = vmax.f32 %v4135_v4, 0.0  ;;  %v4029_v11 = vpop.f32.mrf.mxu0  ;;  %v3451_v33 = vor.u32 %v3450_v56, %v6464_v48  ;;  %v3931_v24 = vunpack.c.l.b16 %v3882_v34  ;;  %v3456_v46 = vrot.slane %v3454_v47, 5  ;;  %v4673_v47 = vld [vmem:[%s5284_s19 + $0xb4] sm:$0xe] }
 0x22e   : > { %v3631_v54 = vpop.f32.mrf.mxu3  ;;  %v2695_v49 = vpop.f32.mrf.mxu1  ;;  %v3442_v13 = vrot.slane %v3441_v28, 4 }
 0x22f   : > { %4199 = vst [vmem:[%s6354_s9 + $0x28] sm:$0xff] %v4167_v38  ;;  %v3702_v27 = vadd.f32 %v3631_v54, %v3048_v63  ;;  %v3452_v16 = vrot.slane %v3451_v33, 4  ;;  %v2763_v6 = vadd.f32 %v2695_v49, %v5853_v30  ;;  %v3885_v30 = vrot.slane %v6447_v55, 5  ;;  %v6496_v49 = vld [vmem:[%s5284_s19 + $0xc4] sm:$0xf] }
 0x230   : > { %4930 = vmatmul.msk.bf16.gmra.mxu0 %vm701_vm4, %v3949_v14  ;;  %v5096_v14 = vld [vmem:[%s5284_s19 + $0xb0] sm:$0x1]  ;;  %v3468_v55 = vshll.u32 %v6496_v49, 16 }
 0x231   : > { %v4100_v59 = vadd.f32 %v4029_v11, %v3702_v27  ;;  %v2979_v12 = vpop.f32.mrf.mxu2  ;;  %4704 = vmatmul.msk.bf16.gmra.mxu1 %vm701_vm4, %v2611_v10  ;;  %v2549_v4 = vrot.slane %v5096_v14, 5  ;;  %v2547_v10 = vsel %vm5470_vm7, %v4688_v3, %v2546_v35  ;;  %v3930_v27 = vunpack.c.l.b16 %v3879_v44  ;;  %v4863_v35 = vld [vmem:[%s5284_s19 + $0xc0] sm:$0xf]  ;;  %v5097_v44 = vld [vmem:[%s5284_s19 + $0xb8] sm:$0xf] }
 0x232   : > { %v3049_v43 = vadd.f32 %v2979_v12, %v2762_v15  ;;  %v2553_v28 = vrot.slane %v5097_v44, 5  ;;  %v3462_v33 = vshll.u32 %v4863_v35, 16 }
 0x233   : > { %v4136_v63 = vadd.f32 %v6323_v7, %v4100_v59  ;;  %v2550_v0 = vsel %vm5470_vm7, %v2548_v23, %v2549_v4  ;;  %v2593_v59 = vunpack.c.l.b16 %v2547_v10  ;;  %v3950_v25 = vpack.c.b16 %v3931_v24, %v3930_v27 }
 0x234   : > { %v2594_v15 = vunpack.c.l.b16 %v2550_v0  ;;  %v3457_v4 = vsel %vm5296_vm3, %v3452_v16, %v3456_v46  ;;  %v3887_v10 = vrot.slane %v3885_v30, 4  ;;  %v3888_v27 = vrot.slane %v6470_v41, 5 }
 0x235   : > { %v4168_v31 = vmax.f32 %v4136_v63, 0.0  ;;  %v4031_v60 = vpop.f32.mrf.mxu0  ;;  %v4899_v63 = vld [vmem:[%s5284_s19 + $0xb4] sm:$0xe]  ;;  %v3535_v34 = vunpack.c.l.b16 %v3457_v4  ;;  %v4689_v16 = vrot.slane %v4673_v47, 9  ;;  %v2555_v46 = vrot.slane %v2553_v28, 4 }
 0x236   : > { %v3633_v38 = vpop.f32.mrf.mxu3  ;;  %4817 = vmatmul.msk.bf16.gmra.mxu2 %vm701_vm4, %v4984_v62  ;;  %v2697_v11 = vpop.f32.mrf.mxu1  ;;  %v3447_v62 = vsel %vm5296_vm3, %v3442_v13, %v6464_v48  ;;  %v2612_v14 = vpack.c.b16 %v2594_v15, %v2593_v59  ;;  %v4985_v13 = vld [vmem:[%s5284_s19 + $0xb4] sm:$0xff] }
 0x237   : > { %4200 = vst [vmem:[%s6354_s9 + $0x30] sm:$0xff] %v4168_v31  ;;  %v3703_v54 = vadd.f32 %v3633_v38, %v3049_v43  ;;  %v3459_v43 = vshrl.u32 %v4863_v35, 16  ;;  %v3472_v31 = vshrl.u32 %v6496_v49, 16  ;;  %v4915_v38 = vrot.slane %v4899_v63, 9 }
 0x238   : > { %v3470_v35 = vrot.slane %v3468_v55, 5 }
 0x239   : > { %v4101_v20 = vadd.f32 %v4031_v60, %v3703_v54  ;;  %v2982_v56 = vpop.f32.mrf.mxu2  ;;  %v3534_v60 = vunpack.c.l.b16 %v3447_v62  ;;  %v2764_v54 = vadd.f32 %v2697_v11, %v5866_v51  ;;  %v3461_v24 = vrot.slane %v3459_v43, 4 }
 0x23a   : > { %v3050_v42 = vadd.f32 %v2982_v56, %v2763_v6  ;;  %v3464_v56 = vrot.slane %v3462_v33, 5  ;;  %v3886_v41 = vsel %vm5470_vm7, %v4915_v38, %v3885_v30 }
 0x23b   : > { %v4137_v12 = vadd.f32 %v6323_v7, %v4101_v20  ;;  %4882 = vmatmul.msk.bf16.gmra.mxu3 %vm701_vm4, %v3552_v57  ;;  %v5098_v20 = vld [vmem:[%s5284_s19 + $0xbc] sm:$0x1]  ;;  %v3553_v43 = vpack.c.b16 %v3535_v34, %v3534_v60  ;;  %v3932_v44 = vunpack.c.l.b16 %v3886_v41 }
 0x23c   : > { %v2556_v6 = vrot.slane %v5098_v20, 5  ;;  %v3465_v4 = vor.u32 %v3464_v56, %v3461_v24  ;;  %v3892_v24 = vrot.slane %v6496_v49, 5 }
 0x23d   : > { %v4169_v3 = vmax.f32 %v4137_v12, 0.0  ;;  %v4034_v23 = vpop.f32.mrf.mxu0  ;;  %v3474_v12 = vrot.slane %v3472_v31, 4 }
 0x23e   : > { %v3636_v26 = vpop.f32.mrf.mxu3  ;;  %v2700_v61 = vpop.f32.mrf.mxu1  ;;  %v3466_v38 = vrot.slane %v3465_v4, 4 }
 0x23f   : > { %4201 = vst [vmem:[%s6354_s9 + $0x38] sm:$0xff] %v4169_v3  ;;  %v3704_v48 = vadd.f32 %v3636_v26, %v3050_v42  ;;  %v6514_v42 = vld [vmem:[%s5284_s19 + $0xc8] sm:$0x1]  ;;  %v3475_v26 = vor.u32 %v3474_v12, %v3470_v35  ;;  %v2765_v47 = vadd.f32 %v2700_v61, %v5882_v1 }
 0x240   : > { %4931 = vmatmul.msk.bf16.gmra.mxu0 %vm701_vm4, %v3950_v25  ;;  %v3889_v25 = vsel %vm5470_vm7, %v3887_v10, %v3888_v27  ;;  %v3478_v30 = vshll.u32 %v6514_v42, 16 }
 0x241   : > { %v4102_v0 = vadd.f32 %v4034_v23, %v3704_v48  ;;  %v2984_v57 = vpop.f32.mrf.mxu2  ;;  %4705 = vmatmul.msk.bf16.gmra.mxu1 %vm701_vm4, %v2612_v14  ;;  %v2554_v23 = vsel %vm5470_vm7, %v4689_v16, %v2553_v28  ;;  %v2557_v14 = vsel %vm5470_vm7, %v2555_v46, %v2556_v6  ;;  %v3933_v33 = vunpack.c.l.b16 %v3889_v25  ;;  %v6534_v16 = vld [vmem:[%s5284_s19 + $0xd0] sm:$0xf]  ;;  %v5099_v6 = vld [vmem:[%s5284_s19 + $0xc4] sm:$0xf] }
 0x242   : > { %v3051_v15 = vadd.f32 %v2984_v57, %v2764_v54  ;;  %v2595_v28 = vunpack.c.l.b16 %v2554_v23  ;;  %v2596_v31 = vunpack.c.l.b16 %v2557_v14  ;;  %v3476_v34 = vrot.slane %v3475_v26, 4  ;;  %v4900_v57 = vld [vmem:[%s5284_s19 + $0xc0] sm:$0xe] }
 0x243   : > { %v4138_v59 = vadd.f32 %v6323_v7, %v4102_v0  ;;  %v3480_v0 = vrot.slane %v3478_v30, 5  ;;  %v3951_v54 = vpack.c.b16 %v3933_v33, %v3932_v44  ;;  %v2560_v56 = vrot.slane %v5099_v6, 5  ;;  %v6699_v14 = vld [vmem:[#allocation5_spill] sm:$0xff] }
 0x244   : > { %v2613_v61 = vpack.c.b16 %v2596_v31, %v2595_v28  ;;  %v3492_v25 = vshll.u32 %v6534_v16, 16  ;;  %v4986_v26 = vld [vmem:[%s5284_s19 + $0xc0] sm:$0xff] }
 0x245   : > { %v4170_v51 = vmax.f32 %v4138_v59, 0.0  ;;  %v4036_v11 = vpop.f32.mrf.mxu0  ;;  %v3481_v12 = vsel %vm5296_vm3, %v3476_v34, %v3480_v0  ;;  %v2562_v33 = vrot.slane %v2560_v56, 4 }
 0x246   : > { %v3638_v62 = vpop.f32.mrf.mxu3  ;;  %4818 = vmatmul.msk.bf16.gmra.mxu2 %vm701_vm4, %v4985_v13  ;;  %v2702_v3 = vpop.f32.mrf.mxu1  ;;  %v4866_v13 = vld [vmem:[%s5284_s19 + $0xcc] sm:$0xf]  ;;  %v3537_v31 = vunpack.c.l.b16 %v3481_v12 }
 0x247   : > { %4202 = vst [vmem:[%s6354_s9 + $0x40] sm:$0xff] %v4170_v51  ;;  %v3705_v63 = vadd.f32 %v3638_v62, %v3051_v15  ;;  %v3471_v15 = vsel %vm5296_vm3, %v3466_v38, %v3470_v35  ;;  %v4916_v51 = vrot.slane %v4900_v57, 9  ;;  %v3483_v49 = vshrl.u32 %v4866_v13, 16  ;;  %v4868_v57 = vld [vmem:[%s5284_s19 + $0xd4] sm:$0x1] }
 0x248   : > { %v3486_v41 = vshll.u32 %v4866_v13, 16  ;;  %v3496_v62 = vshrl.u32 %v6534_v16, 16  ;;  %v2766_v4 = vadd.f32 %v2702_v3, %v6699_v14  ;;  %v3894_v35 = vrot.slane %v3892_v24, 4 }
 0x249   : > { %v4103_v48 = vadd.f32 %v4036_v11, %v3705_v63  ;;  %v2987_v55 = vpop.f32.mrf.mxu2  ;;  %v4674_v11 = vld [vmem:[%s5284_s19 + $0xc0] sm:$0xe]  ;;  %v3536_v30 = vunpack.c.l.b16 %v3471_v15  ;;  %v3893_v3 = vsel %vm5470_vm7, %v4916_v51, %v3892_v24  ;;  %v3485_v38 = vrot.slane %v3483_v49, 4 }
 0x24a   : > { %v3052_v60 = vadd.f32 %v2987_v55, %v2765_v47  ;;  %v4690_v44 = vrot.slane %v4674_v11, 9  ;;  %v3498_v34 = vrot.slane %v3496_v62, 4  ;;  %v3934_v6 = vunpack.c.l.b16 %v3893_v3 }
 0x24b   : > { %v4139_v10 = vadd.f32 %v6323_v7, %v4103_v48  ;;  %4883 = vmatmul.msk.bf16.gmra.mxu3 %vm701_vm4, %v3553_v43  ;;  %v3895_v43 = vrot.slane %v6514_v42, 5  ;;  %v5100_v48 = vld [vmem:[%s5284_s19 + $0xc8] sm:$0x1]  ;;  %v3502_v51 = vshll.u32 %v4868_v57, 16 }
 0x24c   : > { %v2563_v47 = vrot.slane %v5100_v48, 5 }
 0x24d   : > { %v4171_v27 = vmax.f32 %v4139_v10, 0.0  ;;  %v4039_v1 = vpop.f32.mrf.mxu0  ;;  %v3488_v10 = vrot.slane %v3486_v41, 5 }
 0x24e   : > { %v3641_v46 = vpop.f32.mrf.mxu3  ;;  %v2705_v20 = vpop.f32.mrf.mxu1  ;;  %v2564_v24 = vsel %vm5470_vm7, %v2562_v33, %v2563_v47 }
 0x24f   : > { %4203 = vst [vmem:[%s6354_s9 + $0x48] sm:$0xff] %v4171_v27  ;;  %v3706_v59 = vadd.f32 %v3641_v46, %v3052_v60  ;;  %v3494_v60 = vrot.slane %v3492_v25, 5  ;;  %v3554_v46 = vpack.c.b16 %v3537_v31, %v3536_v30  ;;  %v3489_v15 = vor.u32 %v3488_v10, %v3485_v38 }
 0x250   : > { %4932 = vmatmul.msk.bf16.gmra.mxu0 %vm701_vm4, %v3951_v54  ;;  %v3896_v54 = vsel %vm5470_vm7, %v3894_v35, %v3895_v43  ;;  %v2767_v49 = vadd.f32 %v2705_v20, %v5918_v52  ;;  %v2598_v62 = vunpack.c.l.b16 %v2564_v24  ;;  %v3504_v35 = vrot.slane %v3502_v51, 5 }
 0x251   : > { %v4104_v23 = vadd.f32 %v4039_v1, %v3706_v59  ;;  %v2989_v63 = vpop.f32.mrf.mxu2  ;;  %4706 = vmatmul.msk.bf16.gmra.mxu1 %vm701_vm4, %v2613_v61  ;;  %v2561_v61 = vsel %vm5470_vm7, %v4690_v44, %v2560_v56  ;;  %v3935_v59 = vunpack.c.l.b16 %v3896_v54  ;;  %v3499_v12 = vor.u32 %v3498_v34, %v3494_v60  ;;  %v4901_v44 = vld [vmem:[%s5284_s19 + $0xcc] sm:$0xe] }
 0x252   : > { %v3053_v28 = vadd.f32 %v2989_v63, %v2766_v4  ;;  %v2597_v25 = vunpack.c.l.b16 %v2561_v61  ;;  %v3490_v4 = vrot.slane %v3489_v15, 4  ;;  %v3899_v52 = vrot.slane %v6534_v16, 5  ;;  %v4987_v34 = vld [vmem:[%s5284_s19 + $0xcc] sm:$0xff] }
 0x253   : > { %v4140_v55 = vadd.f32 %v6323_v7, %v4104_v23  ;;  %v3952_v14 = vpack.c.b16 %v3935_v59, %v3934_v6  ;;  %v3500_v63 = vrot.slane %v3499_v12, 4  ;;  %v3902_v10 = vrot.slane %v4868_v57, 5 }
 0x254   : > { %v2614_v30 = vpack.c.b16 %v2598_v62, %v2597_v25  ;;  %v3495_v47 = vsel %vm5296_vm3, %v3490_v4, %v3494_v60  ;;  %v3901_v16 = vrot.slane %v3899_v52, 4 }
 0x255   : > { %v4172_v42 = vmax.f32 %v4140_v55, 0.0  ;;  %v4041_v0 = vpop.f32.mrf.mxu0  ;;  %v3505_v55 = vsel %vm5296_vm3, %v3500_v63, %v3504_v35  ;;  %v3538_v54 = vunpack.c.l.b16 %v3495_v47 }
 0x256   : > { %v3643_v27 = vpop.f32.mrf.mxu3  ;;  %4819 = vmatmul.msk.bf16.gmra.mxu2 %vm701_vm4, %v4986_v26  ;;  %v2707_v1 = vpop.f32.mrf.mxu1 }
 0x257   : > { %4204 = vst [vmem:[%s6354_s9 + $0x50] sm:$0xff] %v4172_v42  ;;  %v3707_v13 = vadd.f32 %v3643_v27, %v3053_v28  ;;  %v4917_v28 = vrot.slane %v4901_v44, 9  ;;  %v2768_v3 = vadd.f32 %v2707_v1, %v5938_v21  ;;  %v3539_v27 = vunpack.c.l.b16 %v3505_v55 }
 0x258   : > { %v3903_v21 = vsel %vm5470_vm7, %v3901_v16, %v3902_v10 }
 0x259   : > { %v4105_v11 = vadd.f32 %v4041_v0, %v3707_v13  ;;  %v2992_v41 = vpop.f32.mrf.mxu2  ;;  %v3900_v36 = vsel %vm5470_vm7, %v4917_v28, %v3899_v52  ;;  %v3555_v13 = vpack.c.b16 %v3539_v27, %v3538_v54  ;;  %v3937_v6 = vunpack.c.l.b16 %v3903_v21 }
 0x25a   : > { %v3054_v23 = vadd.f32 %v2992_v41, %v2767_v49 }
 0x25b   : > { %v4141_v56 = vadd.f32 %v6323_v7, %v4105_v11  ;;  %4884 = vmatmul.msk.bf16.gmra.mxu3 %vm701_vm4, %v3554_v46  ;;  %v3936_v46 = vunpack.c.l.b16 %v3900_v36 }
 0x25d   : > { %v4173_v43 = vmax.f32 %v4141_v56, 0.0  ;;  %v4044_v26 = vpop.f32.mrf.mxu0  ;;  %v3953_v11 = vpack.c.b16 %v3937_v6, %v3936_v46 }
 0x25e   : > { %v3646_v20 = vpop.f32.mrf.mxu3  ;;  %v2710_v33 = vpop.f32.mrf.mxu1 }
 0x25f   : > { %4205 = vst [vmem:[%s6354_s9 + $0x58] sm:$0xff] %v4173_v43  ;;  %v3708_v48 = vadd.f32 %v3646_v20, %v3054_v23  ;;  %v2769_v15 = vadd.f32 %v2710_v33, %v5957_v29 }
 0x260   : > { %4933 = vmatmul.msk.bf16.gmra.mxu0 %vm701_vm4, %v3952_v14  ;;  %v6700_v14 = vld [vmem:[#allocation6_spill] sm:$0xff] }
 0x261   : > { %v4106_v31 = vadd.f32 %v4044_v26, %v3708_v48  ;;  %v2994_v38 = vpop.f32.mrf.mxu2  ;;  %4707 = vmatmul.msk.bf16.gmra.mxu1 %vm701_vm4, %v2614_v30 }
 0x262   : > { %v3055_v0 = vadd.f32 %v2994_v38, %v2768_v3 }
 0x263   : > { %v4142_v42 = vadd.f32 %v6323_v7, %v4106_v31 }
 0x265   : > { %v4174_v60 = vmax.f32 %v4142_v42, 0.0  ;;  %v4046_v61 = vpop.f32.mrf.mxu0 }
 0x266   : > { %v3648_v1 = vpop.f32.mrf.mxu3  ;;  %4820 = vmatmul.msk.bf16.gmra.mxu2 %vm701_vm4, %v4987_v34  ;;  %v2712_v24 = vpop.f32.mrf.mxu1 }
 0x267   : > { %4206 = vst [vmem:[%s6354_s9 + $0x60] sm:$0xff] %v4174_v60  ;;  %v3709_v57 = vadd.f32 %v3648_v1, %v3055_v0  ;;  %v2770_v4 = vadd.f32 %v2712_v24, %v6700_v14 }
 0x269   : > { %v4107_v59 = vadd.f32 %v4046_v61, %v3709_v57  ;;  %v2997_v12 = vpop.f32.mrf.mxu2 }
 0x26a   : > { %v3056_v18 = vadd.f32 %v2997_v12, %v2769_v15 }
 0x26b   : > { %v4143_v51 = vadd.f32 %v6323_v7, %v4107_v59  ;;  %4885 = vmatmul.msk.bf16.gmra.mxu3 %vm701_vm4, %v3555_v13 }
 0x26d   : > { %v4175_v49 = vmax.f32 %v4143_v51, 0.0  ;;  %v4049_v41 = vpop.f32.mrf.mxu0 }
 0x26e   : > { %v3651_v25 = vpop.f32.mrf.mxu3  ;;  %v2715_v62 = vpop.f32.mrf.mxu1 }
 0x26f   : > { %4207 = vst [vmem:[%s6354_s9 + $0x68] sm:$0xff] %v4175_v49  ;;  %v3710_v56 = vadd.f32 %v3651_v25, %v3056_v18  ;;  %v2771_v33 = vadd.f32 %v2715_v62, %v6000_v5 }
 0x270   : > { %4934 = vmatmul.msk.bf16.gmra.mxu0 %vm701_vm4, %v3953_v11 }
 0x271   : > { %v4108_v23 = vadd.f32 %v4049_v41, %v3710_v56  ;;  %v2999_v29 = vpop.f32.mrf.mxu2 }
 0x272   : > { %v3057_v35 = vadd.f32 %v2999_v29, %v2770_v4 }
 0x273   : > { %v4144_v63 = vadd.f32 %v6323_v7, %v4108_v23 }
 0x275   : > { %v4176_v43 = vmax.f32 %v4144_v63, 0.0  ;;  %v4051_v26 = vpop.f32.mrf.mxu0 }
 0x276   : > { %v3653_v30 = vpop.f32.mrf.mxu3  ;;  %v2717_v44 = vpop.f32.mrf.mxu1 }
 0x277   : > { %4208 = vst [vmem:[%s6354_s9 + $0x70] sm:$0xff] %v4176_v43  ;;  %v3711_v52 = vadd.f32 %v3653_v30, %v3057_v35  ;;  %v2772_v34 = vadd.f32 %v2717_v44, %v6024_v22 }
 0x279   : > { %v4109_v20 = vadd.f32 %v4051_v26, %v3711_v52  ;;  %v3002_v48 = vpop.f32.mrf.mxu2 }
 0x27a   : > { %v3058_v55 = vadd.f32 %v3002_v48, %v2771_v33  ;;  %v6611_v33 = vld [vmem:[%s6688_s2] ss:$0 sm:$0xff] }
 0x27b   : > { %v4145_v47 = vadd.f32 %v6323_v7, %v4109_v20 }
 0x27d   : > { %v4177_v28 = vmax.f32 %v4145_v47, 0.0  ;;  %v4054_v31 = vpop.f32.mrf.mxu0 }
 0x27e   : > { %v3656_v3 = vpop.f32.mrf.mxu3  ;;  %v2720_v38 = vpop.f32.mrf.mxu1 }
 0x27f   : > { %4209 = vst [vmem:[%s6354_s9 + $0x78] sm:$0xff] %v4177_v28  ;;  %v3712_v16 = vadd.f32 %v3656_v3, %v3058_v55  ;;  %v2773_v1 = vadd.f32 %v2720_v38, %v6043_v19 }
 0x281   : > { %v4110_v10 = vadd.f32 %v4054_v31, %v3712_v16  ;;  %v3004_v42 = vpop.f32.mrf.mxu2 }
 0x282   : > { %v3059_v54 = vadd.f32 %v3004_v42, %v2772_v34 }
 0x283   : > { %v4146_v0 = vadd.f32 %v6323_v7, %v4110_v10 }
 0x285   : > { %v4178_v5 = vmax.f32 %v4146_v0, 0.0  ;;  %v4056_v27 = vpop.f32.mrf.mxu0 }
 0x286   : > { %v3658_v60 = vpop.f32.mrf.mxu3  ;;  %v2722_v61 = vpop.f32.mrf.mxu1 }
 0x287   : > { %4210 = vst [vmem:[%s6354_s9 + $0x80] sm:$0xff] %v4178_v5  ;;  %v3713_v36 = vadd.f32 %v3658_v60, %v3059_v54  ;;  %v2774_v51 = vadd.f32 %v2722_v61, %v6067_v53  ;;  %v6701_v60 = vld [vmem:[#allocation7_spill] sm:$0xff] }
 0x289   : > { %v4111_v21 = vadd.f32 %v4056_v27, %v3713_v36  ;;  %v3007_v24 = vpop.f32.mrf.mxu2 }
 0x28a   : > { %v3060_v13 = vadd.f32 %v3007_v24, %v2773_v1 }
 0x28b   : > { %v4147_v57 = vadd.f32 %v6323_v7, %v4111_v21 }
 0x28d   : > { %v4179_v22 = vmax.f32 %v4147_v57, 0.0  ;;  %v4059_v46 = vpop.f32.mrf.mxu0 }
 0x28e   : > { %v3661_v6 = vpop.f32.mrf.mxu3  ;;  %v2725_v59 = vpop.f32.mrf.mxu1 }
 0x28f   : > { %4211 = vst [vmem:[%s6354_s9 + $0x88] sm:$0xff] %v4179_v22  ;;  %v3714_v15 = vadd.f32 %v3661_v6, %v3060_v13  ;;  %v2775_v14 = vadd.f32 %v2725_v59, %v6086_v2 }
 0x291   : > { %v4112_v12 = vadd.f32 %v4059_v46, %v3714_v15  ;;  %v3009_v18 = vpop.f32.mrf.mxu2 }
 0x292   : > { %v3061_v49 = vadd.f32 %v3009_v18, %v2774_v51 }
 0x293   : > { %v4148_v11 = vadd.f32 %v6323_v7, %v4112_v12 }
 0x295   : > { %v4180_v19 = vmax.f32 %v4148_v11, 0.0  ;;  %v4061_v41 = vpop.f32.mrf.mxu0 }
 0x296   : > { %v3663_v25 = vpop.f32.mrf.mxu3  ;;  %v2727_v62 = vpop.f32.mrf.mxu1 }
 0x297   : > { %4212 = vst [vmem:[%s6354_s9 + $0x90] sm:$0xff] %v4180_v19  ;;  %v3715_v56 = vadd.f32 %v3663_v25, %v3061_v49  ;;  %v2776_v52 = vadd.f32 %v2727_v62, %v6110_v40 }
 0x299   : > { %v4113_v23 = vadd.f32 %v4061_v41, %v3715_v56  ;;  %v3012_v4 = vpop.f32.mrf.mxu2 }
 0x29a   : > { %v3062_v63 = vadd.f32 %v3012_v4, %v2775_v14 }
 0x29b   : > { %v4149_v29 = vadd.f32 %v6323_v7, %v4113_v23 }
 0x29d   : > { %v4181_v35 = vmax.f32 %v4149_v29, 0.0  ;;  %v4064_v53 = vpop.f32.mrf.mxu0 }
 0x29e   : > { %v3666_v43 = vpop.f32.mrf.mxu3  ;;  %v2730_v26 = vpop.f32.mrf.mxu1 }
 0x29f   : > { %4213 = vst [vmem:[%s6354_s9 + $0x98] sm:$0xff] %v4181_v35  ;;  %v3716_v30 = vadd.f32 %v3666_v43, %v3062_v63  ;;  %v2777_v38 = vadd.f32 %v2730_v26, %v6129_v8 }
 0x2a1   : > { %v4114_v44 = vadd.f32 %v4064_v53, %v3716_v30  ;;  %v3014_v20 = vpop.f32.mrf.mxu2 }
 0x2a2   : > { %v3063_v7 = vadd.f32 %v3014_v20, %v2776_v52 }
 0x2a3   : > { %v4150_v2 = vadd.f32 %v6611_v33, %v4114_v44 }
 0x2a5   : > { %v4182_v48 = vmax.f32 %v4150_v2, 0.0  ;;  %v4066_v47 = vpop.f32.mrf.mxu0 }
 0x2a6   : > { %v3668_v55 = vpop.f32.mrf.mxu3  ;;  %v2732_v28 = vpop.f32.mrf.mxu1 }
 0x2a7   : > { %4214 = vst [vmem:[%s6354_s9 + $0xa0] sm:$0xff] %v4182_v48  ;;  %v3717_v31 = vadd.f32 %v3668_v55, %v3063_v7  ;;  %v2778_v61 = vadd.f32 %v2732_v28, %v6701_v60 }
 0x2a9   : > { %v4115_v3 = vadd.f32 %v4066_v47, %v3717_v31  ;;  %v3017_v40 = vpop.f32.mrf.mxu2 }
 0x2aa   : > { %v3064_v10 = vadd.f32 %v3017_v40, %v2777_v38 }
 0x2ab   : > { %v4151_v16 = vadd.f32 %v6611_v33, %v4115_v3 }
 0x2ad   : > { %v4183_v34 = vmax.f32 %v4151_v16, 0.0  ;;  %v4069_v42 = vpop.f32.mrf.mxu0 }
 0x2ae   : > { %v3671_v0 = vpop.f32.mrf.mxu3  ;;  %v2735_v54 = vpop.f32.mrf.mxu1 }
 0x2af   : > { %4215 = vst [vmem:[%s6354_s9 + $0xa8] sm:$0xff] %v4183_v34  ;;  %v3718_v5 = vadd.f32 %v3671_v0, %v3064_v10  ;;  %v2779_v6 = vadd.f32 %v2735_v54, %v6170_v17 }
 0x2b1   : > { %v4116_v27 = vadd.f32 %v4069_v42, %v3718_v5  ;;  %v3019_v36 = vpop.f32.mrf.mxu2 }
 0x2b2   : > { %v3065_v1 = vadd.f32 %v3019_v36, %v2778_v61 }
 0x2b3   : > { %v4152_v21 = vadd.f32 %v6611_v33, %v4116_v27 }
 0x2b5   : > { %v4184_v8 = vmax.f32 %v4152_v21, 0.0  ;;  %v4071_v24 = vpop.f32.mrf.mxu0 }
 0x2b6   : > { %v3673_v57 = vpop.f32.mrf.mxu3  ;;  %v2737_v13 = vpop.f32.mrf.mxu1 }
 0x2b7   : > { %4216 = vst [vmem:[%s6354_s9 + $0xb0] sm:$0xff] %v4184_v8  ;;  %v3719_v22 = vadd.f32 %v3673_v57, %v3065_v1  ;;  %v2780_v25 = vadd.f32 %v2737_v13, %v6191_v50 }
 0x2b9   : > { %v4117_v46 = vadd.f32 %v4071_v24, %v3719_v22  ;;  %v3022_v59 = vpop.f32.mrf.mxu2 }
 0x2ba   : > { %v3066_v12 = vadd.f32 %v3022_v59, %v2779_v6 }
 0x2bb   : > { %v4153_v15 = vadd.f32 %v6611_v33, %v4117_v46 }
 0x2bd   : > { %v4185_v51 = vmax.f32 %v4153_v15, 0.0  ;;  %v4074_v18 = vpop.f32.mrf.mxu0 }
 0x2be   : > { %v3676_v11 = vpop.f32.mrf.mxu3  ;;  %v2740_v49 = vpop.f32.mrf.mxu1 }
 0x2bf   : > { %4217 = vst [vmem:[%s6354_s9 + $0xb8] sm:$0xff] %v4185_v51  ;;  %v3720_v19 = vadd.f32 %v3676_v11, %v3066_v12  ;;  %v2781_v53 = vadd.f32 %v2740_v49, %v6209_v9 }
 0x2c1   : > { %v4118_v41 = vadd.f32 %v4074_v18, %v3720_v19  ;;  %v3024_v62 = vpop.f32.mrf.mxu2 }
 0x2c2   : > { %v3067_v23 = vadd.f32 %v3024_v62, %v2780_v25 }
 0x2c3   : > { %v4154_v56 = vadd.f32 %v6611_v33, %v4118_v41 }
 0x2c5   : > { %v4186_v17 = vmax.f32 %v4154_v56, 0.0  ;;  %v4076_v14 = vpop.f32.mrf.mxu0 }
 0x2c6   : > { %v3678_v4 = vpop.f32.mrf.mxu3  ;;  %v2742_v29 = vpop.f32.mrf.mxu1 }
 0x2c7   : > { %4218 = vst [vmem:[%s6354_s9 + $0xc0] sm:$0xff] %v4186_v17  ;;  %v3721_v63 = vadd.f32 %v3678_v4, %v3067_v23  ;;  %v2782_v48 = vadd.f32 %v2742_v29, %v6232_v45 }
 0x2c9   : > { %v4119_v35 = vadd.f32 %v4076_v14, %v3721_v63  ;;  %v3027_v43 = vpop.f32.mrf.mxu2 }
 0x2ca   : > { %v3068_v30 = vadd.f32 %v3027_v43, %v2781_v53 }
 0x2cb   : > { %v4155_v26 = vadd.f32 %v6611_v33, %v4119_v35 }
 0x2cd   : > { %v4187_v50 = vmax.f32 %v4155_v26, 0.0  ;;  %v4079_v44 = vpop.f32.mrf.mxu0 }
 0x2ce   : > { %v3681_v52 = vpop.f32.mrf.mxu3  ;;  %v2745_v2 = vpop.f32.mrf.mxu1 }
 0x2cf   : > { %4219 = vst [vmem:[%s6354_s9 + $0xc8] sm:$0xff] %v4187_v50  ;;  %v3722_v20 = vadd.f32 %v3681_v52, %v3068_v30  ;;  %v2783_v16 = vadd.f32 %v2745_v2, %v6252_v37 }
 0x2d1   : > { %v4120_v7 = vadd.f32 %v4079_v44, %v3722_v20  ;;  %v3029_v47 = vpop.f32.mrf.mxu2 }
 0x2d2   : > { %v3069_v28 = vadd.f32 %v3029_v47, %v2782_v48 }
 0x2d3   : > { %v4156_v55 = vadd.f32 %v6611_v33, %v4120_v7 }
 0x2d5   : > { %v4188_v9 = vmax.f32 %v4156_v55, 0.0  ;;  %v4081_v31 = vpop.f32.mrf.mxu0 }
 0x2d6   : > { %v3683_v3 = vpop.f32.mrf.mxu3  ;;  %v2747_v34 = vpop.f32.mrf.mxu1 }
 0x2d7   : > { %4220 = vst [vmem:[%s6354_s9 + $0xd0] sm:$0xff] %v4188_v9  ;;  %v3723_v38 = vadd.f32 %v3683_v3, %v3069_v28  ;;  %v2784_v61 = vadd.f32 %v2747_v34, %v6275_v58 }
 0x2d9   : > { %v4121_v40 = vadd.f32 %v4081_v31, %v3723_v38  ;;  %v3032_v10 = vpop.f32.mrf.mxu2 }
 0x2da   : > { %v3070_v0 = vadd.f32 %v3032_v10, %v2783_v16 }
 0x2db   : > { %v4157_v42 = vadd.f32 %v6611_v33, %v4121_v40 }
 0x2dd   : > { %v4189_v45 = vmax.f32 %v4157_v42, 0.0  ;;  %v4084_v54 = vpop.f32.mrf.mxu0 }
 0x2de   : > { %v3686_v5 = vpop.f32.mrf.mxu3  ;;  %v2750_v37 = vpop.f32.mrf.mxu1 }
 0x2df   : > { %4221 = vst [vmem:[%s6354_s9 + $0xd8] sm:$0xff] %v4189_v45  ;;  %v3724_v27 = vadd.f32 %v3686_v5, %v3070_v0  ;;  %v2785_v46 = vadd.f32 %v2750_v37, %v6293_v32 }
 0x2e1   : > { %v4122_v60 = vadd.f32 %v4084_v54, %v3724_v27  ;;  %v3034_v36 = vpop.f32.mrf.mxu2 }
 0x2e2   : > { %v3071_v1 = vadd.f32 %v3034_v36, %v2784_v61 }
 0x2e3   : > { %v4158_v21 = vadd.f32 %v6611_v33, %v4122_v60 }
 0x2e5   : > { %v4190_v8 = vmax.f32 %v4158_v21, 0.0  ;;  %v4086_v24 = vpop.f32.mrf.mxu0 }
 0x2e6   : > { %v3688_v57 = vpop.f32.mrf.mxu3  ;;  %v2752_v12 = vpop.f32.mrf.mxu1 }
 0x2e7   : > { %4222 = vst [vmem:[%s6354_s9 + $0xe0] sm:$0xff] %v4190_v8  ;;  %v3725_v13 = vadd.f32 %v3688_v57, %v3071_v1  ;;  %v2786_v19 = vadd.f32 %v2752_v12, %v6314_v39 }
 0x2e9   : > { %v4123_v22 = vadd.f32 %v4086_v24, %v3725_v13  ;;  %v3037_v6 = vpop.f32.mrf.mxu2 }
 0x2ea   : > { %v3072_v15 = vadd.f32 %v3037_v6, %v2785_v46 }
 0x2eb   : > { %v4159_v59 = vadd.f32 %v6611_v33, %v4123_v22 }
 0x2ed   : > { %v4191_v58 = vmax.f32 %v4159_v59, 0.0  ;;  %v4089_v51 = vpop.f32.mrf.mxu0 }
 0x2ee   : > { %v3691_v18 = vpop.f32.mrf.mxu3 }
 0x2ef   : > { %4223 = vst [vmem:[%s6354_s9 + $0xe8] sm:$0xff] %v4191_v58  ;;  %v3726_v11 = vadd.f32 %v3691_v18, %v3072_v15 }
 0x2f1   : > { %v4124_v49 = vadd.f32 %v4089_v51, %v3726_v11  ;;  %v3039_v41 = vpop.f32.mrf.mxu2 }
 0x2f2   : > { %v3073_v32 = vadd.f32 %v3039_v41, %v2786_v19 }
 0x2f3   : > { %v4160_v25 = vadd.f32 %v6611_v33, %v4124_v49 }
 0x2f5   : > { %v4192_v62 = vmax.f32 %v4160_v25, 0.0  ;;  %v4091_v17 = vpop.f32.mrf.mxu0 }
 0x2f6   : > { %v3693_v56 = vpop.f32.mrf.mxu3 }
 0x2f7   : > { %4224 = vst [vmem:[%s6354_s9 + $0xf0] sm:$0xff] %v4192_v62  ;;  %v3727_v23 = vadd.f32 %v3693_v56, %v3073_v32 }
 0x2f9   : > { %v4125_v14 = vadd.f32 %v4091_v17, %v3727_v23 }
 0x2fb   : > { %v4161_v39 = vadd.f32 %v6611_v33, %v4125_v14 }
 0x2fd   : > { %v4193_v4 = vmax.f32 %v4161_v39, 0.0 }
 0x2ff   : > { %4225 = vst [vmem:[%s6354_s9 + $0xf8] sm:$0xff] %v4193_v4 }
 0x300   : > { %5129 = shalt.err (!%p5126_p5)
}
 0x301   : > { %s5182_s5 = smov 128   ;;  %s5183_s9 = smov 8  }
 0x302   : > { %4993 = dma.vmem_to_hbm [thread:$0]  (%p5244_p4), %s4241_s26, 4096, %s4243_s27, %s4227_s15, %s5182_s5, %s5182_s5, %s5183_s9  }
 0x303 PF: > { %p4999_p6 = scmp.ge.s32.totalorder %s5180_s17, 2  ;;  %s4257_s10 = sand.u32 1, %s5160_s12  }
 0x304   : > { %s4258_s11 = scalar_lea.sflag [#allocation3], %s4257_s10 }
 0x305   : > { %p4996_p7 = pnand %p4999_p6, %p5251_p8 }
 0x307   : > { %p4997_p9 = pneg %p4996_p7 }
 0x309   : > { %5155 = dma.done.wait (%p4997_p9), %s4258_s11, 4096  }
 0x30a   : > { %5157 = vsyncadd (%p4997_p9), %s4258_s11, 4294963200  ;;  %s16_s17 = sadd.s32 1, %s5180_s17   ;;  %s6702_s12 = smov %s5164_s13 }
 0x30b   : > { %p13_p10 = scmp.ge.s32.totalorder %s16_s17, 4   ;;  %s6703_s13 = smov %s5168_s14 }
 0x30c   : > { %s6704_s14 = smov %s5257_s25  ;;  %s6705_s15 = smov %s5176_s16 }
 0x30d   : > { %s6706_s16 = smov %s6708_s20  ;;  %15 = sbr.rel (!%p13_p10) target bundleno = 4 (0x4), region = 83 }
 0x312   :  { %4264 = vsyncpa [#allocation3], 1 }
 0x313   :  { %4266 = vsyncpa [#allocation3 + $0x1], 1 }

</bundles_post_ra>
